<compile_context>
chip_gen: v5e
topology: v5e:2x2
jax: 0.10.0
libtpu: 0.0.40
codegen_flags: <defaults>
</compile_context>

<pallas_src>
import math

import numpy as np
import jax
import jax.numpy as jnp
from jax.experimental import pallas as pl
from jax.experimental.pallas import tpu as pltpu

EMBED_DIM = 256
HIDDEN_DIM = 512
NUM_GAUSSIANS = 32
NUM_LAYERS = 5
POS_MIN_PERIOD = 0.005
POS_MAX_PERIOD = 50.0

IN_DIM = EMBED_DIM * 2              # 512 (== HIDDEN_DIM, so all 5 layers are 512x512)
HEAD_DIM = 128                      # fused head width (64 + 32 + 1 + 31 pad)
MEANS_W = NUM_GAUSSIANS * 2         # 64
LW_START = MEANS_W                  # 64
LW_END = LW_START + NUM_GAUSSIANS   # 96
LS_COL = LW_END                     # 96

MAX_TILE_B = 1024                   # per review: amortize per-grid-step overhead


# ----------------------------------------------------------------------------
# Embedding frequency/phase table (matches the PyTorch reference exactly)
# ----------------------------------------------------------------------------
def _build_emb_table():
    # diffusers Timesteps(num_channels=256, flip_sin_to_cos=True,
    #                     downscale_freq_shift=1): emb = [cos(t f) | sin(t f)]
    half_t = EMBED_DIM // 2                                    # 128
    time_freqs = np.exp(-math.log(10000.0) * np.arange(half_t) / (half_t - 1.0))
    # get_2d_sincos_pos_embed: per coord a 128-d 1D sincos embedding
    #   row layout: [sin(x f) | cos(x f) | sin(y f) | cos(y f)]  (64 each)
    half_p = EMBED_DIM // 4                                    # 64
    period = np.exp(np.linspace(math.log(POS_MIN_PERIOD),
                                math.log(POS_MAX_PERIOD), half_p))
    pos_freqs = 2.0 * math.pi / period

    ft = np.zeros(IN_DIM); fx = np.zeros(IN_DIM)
    fy = np.zeros(IN_DIM); ph = np.zeros(IN_DIM)
    hp = math.pi / 2.0                                         # cos(a-pi/2)=sin(a)
    ft[0:128] = time_freqs;   ph[0:128] = 0.0                  # cos(t f)
    ft[128:256] = time_freqs; ph[128:256] = hp                 # sin(t f)
    fx[256:320] = pos_freqs;  ph[256:320] = hp                 # sin(x f)
    fx[320:384] = pos_freqs;  ph[320:384] = 0.0                # cos(x f)
    fy[384:448] = pos_freqs;  ph[384:448] = hp                 # sin(y f)
    fy[448:512] = pos_freqs;  ph[448:512] = 0.0                # cos(y f)
    return np.stack([ft, fx, fy, ph]).astype(np.float32)       # (4, 512)


_EMB_TABLE = _build_emb_table()


# ----------------------------------------------------------------------------
# Pallas kernel: in-kernel embedding, 5x (Linear + EUP-routed SiLU),
# fused 128-wide head, log_softmax folded into one packed lane-dense store.
# ----------------------------------------------------------------------------
def _denoiser_kernel(txy_ref, tbl_ref, w_ref, b_ref, wh_ref, bh_ref, out_ref):
    txy = txy_ref[...]                                          # (TB, 3) f32
    # emb[:, c] = cos(t*Ft + x*Fx + y*Fy - phase)  -> (TB, 512)
    arg = (txy[:, 0:1] * tbl_ref[0:1, :]
           + txy[:, 1:2] * tbl_ref[1:2, :]
           + txy[:, 2:3] * tbl_ref[2:3, :]
           - tbl_ref[3:4, :])
    x = jnp.cos(arg).astype(jnp.bfloat16)                       # (TB, 512) bf16

    # net: 5 x (Linear -> SiLU); bf16 matmul, f32 accumulate/activation.
    # sigmoid via EUP: exp + approx reciprocal run on the (otherwise idle) EUP
    # slot, leaving only bias add / (1+e) / mul / cast on the VALU.
    for i in range(NUM_LAYERS):
        h = jnp.dot(x, w_ref[i], preferred_element_type=jnp.float32) + b_ref[i]
        s = pl.reciprocal(1.0 + jnp.exp(-h), approx=True)       # sigmoid(h)
        x = (h * s).astype(jnp.bfloat16)                        # SiLU, back to bf16

    # fused heads: [means(64) | logweights(32) | logstds(1) | pad(31)]
    head = jnp.dot(x, wh_ref[...], preferred_element_type=jnp.float32) + bh_ref[...]

    # log_softmax over the 32 logweight columns only
    lw = head[:, LW_START:LW_END]                               # (TB, 32)
    m = jnp.max(lw, axis=-1, keepdims=True)
    lse = m + jnp.log(jnp.sum(jnp.exp(lw - m), axis=-1, keepdims=True))

    col = jax.lax.broadcasted_iota(jnp.int32, head.shape, 1)
    is_lw = (col >= LW_START) & (col < LW_END)
    out_ref[...] = jnp.where(is_lw, head - lse, head)           # lane-dense store


# ----------------------------------------------------------------------------
# Deterministic parameter init (matches module's init_weights semantics)
# ----------------------------------------------------------------------------
def init_params(key):
    keys = jax.random.split(key, NUM_LAYERS + 1)
    layers = []
    in_dim = IN_DIM
    for i in range(NUM_LAYERS):
        std = math.sqrt(2.0 / in_dim)       # kaiming_normal_, fan_in, relu
        w = jax.random.normal(keys[i], (in_dim, HIDDEN_DIM), jnp.float32) * std
        b = jnp.zeros((HIDDEN_DIM,), jnp.float32)
        layers.append((w, b))
        in_dim = HIDDEN_DIM
    std = math.sqrt(2.0 / HIDDEN_DIM)
    wm = jax.random.normal(keys[NUM_LAYERS],
                           (HIDDEN_DIM, MEANS_W), jnp.float32) * std
    bm = jnp.zeros((MEANS_W,), jnp.float32)
    # out_logweights / out_logstds weights explicitly zeroed in init_weights
    wlw = jnp.zeros((HIDDEN_DIM, NUM_GAUSSIANS), jnp.float32)
    blw = jnp.zeros((NUM_GAUSSIANS,), jnp.float32)
    wls = jnp.zeros((HIDDEN_DIM, 1), jnp.float32)
    bls = jnp.zeros((1,), jnp.float32)
    return dict(layers=layers, wm=wm, bm=bm, wlw=wlw, blw=blw, wls=wls, bls=bls)


def pack_params(params):
    """Kernel-ready params: stacked bf16 hidden weights, f32 biases, fused head."""
    wstack = jnp.stack([w for w, _ in params["layers"]]).astype(jnp.bfloat16)
    bstack = jnp.stack([b for _, b in params["layers"]]).reshape(
        NUM_LAYERS, 1, HIDDEN_DIM).astype(jnp.float32)
    pad = HEAD_DIM - (MEANS_W + NUM_GAUSSIANS + 1)              # 31 zero columns
    wh = jnp.concatenate(
        [params["wm"], params["wlw"], params["wls"],
         jnp.zeros((HIDDEN_DIM, pad), jnp.float32)], axis=1).astype(jnp.bfloat16)
    bh = jnp.concatenate(
        [params["bm"], params["blw"], params["bls"],
         jnp.zeros((pad,), jnp.float32)], axis=0).reshape(1, HEAD_DIM).astype(jnp.float32)
    return (wstack, bstack, wh, bh)


# ----------------------------------------------------------------------------
# Forward wrapper
# ----------------------------------------------------------------------------
def _round_up(x, m):
    return ((x + m - 1) // m) * m


def _cdiv(a, b):
    return (a + b - 1) // b


@jax.jit
def gmflow_mlp2d_denoiser(hidden_states, timestep, packed_params):
    wstack, bstack, wh, bh = packed_params
    bs = hidden_states.shape[0]
    crd = hidden_states.reshape(bs, 2).astype(jnp.float32)
    ts = jnp.broadcast_to(jnp.asarray(timestep, jnp.float32).reshape(-1), (bs,))
    txy = jnp.concatenate([ts[:, None], crd], axis=1)           # (bs, 3)

    # Batch tiling: pad rows to a sublane multiple; large tiles amortize the
    # ~0.35us per-grid-step overhead; force >=2 steps when possible so v7x's
    # two TensorCores both get work ("parallel" grid axis).
    bs_pad = _round_up(bs, 8)
    nb = max(1, _cdiv(bs_pad, MAX_TILE_B))
    if nb == 1 and bs_pad >= 16:
        nb = 2
    tile_b = _round_up(_cdiv(bs_pad, nb), 8)
    bs_pad = tile_b * nb
    if bs_pad != bs:
        txy = jnp.pad(txy, ((0, bs_pad - bs), (0, 0)))

    emb_table = jnp.asarray(_EMB_TABLE)                         # (4, 512)

    def resident(arr):
        # constant index_map -> stays in VMEM; single buffer (no useless
        # double-buffering of never-refetched weights).
        nd = arr.ndim
        return pl.BlockSpec(arr.shape, lambda i: (0,) * nd,
                            pipeline_mode=pl.Buffered(1))

    in_specs = [
        pl.BlockSpec((tile_b, 3), lambda i: (i, 0)),            # streamed activations
        resident(emb_table),
        resident(wstack),                                       # (5, 512, 512) bf16
        resident(bstack),                                       # (5, 1, 512) f32
        resident(wh),                                           # (512, 128) bf16
        resident(bh),                                           # (1, 128) f32
    ]

    packed = pl.pallas_call(
        _denoiser_kernel,
        grid=(nb,),
        out_shape=jax.ShapeDtypeStruct((bs_pad, HEAD_DIM), jnp.float32),
        in_specs=in_specs,
        out_specs=pl.BlockSpec((tile_b, HEAD_DIM), lambda i: (i, 0)),
        compiler_params=pltpu.CompilerParams(
            dimension_semantics=("parallel",)),
    )(txy, emb_table, wstack, bstack, wh, bh)

    # TODO(synk): for small-batch sampling loops, the per-call weight DMA
    # prologue (~2.7 MiB) could be hidden with a cross-call prefetch pallas_call.

    packed = packed[:bs]
    means = packed[:, :MEANS_W].reshape(bs, NUM_GAUSSIANS, 2)
    logweights = packed[:, LW_START:LW_END].reshape(bs, NUM_GAUSSIANS, 1)
    logstds = packed[:, LS_COL:LS_COL + 1].reshape(bs, 1, 1)
    # extra_dims is empty for (B, 2) inputs
    return dict(means=means, logweights=logweights, logstds=logstds)


# ----------------------------------------------------------------------------
# Pure-JAX reference (same bf16 quantization, exact sigmoid) for sanity checks
# ----------------------------------------------------------------------------
def reference_forward(hidden_states, timestep, packed_params):
    wstack, bstack, wh, bh = packed_params
    bs = hidden_states.shape[0]
    crd = hidden_states.reshape(bs, 2).astype(jnp.float32)
    ts = jnp.broadcast_to(jnp.asarray(timestep, jnp.float32).reshape(-1), (bs,))
    txy = jnp.concatenate([ts[:, None], crd], axis=1)
    tbl = jnp.asarray(_EMB_TABLE)
    arg = (txy[:, 0:1] * tbl[0:1] + txy[:, 1:2] * tbl[1:2]
           + txy[:, 2:3] * tbl[2:3] - tbl[3:4])
    x = jnp.cos(arg).astype(jnp.bfloat16)
    for i in range(NUM_LAYERS):
        h = jnp.dot(x, wstack[i], preferred_element_type=jnp.float32) + bstack[i]
        h = h * jax.nn.sigmoid(h)
        x = h.astype(jnp.bfloat16)
    head = jnp.dot(x, wh, preferred_element_type=jnp.float32) + bh
    means = head[:, :MEANS_W].reshape(bs, NUM_GAUSSIANS, 2)
    lw = jax.nn.log_softmax(head[:, LW_START:LW_END], axis=-1)
    return dict(means=means,
                logweights=lw.reshape(bs, NUM_GAUSSIANS, 1),
                logstds=head[:, LS_COL:LS_COL + 1].reshape(bs, 1, 1))


if __name__ == "__main__":
    key = jax.random.PRNGKey(0)
    kp, kx, kt = jax.random.split(key, 3)

    params = init_params(kp)
    packed_params = pack_params(params)

    # Small case (single grid step).
    bs = 2
    hidden_states = jax.random.normal(kx, (bs, 2), jnp.float32)
    timestep = jax.random.uniform(kt, (bs,), jnp.float32, 0.0, 1000.0)

    out = gmflow_mlp2d_denoiser(hidden_states, timestep, packed_params)
    jax.block_until_ready(out)

    assert out["means"].shape == (bs, NUM_GAUSSIANS, 2)
    assert out["logweights"].shape == (bs, NUM_GAUSSIANS, 1)
    assert out["logstds"].shape == (bs, 1, 1)
    assert bool(jnp.all(jnp.isfinite(out["means"])))

    # With init_weights(), logweight/logstd head weights+biases are zero:
    # logweights must be exactly log_softmax(0) = -log(32), logstds = 0.
    np.testing.assert_allclose(np.asarray(out["logweights"]),
                               -math.log(NUM_GAUSSIANS), rtol=0, atol=1e-5)
    np.testing.assert_allclose(np.asarray(out["logstds"]), 0.0, rtol=0, atol=1e-6)

    ref = reference_forward(hidden_states, timestep, packed_params)
    np.testing.assert_allclose(np.asarray(out["means"]),
                               np.asarray(ref["means"]), rtol=5e-2, atol=5e-2)

    # Larger case exercising the multi-step (megacore-shardable) grid + padding.
    bs2 = 50
    hs2 = jax.random.normal(jax.random.PRNGKey(1), (bs2, 2), jnp.float32)
    ts2 = jax.random.uniform(jax.random.PRNGKey(2), (bs2,), jnp.float32, 0.0, 1000.0)
    out2 = gmflow_mlp2d_denoiser(hs2, ts2, packed_params)
    jax.block_until_ready(out2)
    ref2 = reference_forward(hs2, ts2, packed_params)
    np.testing.assert_allclose(np.asarray(out2["means"]),
                               np.asarray(ref2["means"]), rtol=5e-2, atol=5e-2)

    print("KERNEL_OK")
</pallas_src>

<mosaic_0001>
module attributes {stable_mosaic.version = 11 : i64} {
  func.func @_denoiser_kernel(%arg0: i32, %arg1: memref<8x3xf32, #tpu.memory_space<vmem>>, %arg2: memref<4x512xf32, #tpu.memory_space<vmem>>, %arg3: memref<5x512x512xbf16, #tpu.memory_space<vmem>>, %arg4: memref<5x1x512xf32, #tpu.memory_space<vmem>>, %arg5: memref<512x128xbf16, #tpu.memory_space<vmem>>, %arg6: memref<1x128xf32, #tpu.memory_space<vmem>>, %arg7: memref<8x128xf32, #tpu.memory_space<vmem>>) attributes {dimension_semantics = [#tpu.dimension_semantics<parallel>], iteration_bounds = array<i64: 1>, scalar_prefetch = 0 : i64, scratch_operands = 0 : i64, tpu.core_type = #tpu.core_type<tc>, window_params = [{transform_indices = @transform_0, window_bounds = array<i64: 8, 3>}, {pipeline_mode = #tpu.pipeline_mode<synchronous>, transform_indices = @transform_1, window_bounds = array<i64: 4, 512>}, {pipeline_mode = #tpu.pipeline_mode<synchronous>, transform_indices = @transform_2, window_bounds = array<i64: 5, 512, 512>}, {pipeline_mode = #tpu.pipeline_mode<synchronous>, transform_indices = @transform_3, window_bounds = array<i64: 5, 1, 512>}, {pipeline_mode = #tpu.pipeline_mode<synchronous>, transform_indices = @transform_4, window_bounds = array<i64: 512, 128>}, {pipeline_mode = #tpu.pipeline_mode<synchronous>, transform_indices = @transform_5, window_bounds = array<i64: 1, 128>}, {transform_indices = @transform_6, window_bounds = array<i64: 8, 128>}]} {
    %c0 = arith.constant 0 : index
    %c0_0 = arith.constant 0 : index
    %0 = vector.load %arg1[%c0, %c0_0] : memref<8x3xf32, #tpu.memory_space<vmem>>, vector<8x3xf32>
    %1 = vector.extract_strided_slice %0 {offsets = [0, 0], sizes = [8, 1], strides = [1, 1]} : vector<8x3xf32> to vector<8x1xf32>
    %c0_1 = arith.constant 0 : index
    %c0_2 = arith.constant 0 : index
    %2 = vector.load %arg2[%c0_1, %c0_2] : memref<4x512xf32, #tpu.memory_space<vmem>>, vector<1x512xf32>
    %3 = vector.broadcast %1 : vector<8x1xf32> to vector<8x512xf32>
    %4 = vector.broadcast %2 : vector<1x512xf32> to vector<8x512xf32>
    %5 = arith.mulf %3, %4 : vector<8x512xf32>
    %6 = vector.extract_strided_slice %0 {offsets = [0, 1], sizes = [8, 1], strides = [1, 1]} : vector<8x3xf32> to vector<8x1xf32>
    %c1 = arith.constant 1 : index
    %c0_3 = arith.constant 0 : index
    %7 = vector.load %arg2[%c1, %c0_3] : memref<4x512xf32, #tpu.memory_space<vmem>>, vector<1x512xf32>
    %8 = vector.broadcast %6 : vector<8x1xf32> to vector<8x512xf32>
    %9 = vector.broadcast %7 : vector<1x512xf32> to vector<8x512xf32>
    %10 = arith.mulf %8, %9 : vector<8x512xf32>
    %11 = arith.addf %5, %10 : vector<8x512xf32>
    %12 = vector.extract_strided_slice %0 {offsets = [0, 2], sizes = [8, 1], strides = [1, 1]} : vector<8x3xf32> to vector<8x1xf32>
    %c2 = arith.constant 2 : index
    %c0_4 = arith.constant 0 : index
    %13 = vector.load %arg2[%c2, %c0_4] : memref<4x512xf32, #tpu.memory_space<vmem>>, vector<1x512xf32>
    %14 = vector.broadcast %12 : vector<8x1xf32> to vector<8x512xf32>
    %15 = vector.broadcast %13 : vector<1x512xf32> to vector<8x512xf32>
    %16 = arith.mulf %14, %15 : vector<8x512xf32>
    %17 = arith.addf %11, %16 : vector<8x512xf32>
    %c3 = arith.constant 3 : index
    %c0_5 = arith.constant 0 : index
    %18 = vector.load %arg2[%c3, %c0_5] : memref<4x512xf32, #tpu.memory_space<vmem>>, vector<1x512xf32>
    %19 = vector.broadcast %18 : vector<1x512xf32> to vector<8x512xf32>
    %20 = arith.subf %17, %19 : vector<8x512xf32>
    %21 = math.cos %20 : vector<8x512xf32>
    %22 = arith.truncf %21 : vector<8x512xf32> to vector<8x512xbf16>
    %c0_6 = arith.constant 0 : index
    %c0_7 = arith.constant 0 : index
    %c0_8 = arith.constant 0 : index
    %23 = vector.load %arg3[%c0_6, %c0_7, %c0_8] : memref<5x512x512xbf16, #tpu.memory_space<vmem>>, vector<1x512x512xbf16>
    %24 = vector.shape_cast %23 : vector<1x512x512xbf16> to vector<512x512xbf16>
    %cst = arith.constant dense<0.000000e+00> : vector<8x512xf32>
    %25 = tpu.matmul %22, %24, %cst {dimension_numbers = #tpu.dot_dimension_numbers<[1], [0], [0], [1], [0, 0, 1, 1], [], []>} : vector<8x512xbf16>, vector<512x512xbf16>, vector<8x512xf32> -> vector<8x512xf32>
    %c0_9 = arith.constant 0 : index
    %c0_10 = arith.constant 0 : index
    %c0_11 = arith.constant 0 : index
    %26 = vector.load %arg4[%c0_9, %c0_10, %c0_11] : memref<5x1x512xf32, #tpu.memory_space<vmem>>, vector<1x1x512xf32>
    %27 = vector.shape_cast %26 : vector<1x1x512xf32> to vector<1x512xf32>
    %28 = vector.broadcast %27 : vector<1x512xf32> to vector<8x512xf32>
    %29 = arith.addf %25, %28 : vector<8x512xf32>
    %cst_12 = arith.constant 0.000000e+00 : f32
    %30 = vector.broadcast %cst_12 : f32 to vector<8x512xf32>
    %31 = arith.subf %30, %29 : vector<8x512xf32>
    %32 = math.exp %31 : vector<8x512xf32>
    %cst_13 = arith.constant 1.000000e+00 : f32
    %33 = vector.broadcast %cst_13 : f32 to vector<8x512xf32>
    %34 = arith.addf %33, %32 : vector<8x512xf32>
    %35 = tpu.reciprocal %34 {approx = true} : vector<8x512xf32> -> vector<8x512xf32>
    %36 = arith.mulf %29, %35 : vector<8x512xf32>
    %37 = arith.truncf %36 : vector<8x512xf32> to vector<8x512xbf16>
    %c1_14 = arith.constant 1 : index
    %c0_15 = arith.constant 0 : index
    %c0_16 = arith.constant 0 : index
    %38 = vector.load %arg3[%c1_14, %c0_15, %c0_16] : memref<5x512x512xbf16, #tpu.memory_space<vmem>>, vector<1x512x512xbf16>
    %39 = vector.shape_cast %38 : vector<1x512x512xbf16> to vector<512x512xbf16>
    %cst_17 = arith.constant dense<0.000000e+00> : vector<8x512xf32>
    %40 = tpu.matmul %37, %39, %cst_17 {dimension_numbers = #tpu.dot_dimension_numbers<[1], [0], [0], [1], [0, 0, 1, 1], [], []>} : vector<8x512xbf16>, vector<512x512xbf16>, vector<8x512xf32> -> vector<8x512xf32>
    %c1_18 = arith.constant 1 : index
    %c0_19 = arith.constant 0 : index
    %c0_20 = arith.constant 0 : index
    %41 = vector.load %arg4[%c1_18, %c0_19, %c0_20] : memref<5x1x512xf32, #tpu.memory_space<vmem>>, vector<1x1x512xf32>
    %42 = vector.shape_cast %41 : vector<1x1x512xf32> to vector<1x512xf32>
    %43 = vector.broadcast %42 : vector<1x512xf32> to vector<8x512xf32>
    %44 = arith.addf %40, %43 : vector<8x512xf32>
    %cst_21 = arith.constant 0.000000e+00 : f32
    %45 = vector.broadcast %cst_21 : f32 to vector<8x512xf32>
    %46 = arith.subf %45, %44 : vector<8x512xf32>
    %47 = math.exp %46 : vector<8x512xf32>
    %cst_22 = arith.constant 1.000000e+00 : f32
    %48 = vector.broadcast %cst_22 : f32 to vector<8x512xf32>
    %49 = arith.addf %48, %47 : vector<8x512xf32>
    %50 = tpu.reciprocal %49 {approx = true} : vector<8x512xf32> -> vector<8x512xf32>
    %51 = arith.mulf %44, %50 : vector<8x512xf32>
    %52 = arith.truncf %51 : vector<8x512xf32> to vector<8x512xbf16>
    %c2_23 = arith.constant 2 : index
    %c0_24 = arith.constant 0 : index
    %c0_25 = arith.constant 0 : index
    %53 = vector.load %arg3[%c2_23, %c0_24, %c0_25] : memref<5x512x512xbf16, #tpu.memory_space<vmem>>, vector<1x512x512xbf16>
    %54 = vector.shape_cast %53 : vector<1x512x512xbf16> to vector<512x512xbf16>
    %cst_26 = arith.constant dense<0.000000e+00> : vector<8x512xf32>
    %55 = tpu.matmul %52, %54, %cst_26 {dimension_numbers = #tpu.dot_dimension_numbers<[1], [0], [0], [1], [0, 0, 1, 1], [], []>} : vector<8x512xbf16>, vector<512x512xbf16>, vector<8x512xf32> -> vector<8x512xf32>
    %c2_27 = arith.constant 2 : index
    %c0_28 = arith.constant 0 : index
    %c0_29 = arith.constant 0 : index
    %56 = vector.load %arg4[%c2_27, %c0_28, %c0_29] : memref<5x1x512xf32, #tpu.memory_space<vmem>>, vector<1x1x512xf32>
    %57 = vector.shape_cast %56 : vector<1x1x512xf32> to vector<1x512xf32>
    %58 = vector.broadcast %57 : vector<1x512xf32> to vector<8x512xf32>
    %59 = arith.addf %55, %58 : vector<8x512xf32>
    %cst_30 = arith.constant 0.000000e+00 : f32
    %60 = vector.broadcast %cst_30 : f32 to vector<8x512xf32>
    %61 = arith.subf %60, %59 : vector<8x512xf32>
    %62 = math.exp %61 : vector<8x512xf32>
    %cst_31 = arith.constant 1.000000e+00 : f32
    %63 = vector.broadcast %cst_31 : f32 to vector<8x512xf32>
    %64 = arith.addf %63, %62 : vector<8x512xf32>
    %65 = tpu.reciprocal %64 {approx = true} : vector<8x512xf32> -> vector<8x512xf32>
    %66 = arith.mulf %59, %65 : vector<8x512xf32>
    %67 = arith.truncf %66 : vector<8x512xf32> to vector<8x512xbf16>
    %c3_32 = arith.constant 3 : index
    %c0_33 = arith.constant 0 : index
    %c0_34 = arith.constant 0 : index
    %68 = vector.load %arg3[%c3_32, %c0_33, %c0_34] : memref<5x512x512xbf16, #tpu.memory_space<vmem>>, vector<1x512x512xbf16>
    %69 = vector.shape_cast %68 : vector<1x512x512xbf16> to vector<512x512xbf16>
    %cst_35 = arith.constant dense<0.000000e+00> : vector<8x512xf32>
    %70 = tpu.matmul %67, %69, %cst_35 {dimension_numbers = #tpu.dot_dimension_numbers<[1], [0], [0], [1], [0, 0, 1, 1], [], []>} : vector<8x512xbf16>, vector<512x512xbf16>, vector<8x512xf32> -> vector<8x512xf32>
    %c3_36 = arith.constant 3 : index
    %c0_37 = arith.constant 0 : index
    %c0_38 = arith.constant 0 : index
    %71 = vector.load %arg4[%c3_36, %c0_37, %c0_38] : memref<5x1x512xf32, #tpu.memory_space<vmem>>, vector<1x1x512xf32>
    %72 = vector.shape_cast %71 : vector<1x1x512xf32> to vector<1x512xf32>
    %73 = vector.broadcast %72 : vector<1x512xf32> to vector<8x512xf32>
    %74 = arith.addf %70, %73 : vector<8x512xf32>
    %cst_39 = arith.constant 0.000000e+00 : f32
    %75 = vector.broadcast %cst_39 : f32 to vector<8x512xf32>
    %76 = arith.subf %75, %74 : vector<8x512xf32>
    %77 = math.exp %76 : vector<8x512xf32>
    %cst_40 = arith.constant 1.000000e+00 : f32
    %78 = vector.broadcast %cst_40 : f32 to vector<8x512xf32>
    %79 = arith.addf %78, %77 : vector<8x512xf32>
    %80 = tpu.reciprocal %79 {approx = true} : vector<8x512xf32> -> vector<8x512xf32>
    %81 = arith.mulf %74, %80 : vector<8x512xf32>
    %82 = arith.truncf %81 : vector<8x512xf32> to vector<8x512xbf16>
    %c4 = arith.constant 4 : index
    %c0_41 = arith.constant 0 : index
    %c0_42 = arith.constant 0 : index
    %83 = vector.load %arg3[%c4, %c0_41, %c0_42] : memref<5x512x512xbf16, #tpu.memory_space<vmem>>, vector<1x512x512xbf16>
    %84 = vector.shape_cast %83 : vector<1x512x512xbf16> to vector<512x512xbf16>
    %cst_43 = arith.constant dense<0.000000e+00> : vector<8x512xf32>
    %85 = tpu.matmul %82, %84, %cst_43 {dimension_numbers = #tpu.dot_dimension_numbers<[1], [0], [0], [1], [0, 0, 1, 1], [], []>} : vector<8x512xbf16>, vector<512x512xbf16>, vector<8x512xf32> -> vector<8x512xf32>
    %c4_44 = arith.constant 4 : index
    %c0_45 = arith.constant 0 : index
    %c0_46 = arith.constant 0 : index
    %86 = vector.load %arg4[%c4_44, %c0_45, %c0_46] : memref<5x1x512xf32, #tpu.memory_space<vmem>>, vector<1x1x512xf32>
    %87 = vector.shape_cast %86 : vector<1x1x512xf32> to vector<1x512xf32>
    %88 = vector.broadcast %87 : vector<1x512xf32> to vector<8x512xf32>
    %89 = arith.addf %85, %88 : vector<8x512xf32>
    %cst_47 = arith.constant 0.000000e+00 : f32
    %90 = vector.broadcast %cst_47 : f32 to vector<8x512xf32>
    %91 = arith.subf %90, %89 : vector<8x512xf32>
    %92 = math.exp %91 : vector<8x512xf32>
    %cst_48 = arith.constant 1.000000e+00 : f32
    %93 = vector.broadcast %cst_48 : f32 to vector<8x512xf32>
    %94 = arith.addf %93, %92 : vector<8x512xf32>
    %95 = tpu.reciprocal %94 {approx = true} : vector<8x512xf32> -> vector<8x512xf32>
    %96 = arith.mulf %89, %95 : vector<8x512xf32>
    %97 = arith.truncf %96 : vector<8x512xf32> to vector<8x512xbf16>
    %c0_49 = arith.constant 0 : index
    %c0_50 = arith.constant 0 : index
    %98 = vector.load %arg5[%c0_49, %c0_50] : memref<512x128xbf16, #tpu.memory_space<vmem>>, vector<512x128xbf16>
    %cst_51 = arith.constant dense<0.000000e+00> : vector<8x128xf32>
    %99 = tpu.matmul %97, %98, %cst_51 {dimension_numbers = #tpu.dot_dimension_numbers<[1], [0], [0], [1], [0, 0, 1, 1], [], []>} : vector<8x512xbf16>, vector<512x128xbf16>, vector<8x128xf32> -> vector<8x128xf32>
    %c0_52 = arith.constant 0 : index
    %c0_53 = arith.constant 0 : index
    %100 = vector.load %arg6[%c0_52, %c0_53] : memref<1x128xf32, #tpu.memory_space<vmem>>, vector<1x128xf32>
    %101 = vector.broadcast %100 : vector<1x128xf32> to vector<8x128xf32>
    %102 = arith.addf %99, %101 : vector<8x128xf32>
    %103 = vector.extract_strided_slice %102 {offsets = [0, 64], sizes = [8, 32], strides = [1, 1]} : vector<8x128xf32> to vector<8x32xf32>
    %cst_54 = arith.constant dense<0xFF800000> : vector<8xf32>
    %104 = vector.multi_reduction <maximumf>, %103, %cst_54 [1] : vector<8x32xf32> to vector<8xf32>
    %105 = vector.shape_cast %104 : vector<8xf32> to vector<8x1xf32>
    %106 = vector.broadcast %105 : vector<8x1xf32> to vector<8x32xf32>
    %107 = arith.subf %103, %106 : vector<8x32xf32>
    %108 = math.exp %107 : vector<8x32xf32>
    %cst_55 = arith.constant dense<0.000000e+00> : vector<8xf32>
    %109 = vector.multi_reduction <add>, %108, %cst_55 [1] : vector<8x32xf32> to vector<8xf32>
    %110 = vector.shape_cast %109 : vector<8xf32> to vector<8x1xf32>
    %111 = math.log %110 : vector<8x1xf32>
    %112 = arith.addf %105, %111 : vector<8x1xf32>
    %113 = tpu.iota {dimensions = array<i32: 1>} : vector<8x128xi32>
    %c64_i32 = arith.constant 64 : i32
    %114 = vector.broadcast %c64_i32 : i32 to vector<8x128xi32>
    %115 = arith.cmpi sge, %113, %114 : vector<8x128xi32>
    %c96_i32 = arith.constant 96 : i32
    %116 = vector.broadcast %c96_i32 : i32 to vector<8x128xi32>
    %117 = arith.cmpi slt, %113, %116 : vector<8x128xi32>
    %118 = arith.andi %115, %117 : vector<8x128xi1>
    %119 = vector.broadcast %112 : vector<8x1xf32> to vector<8x128xf32>
    %120 = arith.subf %102, %119 : vector<8x128xf32>
    %121 = arith.select %118, %120, %102 : vector<8x128xi1>, vector<8x128xf32>
    %c0_56 = arith.constant 0 : index
    %c0_57 = arith.constant 0 : index
    %122 = vector.load %arg7[%c0_56, %c0_57] : memref<8x128xf32, #tpu.memory_space<vmem>>, vector<8x128xf32>
    tpu.vector_store %arg7[%c0_56, %c0_57], %121 {strides = array<i32>} : memref<8x128xf32, #tpu.memory_space<vmem>>, vector<8x128xf32>,
    return
  }
  func.func @transform_0(%arg0: i32) -> (i32, i32) {
    %c0_i32 = arith.constant 0 : i32
    %c0_i32_0 = arith.constant 0 : i32
    return %arg0, %c0_i32 : i32, i32
  }
  func.func @transform_1(%arg0: i32) -> (i32, i32) {
    %c0_i32 = arith.constant 0 : i32
    %c0_i32_0 = arith.constant 0 : i32
    %c0_i32_1 = arith.constant 0 : i32
    return %c0_i32, %c0_i32_0 : i32, i32
  }
  func.func @transform_2(%arg0: i32) -> (i32, i32, i32) {
    %c0_i32 = arith.constant 0 : i32
    %c0_i32_0 = arith.constant 0 : i32
    %c0_i32_1 = arith.constant 0 : i32
    %c0_i32_2 = arith.constant 0 : i32
    return %c0_i32, %c0_i32_0, %c0_i32_1 : i32, i32, i32
  }
  func.func @transform_3(%arg0: i32) -> (i32, i32, i32) {
    %c0_i32 = arith.constant 0 : i32
    %c0_i32_0 = arith.constant 0 : i32
    %c0_i32_1 = arith.constant 0 : i32
    %c0_i32_2 = arith.constant 0 : i32
    return %c0_i32, %c0_i32_0, %c0_i32_1 : i32, i32, i32
  }
  func.func @transform_4(%arg0: i32) -> (i32, i32) {
    %c0_i32 = arith.constant 0 : i32
    %c0_i32_0 = arith.constant 0 : i32
    %c0_i32_1 = arith.constant 0 : i32
    return %c0_i32, %c0_i32_0 : i32, i32
  }
  func.func @transform_5(%arg0: i32) -> (i32, i32) {
    %c0_i32 = arith.constant 0 : i32
    %c0_i32_0 = arith.constant 0 : i32
    %c0_i32_1 = arith.constant 0 : i32
    return %c0_i32, %c0_i32_0 : i32, i32
  }
  func.func @transform_6(%arg0: i32) -> (i32, i32) {
    %c0_i32 = arith.constant 0 : i32
    %c0_i32_0 = arith.constant 0 : i32
    return %arg0, %c0_i32 : i32, i32
  }
}

</mosaic_0001>

<bundles_post_ra>
// kernel: gmflow_mlp2d_denoiser.1
= control target key start
LH: loop header
LB: loop body
LE: loop exit
PB: predicated region body
PF: predicated region fallthrough
CT: control target
= control target key end

     0   :  { %11 = vsyncpa [#allocation3], 0  ;;  %s10837_s0 = inlined_call_operand.vmem [shape: f32[8,3], index: 0, kind: input, shape index: {}]   ;;  %s10838_s1 = inlined_call_operand.hbm [shape: f32[4,512], index: 1, kind: input, shape index: {}]   ;;  %s10839_s2 = inlined_call_operand.hbm [shape: bf16[5,512,512], index: 2, kind: input, shape index: {}]   ;;  %s10840_s3 = inlined_call_operand.hbm [shape: f32[5,1,512], index: 3, kind: input, shape index: {}]   ;;  %s10841_s4 = inlined_call_operand.hbm [shape: bf16[512,128], index: 4, kind: input, shape index: {}]   ;;  %s10842_s5 = inlined_call_operand.hbm [shape: f32[1,128], index: 5, kind: input, shape index: {}]   ;;  %s10843_s6 = inlined_call_operand.vmem [shape: f32[8,128], index: 6, kind: output, shape index: {}]  }
   0x1   :  { %12 = vsyncpa [#allocation5], 0  ;;  %s31_s23 = sshll.u32 %s10839_s2, 4  ;;  %s32_s23 = int_to_ptr.hbm [resolvable:$true] %s31_s23 }
   0x2   :  { %13 = vsyncpa [#allocation8], 0  ;;  %s9826_s24 = smov [#allocation4]   ;;  %s9827_s26 = smov 256  }
   0x3   :  { %s33_s25 = sshll.u32 %s9826_s24, 4  ;;  %s9828_s27 = smov 16   ;;  %s34_s25 = int_to_ptr.vmem [resolvable:$true] %s33_s25 }
   0x4   :  { %39 = dma.hbm_to_vmem [thread:$0]  %s32_s23, 81920, %s34_s25, [#allocation5], %s9827_s26, %s9827_s26, %s9828_s27  }
   0x5   :  { %s57_s30 = sshll.u32 %s10841_s4, 4  ;;  %s9829_s7 = smov [#allocation7]   ;;  %s58_s30 = int_to_ptr.hbm [resolvable:$true] %s57_s30 }
   0x6   :  { %s59_s8 = sshll.u32 %s9829_s7, 4  ;;  %s21_s11 = sshll.u32 %s10838_s1, 4  ;;  %s60_s8 = int_to_ptr.vmem [resolvable:$true] %s59_s8  ;;  %s22_s11 = int_to_ptr.hbm [resolvable:$true] %s21_s11 }
   0x7   :  { %s9830_s2 = smov 64   ;;  %s9831_s12 = smov 4  }
   0x8   :  { %65 = dma.hbm_to_vmem [thread:$0]  %s58_s30, 4096, %s60_s8, [#allocation8], %s9830_s2, %s9830_s2, %s9831_s12  }
   0x9   :  { %s44_s15 = sshll.u32 %s10840_s3, 4  ;;  %s9832_s16 = smov [#allocation2]   ;;  %s45_s15 = int_to_ptr.hbm [resolvable:$true] %s44_s15 }
   0xa   :  { %s23_s4 = sshll.u32 %s9832_s16, 4  ;;  %s9833_s17 = smov [#allocation6]   ;;  %s24_s4 = int_to_ptr.vmem [resolvable:$true] %s23_s4 }
   0xb   :  { %26 = dma.hbm_to_vmem [thread:$0]  %s22_s11, 256, %s24_s4, [#allocation3]  }
   0xc   :  { %s46_s18 = sshll.u32 %s9833_s17, 4  ;;  %s71_s20 = sshll.u32 %s10842_s5, 4  ;;  %s47_s18 = int_to_ptr.vmem [resolvable:$true] %s46_s18  ;;  %s72_s20 = int_to_ptr.hbm [resolvable:$true] %s71_s20 }
   0xd   :  { %52 = dma.hbm_to_vmem [thread:$0]  %s45_s15, 320, %s47_s18, [#allocation5], %s9830_s2, %s9830_s2, %s9831_s12  }
   0xe   :  { %s9834_s21 = smov [#allocation9]  }
   0xf   :  { %s73_s22 = sshll.u32 %s9834_s21, 4  ;;  %s74_s22 = int_to_ptr.vmem [resolvable:$true] %s73_s22 }
  0x10   :  { %76 = dma.hbm_to_vmem [thread:$0]  %s72_s20, 16, %s74_s22, [#allocation8]  }
  0x11   :  { %9820 = dma.done.wait [#allocation3], 256  }
  0x12   :  { %9821 = vsyncadd [#allocation3], 4294967040 }
  0x13   :  { %9822 = dma.done.wait [#allocation5], 82240  }
  0x14   :  { %9823 = vsyncadd [#allocation5], 4294885056 }
  0x15   :  { %9824 = dma.done.wait [#allocation8], 4112  }
  0x16   :  { %9825 = vsyncadd [#allocation8], 4294963184  ;;  %v9835_v0 = vmov 0   ;;  %v9836_v1 = vmov 2   ;;  %v97_v2 = vld [vmem:[%s10837_s0] sm:$0xff]  ;;  %v9837_v3 = vmov 1  }
  0x17   :  { %9611 = vset.pattern.permute.xlu0 %v9835_v0  ;;  %9613 = vset.pattern.permute.xlu1 %v9836_v1  ;;  %v98_v4 = vld [vmem:[#allocation2] ss:$4 sm:$0xf]  ;;  %v9902_v5 = vld [vmem:[#allocation2 + $0x1] ss:$4 sm:$0xf] }
  0x18   :  { %101 = vperm.xlu0 %9611, %v97_v2   ;;  %143 = vperm.xlu1 %9613, %v97_v2   ;;  %v9904_v6 = vld [vmem:[#allocation2 + $0x2] ss:$4 sm:$0xf]  ;;  %v105_v7 = vperm.slane %v98_v4, 0  ;;  %v106_v9 = vperm.slane %v98_v4, 1  ;;  %v107_v10 = vperm.slane %v98_v4, 2 }
  0x19   :  { %v9906_v8 = vld [vmem:[#allocation2 + $0x3] ss:$4 sm:$0xf]  ;;  %v108_v11 = vperm.slane %v98_v4, 3  ;;  %v124_v12 = vperm.slane %v9902_v5, 0  ;;  %v125_v13 = vperm.slane %v9902_v5, 1 }
  0x1a   :  { %v126_v14 = vperm.slane %v9902_v5, 2  ;;  %v127_v15 = vperm.slane %v9902_v5, 3  ;;  %v147_v16 = vperm.slane %v9904_v6, 0  ;;  %v148_v17 = vperm.slane %v9904_v6, 1  ;;  %v6347_v21 = vld [vmem:[#allocation4 + $0xe0] sm:$0xf] }
  0x1b   :  { %v149_v18 = vperm.slane %v9904_v6, 2  ;;  %v150_v19 = vperm.slane %v9904_v6, 3  ;;  %v166_v20 = vperm.slane %v9906_v8, 0  ;;  %v8951_v22 = vld [vmem:[#allocation4 + $0xec] sm:$0xf0] }
  0x1c   :  { %v6475_v23 = vld [vmem:[#allocation4 + $0x1e0] sm:$0xf]  ;;  %v6348_v25 = vor.u32 %v8951_v22, %v6347_v21  ;;  %v8983_v26 = vld [vmem:[#allocation4 + $0x1ec] sm:$0xf0] }
  0x1d   :  { %v6603_v27 = vld [vmem:[#allocation4 + $0x2e0] sm:$0xf]  ;;  %v9015_v28 = vld [vmem:[#allocation4 + $0x2ec] sm:$0xf0]  ;;  %v6476_v36 = vor.u32 %v8983_v26, %v6475_v23  ;;  %v169_v26 = vperm.slane %v9906_v8, 3 }
  0x1e   :  { %v6731_v30 = vld [vmem:[#allocation4 + $0x3e0] sm:$0xf]  ;;  %v9047_v31 = vld [vmem:[#allocation4 + $0x3ec] sm:$0xf0]  ;;  %1576 = vmatpush.bf16.msra.mxu0 %v6348_v25  ;;  %v6604_v37 = vor.u32 %v9015_v28, %v6603_v27  ;;  %v168_v25 = vperm.slane %v9906_v8, 2 }
  0x1f   :  { %v6331_v32 = vld [vmem:[#allocation4 + $0xc0] sm:$0xf]  ;;  %v8947_v33 = vld [vmem:[#allocation4 + $0xcc] sm:$0xf0]  ;;  %v6732_v38 = vor.u32 %v9047_v31, %v6731_v30  ;;  %1589 = vmatpush.bf16.msra.mxu1 %v6476_v36 }
  0x20   :  { %9612 = vset.pattern.permute.xlu0 %v9837_v3  ;;  %v6459_v34 = vld [vmem:[#allocation4 + $0x1c0] sm:$0xf]  ;;  %v8979_v35 = vld [vmem:[#allocation4 + $0x1cc] sm:$0xf0]  ;;  %v6332_v39 = vor.u32 %v8947_v33, %v6331_v32  ;;  %1602 = vmatpush.bf16.msra.mxu2 %v6604_v37 }
  0x21   :  { %120 = vperm.xlu0 %9612, %v97_v2   ;;  %v6587_v40 = vld [vmem:[#allocation4 + $0x2c0] sm:$0xf]  ;;  %v9011_v41 = vld [vmem:[#allocation4 + $0x2cc] sm:$0xf0]  ;;  %v6460_v47 = vor.u32 %v8979_v35, %v6459_v34  ;;  %1615 = vmatpush.bf16.msra.mxu3 %v6732_v38 }
  0x22   :  { %v6715_v42 = vld [vmem:[#allocation4 + $0x3c0] sm:$0xf]  ;;  %v9043_v43 = vld [vmem:[#allocation4 + $0x3cc] sm:$0xf0]  ;;  %v6588_v48 = vor.u32 %v9011_v41, %v6587_v40  ;;  %1577 = vmatpush.bf16.msra.mxu0 %v6332_v39 }
  0x23   :  { %v6315_v44 = vld [vmem:[#allocation4 + $0xa0] sm:$0xf]  ;;  %v8943_v45 = vld [vmem:[#allocation4 + $0xac] sm:$0xf0]  ;;  %v6716_v52 = vor.u32 %v9043_v43, %v6715_v42  ;;  %1590 = vmatpush.bf16.msra.mxu1 %v6460_v47 }
  0x24   :  { %v6443_v49 = vld [vmem:[#allocation4 + $0x1a0] sm:$0xf]  ;;  %v8975_v50 = vld [vmem:[#allocation4 + $0x1ac] sm:$0xf0]  ;;  %v6316_v59 = vor.u32 %v8943_v45, %v6315_v44  ;;  %1603 = vmatpush.bf16.msra.mxu2 %v6588_v48 }
  0x25   :  { %v6571_v51 = vld [vmem:[#allocation4 + $0x2a0] sm:$0xf]  ;;  %v9007_v53 = vld [vmem:[#allocation4 + $0x2ac] sm:$0xf0]  ;;  %v6444_v4 = vor.u32 %v8975_v50, %v6443_v49  ;;  %1616 = vmatpush.bf16.msra.mxu3 %v6716_v52 }
  0x26   :  { %v6699_v54 = vld [vmem:[#allocation4 + $0x3a0] sm:$0xf]  ;;  %v9039_v55 = vld [vmem:[#allocation4 + $0x3ac] sm:$0xf0]  ;;  %v6572_v6 = vor.u32 %v9007_v53, %v6571_v51  ;;  %1578 = vmatpush.bf16.msra.mxu0 %v6316_v59 }
  0x27   :  { %v8939_v2 = vld [vmem:[#allocation4 + $0x8c] sm:$0xf0]  ;;  %v6427_v21 = vld [vmem:[#allocation4 + $0x180] sm:$0xf]  ;;  %1591 = vmatpush.bf16.msra.mxu1 %v6444_v4 }
  0x28   :  { %v8971_v22 = vld [vmem:[#allocation4 + $0x18c] sm:$0xf0]  ;;  %v6555_v23 = vld [vmem:[#allocation4 + $0x280] sm:$0xf]  ;;  %1604 = vmatpush.bf16.msra.mxu2 %v6572_v6 }
  0x29   :  { %9614 = vset.pattern.permute.xlu0 %v9836_v1  ;;  %v6299_v1 = vld [vmem:[#allocation4 + $0x80] sm:$0xf]  ;;  %v8935_v5 = vld [vmem:[#allocation4 + $0x6c] sm:$0xf0] }
  0x2a   :  { %v6283_v30 = vld [vmem:[#allocation4 + $0x60] sm:$0xf]  ;;  %v8967_v38 = vld [vmem:[#allocation4 + $0x16c] sm:$0xf0] }
  0x2b   :  { %v6411_v33 = vld [vmem:[#allocation4 + $0x160] sm:$0xf]  ;;  %v8999_v40 = vld [vmem:[#allocation4 + $0x26c] sm:$0xf0]  ;;  %v6284_v41 = vor.u32 %v8935_v5, %v6283_v30 }
  0x2c   :  { %v6539_v39 = vld [vmem:[#allocation4 + $0x260] sm:$0xf]  ;;  %v8931_v48 = vld [vmem:[#allocation4 + $0x4c] sm:$0xf0]  ;;  %v6412_v49 = vor.u32 %v8967_v38, %v6411_v33  ;;  %v9013_v38 = vld [vmem:[#allocation4 + $0x2e4] sm:$0xf] }
  0x2d   :  { %v6667_v42 = vld [vmem:[#allocation4 + $0x360] sm:$0xf]  ;;  %v6540_v50 = vor.u32 %v8999_v40, %v6539_v39  ;;  %v8963_v52 = vld [vmem:[#allocation4 + $0x14c] sm:$0xf0]  ;;  %v6605_v40 = vld [vmem:[#allocation4 + $0x2f0] sm:$0xf0] }
  0x2e   :  { %v6267_v47 = vld [vmem:[#allocation4 + $0x40] sm:$0xf]  ;;  %v8959_v6 = vld [vmem:[#allocation4 + $0x12c] sm:$0xf0] }
  0x2f   :  { %v6395_v51 = vld [vmem:[#allocation4 + $0x140] sm:$0xf]  ;;  %v9019_v33 = vld [vmem:[#allocation4 + $0x30c] sm:$0xf0] }
  0x30   :  { %v6251_v59 = vld [vmem:[#allocation4 + $0x20] sm:$0xf] }
  0x31   :  { %v6379_v4 = vld [vmem:[#allocation4 + $0x120] sm:$0xf] }
  0x32   :  { %v6619_v5 = vld [vmem:[#allocation4 + $0x300] sm:$0xf] }
  0x8a   :  { %v102_v24 = vpop.permute.xlu0 %101  ;;  %v144_v46 = vpop.permute.xlu1 %143 }
  0x8b   :  { %v9917_v29 = vmul.f32 %v108_v11, %v102_v24  ;;  %v113_v56 = vmul.f32 %v105_v7, %v102_v24  ;;  %v114_v57 = vmul.f32 %v106_v9, %v102_v24  ;;  %v115_v58 = vmul.f32 %v107_v10, %v102_v24 }
  0x8c   :  { %v155_v60 = vmul.f32 %v147_v16, %v144_v46  ;;  %v156_v61 = vmul.f32 %v148_v17, %v144_v46  ;;  %v157_v62 = vmul.f32 %v149_v18, %v144_v46  ;;  %v158_v63 = vmul.f32 %v150_v19, %v144_v46  ;;  %v9003_v17 = vld [vmem:[#allocation4 + $0x28c] sm:$0xf0]  ;;  %v6683_v18 = vld [vmem:[#allocation4 + $0x380] sm:$0xf] }
  0x8d   :  { %v6700_v11 = vor.u32 %v9039_v55, %v6699_v54  ;;  %v9035_v19 = vld [vmem:[#allocation4 + $0x38c] sm:$0xf0]  ;;  %v167_v24 = vperm.slane %v9906_v8, 1  ;;  %v6556_v31 = vor.u32 %v9003_v17, %v6555_v23  ;;  %v6523_v54 = vld [vmem:[#allocation4 + $0x240] sm:$0xf] }
  0x8e   :  { %v6684_v32 = vor.u32 %v9035_v19, %v6683_v18  ;;  %v8995_v55 = vld [vmem:[#allocation4 + $0x24c] sm:$0xf0]  ;;  %v6235_v17 = vld [vmem:[#allocation4] sm:$0xf] }
  0x8f   :  { %1617 = vmatpush.bf16.msra.mxu3 %v6700_v11  ;;  %1605 = vmatpush.bf16.msra.mxu2 %v6556_v31  ;;  %v6507_v11 = vld [vmem:[#allocation4 + $0x220] sm:$0xf]  ;;  %v8923_v18 = vld [vmem:[#allocation4 + $0xc] sm:$0xf0]  ;;  %v6349_v31 = vld [vmem:[#allocation4 + $0xf0] sm:$0xf0] }
  0x93   :  { %v121_v3 = vpop.permute.xlu0 %120  ;;  %1618 = vmatpush.bf16.msra.mxu3 %v6684_v32  ;;  %1606 = vmatpush.bf16.msra.mxu2 %v6540_v50  ;;  %v8945_v50 = vld [vmem:[#allocation4 + $0xc4] sm:$0xf] }
  0x94   :  { %v132_v7 = vmul.f32 %v124_v12, %v121_v3  ;;  %v133_v9 = vmul.f32 %v125_v13, %v121_v3  ;;  %v134_v10 = vmul.f32 %v126_v14, %v121_v3  ;;  %v135_v16 = vmul.f32 %v127_v15, %v121_v3 }
  0x95   :  { %v6300_v12 = vor.u32 %v8939_v2, %v6299_v1  ;;  %v6428_v15 = vor.u32 %v8971_v22, %v6427_v21  ;;  %v8927_v1 = vld [vmem:[#allocation4 + $0x2c] sm:$0xf0]  ;;  %v6396_v2 = vor.u32 %v8963_v52, %v6395_v51  ;;  %v6524_v3 = vor.u32 %v8995_v55, %v6523_v54  ;;  %v6333_v51 = vld [vmem:[#allocation4 + $0xd0] sm:$0xf0] }
  0x96   :  { %v136_v27 = vadd.f32 %v132_v7, %v113_v56  ;;  %v137_v13 = vadd.f32 %v133_v9, %v114_v57  ;;  %v138_v28 = vadd.f32 %v134_v10, %v115_v58  ;;  %v139_v14 = vadd.f32 %v135_v16, %v9917_v29  ;;  %v9031_v29 = vld [vmem:[#allocation4 + $0x36c] sm:$0xf0]  ;;  %v6651_v57 = vld [vmem:[#allocation4 + $0x340] sm:$0xf] }
  0x97   :  { %1579 = vmatpush.bf16.msra.mxu0 %v6300_v12  ;;  %1592 = vmatpush.bf16.msra.mxu1 %v6428_v15  ;;  %v6268_v56 = vor.u32 %v8931_v48, %v6267_v47  ;;  %v9027_v58 = vld [vmem:[#allocation4 + $0x34c] sm:$0xf0]  ;;  %v6635_v9 = vld [vmem:[#allocation4 + $0x320] sm:$0xf]  ;;  %v6252_v10 = vor.u32 %v8927_v1, %v6251_v59  ;;  %v8949_v15 = vld [vmem:[#allocation4 + $0xe4] sm:$0xf]  ;;  %v6608_v54 = vor.u32 %v9013_v38, %v6605_v40 }
  0x98   :  { %v159_v34 = vadd.f32 %v155_v60, %v136_v27  ;;  %v160_v35 = vadd.f32 %v156_v61, %v137_v13  ;;  %v161_v36 = vadd.f32 %v157_v62, %v138_v28  ;;  %v162_v37 = vadd.f32 %v158_v63, %v139_v14  ;;  %v8991_v7 = vld [vmem:[#allocation4 + $0x22c] sm:$0xf0]  ;;  %v6363_v12 = vld [vmem:[#allocation4 + $0x100] sm:$0xf]  ;;  %1607 = vmatpush.bf16.msra.mxu2 %v6524_v3  ;;  %v6317_v3 = vld [vmem:[#allocation4 + $0xb0] sm:$0xf0] }
  0x99   :  { %v6652_v23 = vor.u32 %v9027_v58, %v6651_v57  ;;  %v9023_v16 = vld [vmem:[#allocation4 + $0x32c] sm:$0xf0]  ;;  %v6491_v13 = vld [vmem:[#allocation4 + $0x200] sm:$0xf]  ;;  %v6380_v14 = vor.u32 %v8959_v6, %v6379_v4  ;;  %v6508_v30 = vor.u32 %v8991_v7, %v6507_v11  ;;  %v6352_v39 = vor.u32 %v8949_v15, %v6349_v31  ;;  %v6461_v57 = vld [vmem:[#allocation4 + $0x1d0] sm:$0xf0] }
  0x9a   :  { %v9933_v43 = vsub.f32 %v159_v34, %v166_v20  ;;  %v9935_v44 = vsub.f32 %v160_v35, %v167_v24  ;;  %v9937_v45 = vsub.f32 %v161_v36, %v168_v25  ;;  %v9939_v46 = vsub.f32 %v162_v37, %v169_v26  ;;  %v8955_v27 = vld [vmem:[#allocation4 + $0x10c] sm:$0xf0]  ;;  %v8981_v34 = vld [vmem:[#allocation4 + $0x1e4] sm:$0xf]  ;;  %v6477_v37 = vld [vmem:[#allocation4 + $0x1f0] sm:$0xf0] }
  0x9b   :  { %v6668_v20 = vor.u32 %v9031_v29, %v6667_v42  ;;  %1580 = vmatpush.bf16.msra.mxu0 %v6284_v41  ;;  %1593 = vmatpush.bf16.msra.mxu1 %v6412_v49  ;;  %v8987_v28 = vld [vmem:[#allocation4 + $0x20c] sm:$0xf0]  ;;  %v6636_v32 = vor.u32 %v9023_v16, %v6635_v9  ;;  %v6236_v36 = vor.u32 %v8923_v18, %v6235_v17  ;;  %v9045_v41 = vld [vmem:[#allocation4 + $0x3e4] sm:$0xf]  ;;  %v6733_v42 = vld [vmem:[#allocation4 + $0x3f0] sm:$0xf0] }
  0x9c   :  { %v181_v53 = vand.u32 2139095040, %v9933_v43  ;;  %v335_v8 = vand.u32 2139095040, %v9935_v44  ;;  %v489_v62 = vand.u32 2139095040, %v9937_v45  ;;  %v643_v63 = vand.u32 2139095040, %v9939_v46  ;;  %1608 = vmatpush.bf16.msra.mxu2 %v6508_v30  ;;  %v9009_v58 = vld [vmem:[#allocation4 + $0x2c4] sm:$0xf] }
  0x9d   :  { %1619 = vmatpush.bf16.msra.mxu3 %v6668_v20  ;;  %v6364_v48 = vor.u32 %v8955_v27, %v6363_v12  ;;  %v6492_v49 = vor.u32 %v8987_v28, %v6491_v13  ;;  %v6480_v20 = vor.u32 %v8981_v34, %v6477_v37  ;;  %v6736_v55 = vor.u32 %v9045_v41, %v6733_v42  ;;  %v6445_v9 = vld [vmem:[#allocation4 + $0x1b0] sm:$0xf0]  ;;  %v9037_v18 = vld [vmem:[#allocation4 + $0x3a4] sm:$0xf] }
  0x9e   :  { %v182_v60 = vshrl.u32 %v181_v53, 23  ;;  %v336_v61 = vshrl.u32 %v335_v8, 23  ;;  %v490_v25 = vshrl.u32 %v489_v62, 23  ;;  %v644_v26 = vshrl.u32 %v643_v63, 23  ;;  %v6717_v62 = vld [vmem:[#allocation4 + $0x3d0] sm:$0xf0] }
  0x9f   :  { %1581 = vmatpush.bf16.msra.mxu0 %v6268_v56  ;;  %1594 = vmatpush.bf16.msra.mxu1 %v6396_v2  ;;  %v6620_v8 = vor.u32 %v9019_v33, %v6619_v5  ;;  %v8977_v56 = vld [vmem:[#allocation4 + $0x1c4] sm:$0xf]  ;;  %v6336_v59 = vor.u32 %v8945_v50, %v6333_v51  ;;  %v6573_v16 = vld [vmem:[#allocation4 + $0x2b0] sm:$0xf0] }
  0xa0   :  { %v6221_v21 = vadd.s32 4294967169, %v182_v60  ;;  %v6224_v22 = vadd.s32 4294967169, %v336_v61  ;;  %v6227_v29 = vadd.s32 4294967169, %v490_v25  ;;  %v6230_v47 = vadd.s32 4294967169, %v644_v26  ;;  %v6589_v60 = vld [vmem:[#allocation4 + $0x2d0] sm:$0xf0]  ;;  %1609 = vmatpush.bf16.msra.mxu2 %v6492_v49 }
  0xa1   :  { %1620 = vmatpush.bf16.msra.mxu3 %v6652_v23  ;;  %v9041_v61 = vld [vmem:[#allocation4 + $0x3c4] sm:$0xf]  ;;  %v6592_v23 = vor.u32 %v9009_v58, %v6589_v60  ;;  %v6301_v25 = vld [vmem:[#allocation4 + $0x90] sm:$0xf0] }
  0xa2   :  { %v188_v19 = vadd.s32 1, %v6221_v21  ;;  %v342_v24 = vadd.s32 1, %v6224_v22  ;;  %v9950_v63 = vadd.s32 1, %v6227_v29  ;;  %v9952_v1 = vadd.s32 1, %v6230_v47  ;;  %v8941_v2 = vld [vmem:[#allocation4 + $0xa4] sm:$0xf] }
  0xa3   :  { %1582 = vmatpush.bf16.msra.mxu0 %v6252_v10  ;;  %1595 = vmatpush.bf16.msra.mxu1 %v6380_v14  ;;  %v6464_v21 = vor.u32 %v8977_v56, %v6461_v57  ;;  %v8973_v22 = vld [vmem:[#allocation4 + $0x1a4] sm:$0xf]  ;;  %v6720_v7 = vor.u32 %v9041_v61, %v6717_v62  ;;  %v6320_v17 = vor.u32 %v8941_v2, %v6317_v3  ;;  %v6429_v12 = vld [vmem:[#allocation4 + $0x190] sm:$0xf0] }
  0xa4   :  { %vm189_vm0 = vcmp.gt.s32.totalorder %v188_v19, 0  ;;  %vm343_vm1 = vcmp.gt.s32.totalorder %v342_v24, 0  ;;  %1654 = vmatpush.bf16.msrb.mxu2 %v6608_v54  ;;  %v9005_v10 = vld [vmem:[#allocation4 + $0x2a4] sm:$0xf]  ;;  %v6448_v27 = vor.u32 %v8973_v22, %v6445_v9  ;;  %v6557_v28 = vld [vmem:[#allocation4 + $0x290] sm:$0xf0] }
  0xa5   :  { %v190_v35 = vsel %vm189_vm0, %v188_v19, 0  ;;  %v9948_v53 = vsel %vm343_vm1, %v342_v24, 0  ;;  %1621 = vmatpush.bf16.msra.mxu3 %v6636_v32  ;;  %v6701_v19 = vld [vmem:[#allocation4 + $0x3b0] sm:$0xf0]  ;;  %v8937_v24 = vld [vmem:[#allocation4 + $0x84] sm:$0xf]  ;;  %v6576_v30 = vor.u32 %v9005_v10, %v6573_v16 }
  0xa6   :  { %v9945_v52 = vand.u32 31, %v190_v35  ;;  %v9954_v4 = vshrl.u32 %v190_v35, 5  ;;  %v9960_v11 = vand.u32 31, %v9948_v53  ;;  %v8969_v26 = vld [vmem:[#allocation4 + $0x184] sm:$0xf]  ;;  %v6704_v5 = vor.u32 %v9037_v18, %v6701_v19 }
  0xa7   :  { %1583 = vmatpush.bf16.msra.mxu0 %v6236_v36  ;;  %1596 = vmatpush.bf16.msra.mxu1 %v6364_v48  ;;  %v9001_v13 = vld [vmem:[#allocation4 + $0x284] sm:$0xf]  ;;  %v6685_v15 = vld [vmem:[#allocation4 + $0x390] sm:$0xf0]  ;;  %v6304_v33 = vor.u32 %v8937_v24, %v6301_v25  ;;  %v6432_v48 = vor.u32 %v8969_v26, %v6429_v12  ;;  %v178_v25 = vand.u32 2147483647, %v9933_v43 }
  0xa8   :  { %v9957_v6 = vsub.s32 32, %v9945_v52  ;;  %v9033_v14 = vld [vmem:[#allocation4 + $0x384] sm:$0xf]  ;;  %1655 = vmatpush.bf16.msrb.mxu2 %v6592_v23  ;;  %v6285_v32 = vld [vmem:[#allocation4 + $0x70] sm:$0xf0]  ;;  %vm497_vm2 = vcmp.gt.s32.totalorder %v9950_v63, 0 }
  0xa9   :  { %1622 = vmatpush.bf16.msra.mxu3 %v6620_v8  ;;  %v8933_v31 = vld [vmem:[#allocation4 + $0x64] sm:$0xf]  ;;  %v6413_v35 = vld [vmem:[#allocation4 + $0x170] sm:$0xf0]  ;;  %v6560_v8 = vor.u32 %v9001_v13, %v6557_v28  ;;  %v185_v28 = vand.u32 8388607, %v178_v25 }
  0xaa   :  { %v8965_v34 = vld [vmem:[#allocation4 + $0x164] sm:$0xf]  ;;  %v6541_v37 = vld [vmem:[#allocation4 + $0x270] sm:$0xf0]  ;;  %v6288_v57 = vor.u32 %v8933_v31, %v6285_v32  ;;  %vm210_vm3 = vcmp.lt.s32.totalorder %v9954_v4, 1  ;;  %vm213_vm4 = vcmp.lt.s32.totalorder %v9954_v4, 4 }
  0xab   :  { %1628 = vmatpush.bf16.msrb.mxu0 %v6352_v39  ;;  %1641 = vmatpush.bf16.msrb.mxu1 %v6480_v20  ;;  %v8997_v36 = vld [vmem:[#allocation4 + $0x264] sm:$0xf]  ;;  %v6669_v39 = vld [vmem:[#allocation4 + $0x370] sm:$0xf0]  ;;  %v6688_v20 = vor.u32 %v9033_v14, %v6685_v15  ;;  %v6416_v61 = vor.u32 %v8965_v34, %v6413_v35  ;;  %v9838_v14 = vmov 683565275  }
  0xac   :  { %v9029_v38 = vld [vmem:[#allocation4 + $0x364] sm:$0xf]  ;;  %v9964_v41 = vld [vmem:[#allocation4 + $0x50] sm:$0xf0]  ;;  %1656 = vmatpush.bf16.msrb.mxu2 %v6576_v30  ;;  %v6544_v62 = vor.u32 %v8997_v36, %v6541_v37  ;;  %v195_v30 = vshll.u32 %v9838_v14, %v9945_v52  ;;  %v9839_v15 = vmov 2475754826  }
  0xad   :  { %1667 = vmatpush.bf16.msrb.mxu3 %v6736_v55  ;;  %v9962_v40 = vld [vmem:[#allocation4 + $0x44] sm:$0xf]  ;;  %v9968_v29 = vld [vmem:[#allocation4 + $0x150] sm:$0xf0]  ;;  %v6672_v22 = vor.u32 %v9029_v38, %v6669_v39  ;;  %v196_v31 = vshrl.u32 %v9839_v15, %v9957_v6  ;;  %v198_v32 = vshll.u32 %v9839_v15, %v9945_v52  ;;  %v9840_v36 = vmov 2131351028  }
  0xae   :  { %v9966_v42 = vld [vmem:[#allocation4 + $0x144] sm:$0xf]  ;;  %v9972_v49 = vld [vmem:[#allocation4 + $0x250] sm:$0xf0]  ;;  %v6272_v23 = vor.u32 %v9962_v40, %v9964_v41  ;;  %v199_v37 = vshrl.u32 %v9840_v36, %v9957_v6  ;;  %v201_v38 = vshll.u32 %v9840_v36, %v9945_v52  ;;  %v9841_v39 = vmov 2102212464  }
  0xaf   :  { %1629 = vmatpush.bf16.msrb.mxu0 %v6336_v59  ;;  %1642 = vmatpush.bf16.msrb.mxu1 %v6464_v21  ;;  %v9970_v47 = vld [vmem:[#allocation4 + $0x244] sm:$0xf]  ;;  %v9976_v51 = vld [vmem:[#allocation4 + $0x350] sm:$0xf0]  ;;  %v202_v40 = vshrl.u32 %v9841_v39, %v9957_v6  ;;  %v186_v41 = vor.u32 8388608, %v185_v28  ;;  %vm211_vm5 = vcmp.lt.s32.totalorder %v9954_v4, 2 }
  0xb0   :  { %v9974_v50 = vld [vmem:[#allocation4 + $0x344] sm:$0xf]  ;;  %v9980_v55 = vld [vmem:[#allocation4 + $0x30] sm:$0xf0]  ;;  %v6528_v9 = vor.u32 %v9970_v47, %v9972_v49  ;;  %1657 = vmatpush.bf16.msrb.mxu2 %v6560_v8  ;;  %v9842_v49 = vmov 920167782  }
  0xb1   :  { %1668 = vmatpush.bf16.msrb.mxu3 %v6720_v7  ;;  %v9978_v54 = vld [vmem:[#allocation4 + $0x24] sm:$0xf]  ;;  %v9984_v58 = vld [vmem:[#allocation4 + $0x130] sm:$0xf0]  ;;  %v6400_v7 = vor.u32 %v9966_v42, %v9968_v29  ;;  %v6656_v18 = vor.u32 %v9974_v50, %v9976_v51  ;;  %v197_v42 = vor.u32 %v196_v31, %v195_v30  ;;  %v200_v29 = vor.u32 %v199_v37, %v198_v32 }
  0xb2   :  { %v9982_v56 = vld [vmem:[#allocation4 + $0x124] sm:$0xf]  ;;  %v9988_v60 = vld [vmem:[#allocation4 + $0x230] sm:$0xf0]  ;;  %v6256_v19 = vor.u32 %v9978_v54, %v9980_v55  ;;  %v203_v47 = vor.u32 %v202_v40, %v201_v38  ;;  %v205_v50 = vshrl.u32 %v9842_v49, %v9957_v6  ;;  %v9843_v54 = vmov 1326507024  }
  0xb3   :  { %1630 = vmatpush.bf16.msrb.mxu0 %v6320_v17  ;;  %1643 = vmatpush.bf16.msrb.mxu1 %v6448_v27  ;;  %v9986_v59 = vld [vmem:[#allocation4 + $0x224] sm:$0xf]  ;;  %v9992_v3 = vld [vmem:[#allocation4 + $0x330] sm:$0xf0]  ;;  %v6384_v24 = vor.u32 %v9982_v56, %v9984_v58  ;;  %v208_v55 = vshrl.u32 %v9843_v54, %v9957_v6  ;;  %v194_v56 = vshrl.u32 %v9838_v14, %v9957_v6  ;;  %vm212_vm6 = vcmp.lt.s32.totalorder %v9954_v4, 3 }
  0xb4   :  { %v9990_v2 = vld [vmem:[#allocation4 + $0x324] sm:$0xf]  ;;  %v10002_v10 = vld [vmem:[#allocation4 + $0x10] sm:$0xf0]  ;;  %v6512_v26 = vor.u32 %v9986_v59, %v9988_v60  ;;  %1658 = vmatpush.bf16.msrb.mxu2 %v6544_v62  ;;  %v215_v59 = vsel %vm213_vm4, %v203_v47, 2102212464  ;;  %v218_v60 = vsel %vm210_vm3, %v197_v42, %v200_v29  ;;  %v222_v62 = vsel %vm210_vm3, %v200_v29, %v203_v47 }
  0xb5   :  { %1669 = vmatpush.bf16.msrb.mxu3 %v6704_v5  ;;  %v9994_v21 = vld [vmem:[#allocation4 + $0x4] sm:$0xf]  ;;  %v10006_v17 = vld [vmem:[#allocation4 + $0x110] sm:$0xf0]  ;;  %v6640_v12 = vor.u32 %v9990_v2, %v9992_v3  ;;  %v214_v2 = vsel %vm210_vm3, %v194_v56, %v197_v42  ;;  %v216_v6 = vsel %vm212_vm6, %v200_v29, %v215_v59  ;;  %v10065_v28 = vshrl.u32 %v9948_v53, 5 }
  0xb6   :  { %v10004_v16 = vld [vmem:[#allocation4 + $0x104] sm:$0xf]  ;;  %v6240_v27 = vor.u32 %v9994_v21, %v10002_v10  ;;  %v6621_v35 = vld [vmem:[#allocation4 + $0x310] sm:$0xf0]  ;;  %vm651_vm9 = vcmp.gt.s32.totalorder %v9952_v1, 0  ;;  %vm180_vm1 = vcmp.lt.s32.totalorder %v9933_v43, 0 }
  0xb7   :  { %1631 = vmatpush.bf16.msrb.mxu0 %v6304_v33  ;;  %1644 = vmatpush.bf16.msrb.mxu1 %v6432_v48  ;;  %v6368_v13 = vor.u32 %v10004_v16, %v10006_v17  ;;  %v10028_v5 = vld [vmem:[#allocation4 + $0x204] sm:$0xf]  ;;  %v6493_v33 = vld [vmem:[#allocation4 + $0x210] sm:$0xf0]  ;;  %v204_v48 = vshll.u32 %v9841_v39, %v9945_v52  ;;  %vm364_vm12 = vcmp.lt.s32.totalorder %v10065_v28, 1  ;;  %vm367_vm13 = vcmp.lt.s32.totalorder %v10065_v28, 4 }
  0xb8   :  { %v9017_v34 = vld [vmem:[#allocation4 + $0x304] sm:$0xf]  ;;  %v6496_v51 = vor.u32 %v10028_v5, %v6493_v33  ;;  %1659 = vmatpush.bf16.msrb.mxu2 %v6528_v9  ;;  %v332_v9 = vand.u32 2147483647, %v9935_v44  ;;  %v10073_v5 = vsub.s32 32, %v9960_v11  ;;  %vm366_vm14 = vcmp.lt.s32.totalorder %v10065_v28, 3 }
  0xb9   :  { %1670 = vmatpush.bf16.msrb.mxu3 %v6688_v20  ;;  %v6624_v8 = vor.u32 %v9017_v34, %v6621_v35  ;;  %v207_v20 = vshll.u32 %v9842_v49, %v9945_v52  ;;  %vm365_vm0 = vcmp.lt.s32.totalorder %v10065_v28, 2  ;;  %v486_v28 = vand.u32 2147483647, %v9937_v45 }
  0xba   :  { %v10084_v34 = vand.u32 8388607, %v332_v9 }
  0xbb   :  { %1632 = vmatpush.bf16.msrb.mxu0 %v6288_v57  ;;  %1645 = vmatpush.bf16.msrb.mxu1 %v6416_v61  ;;  %v206_v57 = vor.u32 %v205_v50, %v204_v48  ;;  %v209_v58 = vor.u32 %v208_v55, %v207_v20  ;;  %v10053_v61 = vshll.u32 %v186_v41, 8  ;;  %v350_v50 = vshrl.u32 %v9839_v15, %v10073_v5 }
  0xbc   :  { %1660 = vmatpush.bf16.msrb.mxu2 %v6512_v26  ;;  %v10070_v26 = vsel %vm497_vm2, %v9950_v63, 0 }
  0xbd   :  { %1671 = vmatpush.bf16.msrb.mxu3 %v6672_v22  ;;  %v219_v52 = vsel %vm213_vm4, %v206_v57, 920167782  ;;  %v223_v21 = vsel %vm213_vm4, %v209_v58, 1326507024 }
  0xbe   :  { %v220_v3 = vsel %vm212_vm6, %v203_v47, %v219_v52  ;;  %v353_v52 = vshrl.u32 %v9840_v36, %v10073_v5 }
  0xbf   :  { %1633 = vmatpush.bf16.msrb.mxu0 %v6272_v23  ;;  %1646 = vmatpush.bf16.msrb.mxu1 %v6400_v7  ;;  %v221_v22 = vsel %vm211_vm5, %v218_v60, %v220_v3  ;;  %v224_v23 = vsel %vm212_vm6, %v206_v57, %v223_v21  ;;  %v227_v7 = vand.u32 65535, %v10053_v61  ;;  %v349_v57 = vshll.u32 %v9838_v14, %v9960_v11 }
  0xc0   :  { %v225_v10 = vsel %vm211_vm5, %v222_v62, %v224_v23  ;;  %1661 = vmatpush.bf16.msrb.mxu2 %v6496_v51  ;;  %v352_v60 = vshll.u32 %v9839_v15, %v9960_v11  ;;  %v356_v3 = vshrl.u32 %v9841_v39, %v10073_v5  ;;  %v358_v23 = vshll.u32 %v9841_v39, %v9960_v11 }
  0xc1   :  { %1672 = vmatpush.bf16.msrb.mxu3 %v6656_v18  ;;  %v228_v18 = vshrl.u32 %v10053_v61, 16  ;;  %v230_v30 = vshrl.u32 %v225_v10, 16 }
  0xc3   :  { %1634 = vmatpush.bf16.msrb.mxu0 %v6256_v19  ;;  %1647 = vmatpush.bf16.msrb.mxu1 %v6384_v24  ;;  %v251_v19 = vand.u32 65535, %v221_v22  ;;  %v252_v24 = vshrl.u32 %v221_v22, 16  ;;  %v232_v32 = vmul.u32 %v230_v30, %v227_v7  ;;  %v234_v37 = vmul.u32 %v230_v30, %v228_v18 }
  0xc4   :  { %v354_v22 = vor.u32 %v353_v52, %v352_v60 }
  0xc5   :  { %1673 = vmatpush.bf16.msrb.mxu3 %v6640_v12  ;;  %v229_v12 = vand.u32 65535, %v225_v10  ;;  %v254_v53 = vmul.u32 %v252_v24, %v227_v7  ;;  %v255_v31 = vmul.u32 %v251_v19, %v228_v18  ;;  %v253_v33 = vmul.u32 %v251_v19, %v227_v7 }
  0xc6   :  { %v256_v38 = vmul.u32 %v252_v24, %v228_v18  ;;  %v235_v17 = vshll.u32 %v232_v32, 16  ;;  %v361_v19 = vshll.u32 %v9842_v49, %v9960_v11  ;;  %v362_v24 = vshrl.u32 %v9843_v54, %v10073_v5 }
  0xc7   :  { %1635 = vmatpush.bf16.msrb.mxu0 %v6240_v27  ;;  %1648 = vmatpush.bf16.msrb.mxu1 %v6368_v13  ;;  %v10080_v27 = vsel %vm211_vm5, %v214_v2, %v216_v6  ;;  %v233_v63 = vmul.u32 %v229_v12, %v228_v18  ;;  %v231_v35 = vmul.u32 %v229_v12, %v227_v7  ;;  %v257_v16 = vshll.u32 %v254_v53, 16 }
  0xc8   :  { %v236_v13 = vshrl.u32 %v232_v32, 16  ;;  %v258_v4 = vshrl.u32 %v254_v53, 16  ;;  %v259_v40 = vshll.u32 %v255_v31, 16  ;;  %v351_v2 = vor.u32 %v350_v50, %v349_v57 }
  0xc9   :  { %1674 = vmatpush.bf16.msrb.mxu3 %v6624_v8  ;;  %v237_v41 = vshll.u32 %v233_v63, 16  ;;  %v238_v42 = vshrl.u32 %v233_v63, 16  ;;  %vm261_vm7 = vc.u32 %v253_v33, %v257_v16  ;;  %v263_v29 = vadd.s32 %v257_v16, %v253_v33 }
  0xca   :  { %vm239_vm8 = vc.u32 %v231_v35, %v235_v17  ;;  %v241_v47 = vadd.s32 %v235_v17, %v231_v35  ;;  %v262_v48 = vsel %vm261_vm7, 1, %v9835_v0  ;;  %v260_v8 = vshrl.u32 %v255_v31, 16 }
  0xcb   :  { %v240_v51 = vsel %vm239_vm8, 1, %v9835_v0  ;;  %v264_v20 = vadd.s32 %v262_v48, %v256_v38  ;;  %vm265_vm10 = vc.u32 %v263_v29, %v259_v40  ;;  %v355_v6 = vshll.u32 %v9840_v36, %v9960_v11 }
  0xcc   :  { %v242_v55 = vadd.s32 %v240_v51, %v234_v37  ;;  %vm243_vm11 = vc.u32 %v241_v47, %v237_v41  ;;  %v266_v56 = vsel %vm265_vm10, 1, %v9835_v0  ;;  %v359_v7 = vshrl.u32 %v9842_v49, %v10073_v5 }
  0xcd   :  { %v244_v58 = vsel %vm243_vm11, 1, %v9835_v0  ;;  %v268_v59 = vadd.s32 %v266_v56, %v264_v20  ;;  %v357_v18 = vor.u32 %v356_v3, %v355_v6  ;;  %v10111_v12 = vadd.s32 %v263_v29, %v259_v40 }
  0xce   :  { %v246_v62 = vadd.s32 %v244_v58, %v242_v55  ;;  %v340_v53 = vor.u32 8388608, %v10084_v34  ;;  %v360_v31 = vor.u32 %v359_v7, %v358_v23  ;;  %v363_v63 = vor.u32 %v362_v24, %v361_v19 }
  0xcf   :  { %v269_v21 = vadd.s32 %v268_v59, %v258_v4  ;;  %v372_v11 = vsel %vm364_vm12, %v351_v2, %v354_v22  ;;  %v271_v34 = vmul.u32 %v10053_v61, %v10080_v27  ;;  %v376_v17 = vsel %vm364_vm12, %v354_v22, %v357_v18 }
  0xd0   :  { %v247_v10 = vadd.s32 %v246_v62, %v236_v13  ;;  %v373_v35 = vsel %vm367_vm13, %v360_v31, 920167782  ;;  %v10137_v13 = vsel %vm651_vm9, %v9952_v1, 0  ;;  %v377_v27 = vsel %vm367_vm13, %v363_v63, 1326507024 }
  0xd1   :  { %v270_v30 = vadd.s32 %v269_v21, %v260_v8  ;;  %v374_v37 = vsel %vm366_vm14, %v357_v18, %v373_v35  ;;  %v10141_v4 = vshll.u32 %v340_v53, 8  ;;  %v10144_v40 = vand.u32 31, %v10070_v26 }
  0xd2   :  { %v10114_v32 = vadd.s32 %v247_v10, %v238_v42  ;;  %v375_v16 = vsel %vm365_vm0, %v372_v11, %v374_v37  ;;  %v369_v41 = vsel %vm367_vm13, %v357_v18, 2102212464  ;;  %v378_v42 = vsel %vm366_vm14, %v360_v31, %v377_v27 }
  0xd3   :  { %v274_v33 = vadd.s32 1, %v270_v30  ;;  %v406_v29 = vshrl.u32 %v375_v16, 16  ;;  %v379_v1 = vsel %vm365_vm0, %v376_v17, %v378_v42  ;;  %v381_v48 = vand.u32 65535, %v10141_v4 }
  0xd4   :  { %vm273_vm15 = vc.u32 %v10114_v32, %v10111_v12  ;;  %v405_v50 = vand.u32 65535, %v375_v16  ;;  %v348_v51 = vshrl.u32 %v9838_v14, %v10073_v5  ;;  %v382_v8 = vshrl.u32 %v10141_v4, 16 }
  0xd5   :  { %v275_v38 = vsel %vm273_vm15, %v274_v33, %v270_v30  ;;  %v383_v20 = vand.u32 65535, %v379_v1  ;;  %v384_v55 = vshrl.u32 %v379_v1, 16  ;;  %v408_v57 = vmul.u32 %v406_v29, %v381_v48 }
  0xd6   :  { %v276_v61 = vadd.s32 %v275_v38, %v271_v34  ;;  %v368_v58 = vsel %vm364_vm12, %v348_v51, %v351_v2  ;;  %v370_v59 = vsel %vm366_vm14, %v354_v22, %v369_v41  ;;  %v10161_v62 = vshrl.u32 %v10070_v26, 5 }
  0xd7   :  { %v386_v60 = vmul.u32 %v384_v55, %v381_v48  ;;  %v387_v52 = vmul.u32 %v383_v20, %v382_v8  ;;  %v10164_v6 = vand.u32 31, %v10137_v13  ;;  %v409_v3 = vmul.u32 %v405_v50, %v382_v8 }
  0xd8   :  { %v277_v47 = vadd.s32 536870912, %v276_v61  ;;  %v10167_v21 = vsub.s32 32, %v10144_v40  ;;  %v385_v23 = vmul.u32 %v383_v20, %v381_v48  ;;  %v411_v10 = vshll.u32 %v408_v57, 16 }
  0xd9   :  { %v389_v7 = vshll.u32 %v386_v60, 16  ;;  %v10172_v22 = vsel %vm365_vm0, %v368_v58, %v370_v59  ;;  %v407_v26 = vmul.u32 %v405_v50, %v381_v48  ;;  %v388_v18 = vmul.u32 %v384_v55, %v382_v8 }
  0xda   :  { %v278_v56 = vshrl.u32 %v277_v47, 30  ;;  %v391_v19 = vshll.u32 %v387_v52, 16  ;;  %v413_v31 = vshll.u32 %v409_v3, 16  ;;  %v410_v34 = vmul.u32 %v406_v29, %v382_v8 }
  0xdb   :  { %vm393_vm2 = vc.u32 %v385_v23, %v389_v7  ;;  %v395_v24 = vadd.s32 %v389_v7, %v385_v23  ;;  %vm415_vm5 = vc.u32 %v407_v26, %v411_v10  ;;  %v417_v33 = vadd.s32 %v411_v10, %v407_v26 }
  0xdc   :  { %v279_v5 = vshll.u32 %v278_v56, 30  ;;  %v394_v53 = vsel %vm393_vm2, 1, %v9835_v0  ;;  %v302_v35 = vsub.s32 4, %v278_v56  ;;  %v416_v16 = vsel %vm415_vm5, 1, %v9835_v0 }
  0xdd   :  { %v396_v63 = vadd.s32 %v394_v53, %v388_v18  ;;  %vm397_vm4 = vc.u32 %v395_v24, %v391_v19  ;;  %vm419_vm6 = vc.u32 %v417_v33, %v413_v31  ;;  %v390_v17 = vshrl.u32 %v386_v60, 16 }
  0xde   :  { %v280_v2 = vsub.s32 %v276_v61, %v279_v5  ;;  %v398_v38 = vsel %vm397_vm4, 1, %v9835_v0  ;;  %v418_v27 = vadd.s32 %v416_v16, %v410_v34  ;;  %v420_v41 = vsel %vm419_vm6, 1, %v9835_v0 }
  0xdf   :  { %v400_v61 = vadd.s32 %v398_v38, %v396_v63  ;;  %v272_v42 = vadd.s32 %v10111_v12, %v10114_v32  ;;  %v392_v1 = vshrl.u32 %v387_v52, 16  ;;  %v425_v29 = vmul.u32 %v10141_v4, %v10172_v22 }
  0xe0   :  { %vm281_vm3 = vcmp.lt.s32.totalorder %v280_v2, 0  ;;  %v282_v30 = vsub.s32 0, %v280_v2  ;;  %v10185_v48 = vsel %vm180_vm1, %v302_v35, %v278_v56  ;;  %v412_v51 = vshrl.u32 %v408_v57, 16 }
  0xe1   :  { %v401_v50 = vadd.s32 %v400_v61, %v390_v17  ;;  %v422_v8 = vadd.s32 %v420_v41, %v418_v27  ;;  %v414_v20 = vshrl.u32 %v409_v3, 16  ;;  %v10187_v55 = vadd.s32 %v417_v33, %v413_v31 }
  0xe2   :  { %v283_v11 = vsel %vm281_vm3, %v282_v30, %v280_v2  ;;  %v493_v58 = vand.u32 8388607, %v486_v28  ;;  %v504_v4 = vshrl.u32 %v9839_v15, %v10167_v21  ;;  %v506_v57 = vshll.u32 %v9839_v15, %v10144_v40 }
  0xe3   :  { %v284_v37 = vclz %v283_v11  ;;  %v10191_v32 = vadd.s32 %v401_v50, %v392_v1  ;;  %v423_v59 = vadd.s32 %v422_v8, %v412_v51  ;;  %v507_v52 = vshrl.u32 %v9840_v36, %v10167_v21 }
  0xe4   :  { %v510_v23 = vshrl.u32 %v9841_v39, %v10167_v21  ;;  %v512_v22 = vshll.u32 %v9841_v39, %v10144_v40  ;;  %v513_v26 = vshrl.u32 %v9842_v49, %v10167_v21  ;;  %v509_v19 = vshll.u32 %v9840_v36, %v10144_v40 }
  0xe5   :  { %v6222_v47 = vadd.s32 4294967294, %v284_v37  ;;  %v424_v3 = vadd.s32 %v423_v59, %v414_v20  ;;  %vm427_vm8 = vc.u32 %v10191_v32, %v10187_v55  ;;  %v516_v24 = vshrl.u32 %v9843_v54, %v10167_v21 }
  0xe6   :  { %v503_v31 = vshll.u32 %v9838_v14, %v10144_v40  ;;  %v514_v63 = vor.u32 %v513_v26, %v512_v22  ;;  %v508_v11 = vor.u32 %v507_v52, %v506_v57  ;;  %v511_v35 = vor.u32 %v510_v23, %v509_v19 }
  0xe7   :  { %vm6223_vm7 = vcmp.lt.s32.totalorder %v6222_v47, 0  ;;  %v428_v18 = vadd.s32 1, %v424_v3  ;;  %vm10217_vm9 = vcmp.le.f32.partialorder %v178_v25, 0.7853982  ;;  %v494_v17 = vor.u32 8388608, %v493_v58 }
  0xe8   :  { %v287_v12 = vsel %vm6223_vm7, 0, %v6222_v47  ;;  %v305_v61 = vsel %vm10217_vm9, 0, %v10185_v48  ;;  %v505_v27 = vor.u32 %v504_v4, %v503_v31  ;;  %vm518_vm10 = vcmp.lt.s32.totalorder %v10161_v62, 1 }
  0xe9   :  { %v288_v60 = vsub.s32 32, %v287_v12  ;;  %v292_v56 = vsub.s32 4294967266, %v287_v12  ;;  %v289_v5 = vshll.u32 %v280_v2, %v287_v12  ;;  %v515_v2 = vshll.u32 %v9842_v49, %v10144_v40 }
  0xea   :  { %v429_v33 = vsel %vm427_vm8, %v428_v18, %v424_v3  ;;  %vm521_vm11 = vcmp.lt.s32.totalorder %v10161_v62, 4  ;;  %vm519_vm12 = vcmp.lt.s32.totalorder %v10161_v62, 2  ;;  %vm520_vm13 = vcmp.lt.s32.totalorder %v10161_v62, 3 }
  0xeb   :  { %v290_v7 = vshrl.u32 %v272_v42, %v288_v60  ;;  %v293_v10 = vadd.s32 127, %v292_v56  ;;  %v517_v34 = vor.u32 %v516_v24, %v515_v2  ;;  %v430_v16 = vadd.s32 %v429_v33, %v425_v29 }
  0xec   :  { %v527_v25 = vsel %vm521_vm11, %v514_v63, 920167782  ;;  %v530_v47 = vsel %vm518_vm10, %v508_v11, %v511_v35  ;;  %v10238_v51 = vshll.u32 %v494_v17, 8  ;;  %v526_v8 = vsel %vm518_vm10, %v505_v27, %v508_v11 }
  0xed   :  { %v291_v30 = vor.u32 %v290_v7, %v289_v5  ;;  %v294_v53 = vshll.u32 %v293_v10, 23  ;;  %v431_v42 = vadd.s32 536870912, %v430_v16  ;;  %v531_v1 = vsel %vm521_vm11, %v517_v34, 1326507024 }
  0xee   :  { %v532_v50 = vsel %vm520_vm13, %v514_v63, %v531_v1  ;;  %v528_v20 = vsel %vm520_vm13, %v511_v35, %v527_v25  ;;  %v10247_v12 = vshrl.u32 %v10137_v13, 5  ;;  %v10250_v59 = vsub.s32 32, %v10164_v6 }
  0xef   :  { %v295_v38 = vor.u32 4788187, %v294_v53  ;;  %v298_v41 = vcvt.s32.f32 %v291_v30  ;;  %v10234_v48 = vshrl.u32 %v431_v42, 30  ;;  %v533_v58 = vsel %vm519_vm12, %v530_v47, %v532_v50 }
  0xf0   :  { %v10253_v56 = vand.u32 3, %v305_v61  ;;  %v535_v57 = vand.u32 65535, %v10238_v51  ;;  %v537_v52 = vand.u32 65535, %v533_v58  ;;  %v538_v5 = vshrl.u32 %v533_v58, 16 }
  0xf1   :  { %v296_v40 = vand.u32 2147483647, %v295_v38  ;;  %v433_v60 = vshll.u32 %v10234_v48, 30  ;;  %v502_v13 = vshrl.u32 %v9838_v14, %v10167_v21  ;;  %v529_v7 = vsel %vm519_vm12, %v526_v8, %v528_v20 }
  0xf2   :  { %v426_v22 = vadd.s32 %v10187_v55, %v10191_v32  ;;  %v536_v26 = vshrl.u32 %v10238_v51, 16  ;;  %v540_v18 = vmul.u32 %v538_v5, %v535_v57  ;;  %v523_v2 = vsel %vm521_vm11, %v511_v35, 2102212464 }
  0xf3   :  { %v299_v29 = vmul.f32 %v298_v41, %v296_v40  ;;  %v10258_v23 = vsub.s32 %v430_v16, %v433_v60  ;;  %v559_v53 = vand.u32 65535, %v529_v7  ;;  %v560_v31 = vshrl.u32 %v529_v7, 16 }
  0xf4   :  { %v10278_v24 = vmul.u32 %v537_v52, %v536_v26  ;;  %v543_v30 = vshll.u32 %v540_v18, 16  ;;  %v539_v33 = vmul.u32 %v537_v52, %v535_v57  ;;  %v522_v37 = vsel %vm518_vm10, %v502_v13, %v505_v27 }
  0xf5   :  { %v300_v4 = vxor.u32 2147483648, %v299_v29  ;;  %vm435_vm14 = vcmp.lt.s32.totalorder %v10258_v23, 0  ;;  %v436_v21 = vsub.s32 0, %v10258_v23  ;;  %v524_v38 = vsel %vm520_vm13, %v508_v11, %v523_v2 }
  0xf6   :  { %v542_v16 = vmul.u32 %v538_v5, %v536_v26  ;;  %v545_v61 = vshll.u32 %v10278_v24, 16  ;;  %vm547_vm15 = vc.u32 %v539_v33, %v543_v30  ;;  %v549_v42 = vadd.s32 %v543_v30, %v539_v33 }
  0xf7   :  { %v301_v3 = vsel %vm180_vm1, %v300_v4, %v299_v29  ;;  %v437_v32 = vsel %vm435_vm14, %v436_v21, %v10258_v23  ;;  %v548_v41 = vsel %vm547_vm15, 1, %v9835_v0  ;;  %v562_v25 = vmul.u32 %v560_v31, %v535_v57 }
  0xf8   :  { %v10267_v10 = vsel %vm10217_vm9, %v9933_v43, %v301_v3  ;;  %v438_v34 = vclz %v437_v32  ;;  %v550_v29 = vadd.s32 %v548_v41, %v542_v16  ;;  %v561_v50 = vmul.u32 %v559_v53, %v535_v57 }
  0xf9   :  { %v306_v19 = vmul.f32 %v10267_v10, %v10267_v10  ;;  %vm551_vm1 = vc.u32 %v549_v42, %v545_v61  ;;  %v563_v27 = vmul.u32 %v559_v53, %v536_v26  ;;  %v565_v8 = vshll.u32 %v562_v25, 16 }
  0xfa   :  { %v6225_v40 = vadd.s32 4294967294, %v438_v34  ;;  %v552_v4 = vsel %vm551_vm1, 1, %v9835_v0  ;;  %vm324_vm2 = vcmp.eq.s32.totalorder %v10253_v56, 0  ;;  %vm327_vm3 = vcmp.eq.s32.totalorder %v10253_v56, 2 }
  0xfb   :  { %v307_v63 = vmul.f32 -0.001358992, %v306_v19  ;;  %v314_v55 = vmul.f32 -0.00019511016, %v306_v19  ;;  %v544_v5 = vshrl.u32 %v540_v18, 16  ;;  %v554_v3 = vadd.s32 %v552_v4, %v550_v29 }
  0xfc   :  { %vm6226_vm0 = vcmp.lt.s32.totalorder %v6225_v40, 0  ;;  %vm323_vm4 = vcmp.lt.s32.totalorder %v10253_v56, 2  ;;  %v564_v21 = vmul.u32 %v560_v31, %v536_v26  ;;  %vm321_vm5 = vweird.f32 %v9933_v43 }
  0xfd   :  { %v308_v17 = vadd.f32 0.041655596, %v307_v63  ;;  %v315_v35 = vadd.f32 0.008332121, %v314_v55  ;;  %v441_v58 = vsel %vm6226_vm0, 0, %v6225_v40  ;;  %vm334_vm6 = vcmp.lt.s32.totalorder %v9935_v44, 0 }
  0xfe   :  { %v442_v60 = vsub.s32 32, %v441_v58  ;;  %v446_v52 = vsub.s32 4294967266, %v441_v58  ;;  %v443_v57 = vshll.u32 %v10258_v23, %v441_v58  ;;  %v555_v53 = vadd.s32 %v554_v3, %v544_v5 }
  0xff   :  { %v309_v47 = vmul.f32 %v308_v17, %v306_v19  ;;  %v316_v1 = vmul.f32 %v315_v35, %v306_v19  ;;  %v567_v63 = vshll.u32 %v563_v27, 16  ;;  %vm569_vm7 = vc.u32 %v561_v50, %v565_v8 }
 0x100   :  { %v444_v2 = vshrl.u32 %v426_v22, %v442_v60  ;;  %v447_v30 = vadd.s32 127, %v446_v52  ;;  %v571_v18 = vadd.s32 %v565_v8, %v561_v50  ;;  %v570_v16 = vsel %vm569_vm7, 1, %v9835_v0 }
 0x101   :  { %v310_v11 = vadd.f32 -0.4999988, %v309_v47  ;;  %v317_v20 = vadd.f32 -0.16666654, %v316_v1  ;;  %v572_v31 = vadd.s32 %v570_v16, %v564_v21  ;;  %v456_v22 = vsub.s32 4, %v10234_v48 }
 0x102   :  { %v445_v33 = vor.u32 %v444_v2, %v443_v57  ;;  %v448_v34 = vshll.u32 %v447_v30, 23  ;;  %vm573_vm8 = vc.u32 %v571_v18, %v567_v63  ;;  %v525_v35 = vsel %vm519_vm12, %v522_v37, %v524_v38 }
 0x103   :  { %v311_v13 = vmul.f32 %v310_v11, %v306_v19  ;;  %v318_v7 = vmul.f32 %v317_v20, %v306_v19  ;;  %v546_v19 = vshrl.u32 %v10278_v24, 16  ;;  %v574_v61 = vsel %vm573_vm8, 1, %v9835_v0 }
 0x104   :  { %v449_v17 = vor.u32 4788187, %v448_v34  ;;  %v566_v42 = vshrl.u32 %v562_v25, 16  ;;  %v576_v24 = vadd.s32 %v574_v61, %v572_v31  ;;  %v452_v1 = vcvt.s32.f32 %v445_v33 }
 0x105   :  { %v312_v55 = vadd.f32 1.0, %v311_v13  ;;  %v319_v32 = vadd.f32 1.0, %v318_v7  ;;  %v10301_v41 = vadd.s32 %v555_v53, %v546_v19  ;;  %v568_v29 = vshrl.u32 %v563_v27, 16 }
 0x106   :  { %v450_v47 = vand.u32 2147483647, %v449_v17  ;;  %v10308_v62 = vadd.s32 %v571_v18, %v567_v63  ;;  %v577_v37 = vadd.s32 %v576_v24, %v566_v42  ;;  %vm10314_vm9 = vcmp.le.f32.partialorder %v332_v9, 0.7853982 }
 0x107   :  { %v320_v23 = vmul.f32 %v319_v32, %v10267_v10  ;;  %v328_v26 = vxor.u32 2147483648, %v312_v55  ;;  %v640_v10 = vand.u32 2147483647, %v9939_v46  ;;  %v579_v11 = vmul.u32 %v10238_v51, %v525_v35 }
 0x108   :  { %v453_v27 = vmul.f32 %v452_v1, %v450_v47  ;;  %v457_v58 = vsel %vm334_vm6, %v456_v22, %v10234_v48  ;;  %v578_v4 = vadd.s32 %v577_v37, %v568_v29  ;;  %vm581_vm10 = vc.u32 %v10301_v41, %v10308_v62 }
 0x109   :  { %v325_v40 = vxor.u32 2147483648, %v320_v23  ;;  %v329_v8 = vsel %vm327_vm3, %v328_v26, %v320_v23  ;;  %v647_v60 = vand.u32 8388607, %v640_v10  ;;  %v657_v51 = vshll.u32 %v9838_v14, %v10164_v6 }
 0x10a   :  { %v454_v9 = vxor.u32 2147483648, %v453_v27  ;;  %v582_v52 = vadd.s32 1, %v578_v4  ;;  %v658_v43 = vshrl.u32 %v9839_v15, %v10250_v59  ;;  %v661_v48 = vshrl.u32 %v9840_v36, %v10250_v59 }
 0x10b   :  { %v326_v50 = vsel %vm324_vm2, %v312_v55, %v325_v40  ;;  %v664_v5 = vshrl.u32 %v9841_v39, %v10250_v59  ;;  %v660_v13 = vshll.u32 %v9839_v15, %v10164_v6  ;;  %v666_v7 = vshll.u32 %v9841_v39, %v10164_v6 }
 0x10c   :  { %v330_v38 = vsel %vm323_vm4, %v326_v50, %v329_v8  ;;  %v455_v3 = vsel %vm334_vm6, %v454_v9, %v453_v27  ;;  %v667_v57 = vshrl.u32 %v9842_v49, %v10250_v59  ;;  %v583_v2 = vsel %vm581_vm10, %v582_v52, %v578_v4 }
 0x10d   :  { %v331_v20 = vsel %vm321_vm5, nan, %v330_v38  ;;  %v458_v21 = vsel %vm10314_vm9, %v9935_v44, %v455_v3  ;;  %v663_v30 = vshll.u32 %v9840_v36, %v10164_v6  ;;  %v669_v53 = vshll.u32 %v9842_v49, %v10164_v6 }
 0x10e   :  { %v10326_v56 = vpack.c.bf16 %v331_v20, %v331_v20  ;;  %v460_v63 = vmul.f32 %v458_v21, %v458_v21  ;;  %v584_v55 = vadd.s32 %v583_v2, %v579_v11  ;;  %v668_v15 = vor.u32 %v667_v57, %v666_v7 }
 0x10f   :  { %v670_v39 = vshrl.u32 %v9843_v54, %v10250_v59  ;;  %v10356_v32 = vor.u32 %v658_v43, %v657_v51  ;;  %v10358_v18 = vor.u32 %v661_v48, %v660_v13  ;;  %v10360_v33 = vor.u32 %v664_v5, %v663_v30 }
 0x110   :  { %1584 = vmatmul.bf16.vlgmr.msra.gmra.mxu0 %v10326_v56  ;;  %vm675_vm11 = vcmp.lt.s32.totalorder %v10247_v12, 4  ;;  %v461_v34 = vmul.f32 -0.001358992, %v460_v63  ;;  %v468_v19 = vmul.f32 -0.00019511016, %v460_v63  ;;  %v585_v36 = vadd.s32 536870912, %v584_v55 }
 0x111   :  { %v671_v16 = vor.u32 %v670_v39, %v669_v53  ;;  %v459_v49 = vsel %vm10314_vm9, 0, %v457_v58  ;;  %v648_v6 = vor.u32 8388608, %v647_v60  ;;  %vm672_vm12 = vcmp.lt.s32.totalorder %v10247_v12, 1 }
 0x112   :  { %v681_v54 = vsel %vm675_vm11, %v668_v15, 920167782  ;;  %v462_v23 = vadd.f32 0.041655596, %v461_v34  ;;  %v469_v26 = vadd.f32 0.008332121, %v468_v19  ;;  %v680_v17 = vsel %vm672_vm12, %v10356_v32, %v10358_v18 }
 0x113   :  { %v10368_v31 = vshrl.u32 %v585_v36, 30  ;;  %vm674_vm13 = vcmp.lt.s32.totalorder %v10247_v12, 3  ;;  %v685_v35 = vsel %vm675_vm11, %v671_v16, 1326507024  ;;  %v684_v24 = vsel %vm672_vm12, %v10358_v18, %v10360_v33 }
 0x114   :  { %v682_v22 = vsel %vm674_vm13, %v10360_v33, %v681_v54  ;;  %v463_v61 = vmul.f32 %v462_v23, %v460_v63  ;;  %v470_v40 = vmul.f32 %v469_v26, %v460_v63  ;;  %v476_v47 = vand.u32 3, %v459_v49 }
 0x115   :  { %v587_v42 = vshll.u32 %v10368_v31, 30  ;;  %vm673_vm14 = vcmp.lt.s32.totalorder %v10247_v12, 2  ;;  %v686_v1 = vsel %vm674_vm13, %v668_v15, %v685_v35  ;;  %v10388_v37 = vshll.u32 %v648_v6, 8 }
 0x116   :  { %v464_v29 = vadd.f32 -0.4999988, %v463_v61  ;;  %v471_v50 = vadd.f32 -0.16666654, %v470_v40  ;;  %v683_v38 = vsel %vm673_vm14, %v680_v17, %v682_v22  ;;  %v687_v25 = vsel %vm673_vm14, %v684_v24, %v686_v1 }
 0x117   :  { %v588_v8 = vsub.s32 %v584_v55, %v587_v42  ;;  %vm475_vm0 = vweird.f32 %v9935_v44  ;;  %vm477_vm1 = vcmp.lt.s32.totalorder %v476_v47, 2  ;;  %v691_v58 = vand.u32 65535, %v687_v25 }
 0x118   :  { %v465_v27 = vmul.f32 %v464_v29, %v460_v63  ;;  %v472_v11 = vmul.f32 %v471_v50, %v460_v63  ;;  %v692_v4 = vshrl.u32 %v687_v25, 16  ;;  %v689_v52 = vand.u32 65535, %v10388_v37 }
 0x119   :  { %vm589_vm15 = vcmp.lt.s32.totalorder %v588_v8, 0  ;;  %v590_v20 = vsub.s32 0, %v588_v8  ;;  %vm478_vm2 = vcmp.eq.s32.totalorder %v476_v47, 0  ;;  %v690_v48 = vshrl.u32 %v10388_v37, 16 }
 0x11a   :  { %v466_v9 = vadd.f32 1.0, %v465_v27  ;;  %v473_v60 = vadd.f32 1.0, %v472_v11  ;;  %v714_v5 = vshrl.u32 %v683_v38, 16  ;;  %vm481_vm3 = vcmp.eq.s32.totalorder %v476_v47, 2 }
 0x11b   :  { %v591_v51 = vsel %vm589_vm15, %v590_v20, %v588_v8  ;;  %v694_v7 = vmul.u32 %v692_v4, %v689_v52  ;;  %v580_v57 = vadd.s32 %v10308_v62, %v10301_v41  ;;  %v695_v30 = vmul.u32 %v691_v58, %v690_v48 }
 0x11c   :  { %v592_v43 = vclz %v591_v51  ;;  %v474_v3 = vmul.f32 %v473_v60, %v458_v21  ;;  %v482_v13 = vxor.u32 2147483648, %v466_v9  ;;  %v713_v53 = vand.u32 65535, %v683_v38 }
 0x11d   :  { %v693_v55 = vmul.u32 %v691_v58, %v689_v52  ;;  %v696_v15 = vmul.u32 %v692_v4, %v690_v48  ;;  %v697_v39 = vshll.u32 %v694_v7, 16  ;;  %v699_v19 = vshll.u32 %v695_v30, 16 }
 0x11e   :  { %v6228_v2 = vadd.s32 4294967294, %v592_v43  ;;  %v479_v63 = vxor.u32 2147483648, %v474_v3  ;;  %v483_v34 = vsel %vm481_vm3, %v482_v13, %v474_v3  ;;  %v716_v36 = vmul.u32 %v714_v5, %v689_v52 }
 0x11f   :  { %vm701_vm5 = vc.u32 %v693_v55, %v697_v39  ;;  %v703_v49 = vadd.s32 %v697_v39, %v693_v55  ;;  %v717_v17 = vmul.u32 %v713_v53, %v690_v48  ;;  %v715_v24 = vmul.u32 %v713_v53, %v689_v52 }
 0x120   :  { %1636 = vmatmul.bf16.vlgmr.msrb.gmra.mxu0 %v10326_v56  ;;  %vm6229_vm4 = vcmp.lt.s32.totalorder %v6228_v2, 0  ;;  %v480_v21 = vsel %vm478_vm2, %v466_v9, %v479_v63  ;;  %v702_v26 = vsel %vm701_vm5, 1, %v9835_v0  ;;  %v719_v47 = vshll.u32 %v716_v36, 16 }
 0x121   :  { %v595_v16 = vsel %vm6229_vm4, 0, %v6228_v2  ;;  %v484_v6 = vsel %vm477_vm1, %v480_v21, %v483_v34  ;;  %vm705_vm6 = vc.u32 %v703_v49, %v699_v19  ;;  %v704_v40 = vadd.s32 %v702_v26, %v696_v15 }
 0x122   :  { %v596_v54 = vsub.s32 32, %v595_v16  ;;  %v597_v41 = vshll.u32 %v588_v8, %v595_v16  ;;  %v600_v62 = vsub.s32 4294967266, %v595_v16  ;;  %v485_v23 = vsel %vm475_vm0, nan, %v484_v6 }
 0x123   :  { %v10405_v22 = vpack.c.bf16 %v485_v23, %v485_v23  ;;  %v706_v42 = vsel %vm705_vm6, 1, %v9835_v0  ;;  %v698_v50 = vshrl.u32 %v694_v7, 16  ;;  %v718_v8 = vmul.u32 %v714_v5, %v690_v48 }
 0x124   :  { %v598_v35 = vshrl.u32 %v580_v57, %v596_v54  ;;  %v601_v61 = vadd.s32 127, %v600_v62  ;;  %v708_v44 = vadd.s32 %v706_v42, %v704_v40  ;;  %v721_v38 = vshll.u32 %v717_v17, 16 }
 0x125   :  { %1597 = vmatmul.bf16.vlgmr.msra.gmra.mxu1 %v10405_v22  ;;  %vm723_vm7 = vc.u32 %v715_v24, %v719_v47  ;;  %v725_v25 = vadd.s32 %v719_v47, %v715_v24  ;;  %v656_v58 = vshrl.u32 %v9838_v14, %v10250_v59  ;;  %v677_v4 = vsel %vm675_vm11, %v10360_v33, 2102212464 }
 0x126   :  { %v599_v1 = vor.u32 %v598_v35, %v597_v41  ;;  %v602_v29 = vshll.u32 %v601_v61, 23  ;;  %v709_v11 = vadd.s32 %v708_v44, %v698_v50  ;;  %v724_v20 = vsel %vm723_vm7, 1, %v9835_v0 }
 0x127   :  { %v726_v9 = vadd.s32 %v724_v20, %v718_v8  ;;  %vm727_vm8 = vc.u32 %v725_v25, %v721_v38  ;;  %v700_v52 = vshrl.u32 %v695_v30, 16  ;;  %v720_v48 = vshrl.u32 %v716_v36, 16 }
 0x128   :  { %v603_v27 = vor.u32 4788187, %v602_v29  ;;  %v606_v51 = vcvt.s32.f32 %v599_v1  ;;  %v728_v43 = vsel %vm727_vm8, 1, %v9835_v0  ;;  %v676_v13 = vsel %vm672_vm12, %v656_v58, %v10356_v32 }
 0x129   :  { %v730_v5 = vadd.s32 %v728_v43, %v726_v9  ;;  %v678_v14 = vsel %vm674_vm13, %v10358_v18, %v677_v4  ;;  %v710_v59 = vadd.s32 %v709_v11, %v700_v52  ;;  %v722_v33 = vshrl.u32 %v717_v17, 16 }
 0x12a   :  { %v604_v60 = vand.u32 2147483647, %v603_v27  ;;  %v729_v2 = vadd.s32 %v725_v25, %v721_v38  ;;  %vm488_vm9 = vcmp.lt.s32.totalorder %v9937_v45, 0  ;;  %v679_v0 = vsel %vm673_vm14, %v676_v13, %v678_v14  ;;  %v6355_v13 = vld [vmem:[#allocation4 + $0xe8] sm:$0xf] }
 0x12b   :  { %v731_v7 = vadd.s32 %v730_v5, %v720_v48  ;;  %vm10427_vm10 = vcmp.le.f32.partialorder %v486_v28, 0.7853982  ;;  %v733_v12 = vmul.u32 %v10388_v37, %v679_v0  ;;  %v610_v28 = vsub.s32 4, %v10368_v31  ;;  %v8952_v14 = vld [vmem:[#allocation4 + $0xf4] sm:$0xf0] }
 0x12c   :  { %v607_v3 = vmul.f32 %v606_v51, %v604_v60  ;;  %vm735_vm11 = vc.u32 %v710_v59, %v729_v2  ;;  %vm629_vm0 = vweird.f32 %v9937_v45  ;;  %v734_v4 = vadd.s32 %v729_v2, %v710_v59  ;;  %v8984_v0 = vld [vmem:[#allocation4 + $0x1f4] sm:$0xf0] }
 0x12d   :  { %v732_v30 = vadd.s32 %v731_v7, %v722_v33  ;;  %v611_v41 = vsel %vm488_vm9, %v610_v28, %v10368_v31  ;;  %vm642_vm2 = vcmp.lt.s32.totalorder %v9939_v46, 0  ;;  %v9016_v2 = vld [vmem:[#allocation4 + $0x2f4] sm:$0xf0]  ;;  %vm10454_vm3 = vcmp.le.f32.partialorder %v640_v10, 0.7853982 }
 0x12e   :  { %v608_v57 = vxor.u32 2147483648, %v607_v3  ;;  %v613_v26 = vsel %vm10427_vm10, 0, %v611_v41  ;;  %vm783_vm7 = vweird.f32 %v9939_v46  ;;  %vm6188_vm8 = vcmask 785920  }
 0x12f   :  { %v736_v63 = vadd.s32 1, %v732_v30  ;;  %v630_v47 = vand.u32 3, %v613_v26  ;;  %v9008_v26 = vld [vmem:[#allocation4 + $0x2b4] sm:$0xf0] }
 0x130   :  { %v609_v32 = vsel %vm488_vm9, %v608_v57, %v607_v3  ;;  %v6356_v57 = vor.u32 %v8952_v14, %v6355_v13  ;;  %v6547_v14 = vld [vmem:[#allocation4 + $0x268] sm:$0xf]  ;;  %vm6199_vm9 = vcmask 261120  }
 0x131   :  { %v612_v18 = vsel %vm10427_vm10, %v9937_v45, %v609_v32  ;;  %v737_v15 = vsel %vm735_vm11, %v736_v63, %v732_v30  ;;  %vm632_vm13 = vcmp.eq.s32.totalorder %v630_v47, 0  ;;  %vm635_vm14 = vcmp.eq.s32.totalorder %v630_v47, 2  ;;  %v6483_v45 = vld [vmem:[#allocation4 + $0x1e8] sm:$0xf]  ;;  %v8948_v63 = vld [vmem:[#allocation4 + $0xd4] sm:$0xf0] }
 0x132   :  { %v614_v55 = vmul.f32 %v612_v18, %v612_v18  ;;  %v738_v19 = vadd.s32 %v737_v15, %v733_v12  ;;  %vm631_vm15 = vcmp.lt.s32.totalorder %v630_v47, 2  ;;  %v6611_v30 = vld [vmem:[#allocation4 + $0x2e8] sm:$0xf]  ;;  %v6484_v59 = vor.u32 %v8984_v0, %v6483_v45  ;;  %1680 = vmatpush.bf16.msra.mxu0 %v6356_v57  ;;  %v8980_v15 = vld [vmem:[#allocation4 + $0x1d4] sm:$0xf0] }
 0x133   :  { %v6612_v32 = vor.u32 %v9016_v2, %v6611_v30  ;;  %v6435_v47 = vld [vmem:[#allocation4 + $0x188] sm:$0xf]  ;;  %v9000_v45 = vld [vmem:[#allocation4 + $0x274] sm:$0xf0] }
 0x134   :  { %v615_v39 = vmul.f32 -0.001358992, %v614_v55  ;;  %v622_v34 = vmul.f32 -0.00019511016, %v614_v55  ;;  %v739_v16 = vadd.s32 536870912, %v738_v19  ;;  %1693 = vmatpush.bf16.msra.mxu1 %v6484_v59  ;;  %v6548_v0 = vor.u32 %v9000_v45, %v6547_v14 }
 0x135   :  { %1649 = vmatmul.bf16.vlgmr.msrb.gmra.mxu1 %v10405_v22  ;;  %v6275_v30 = vld [vmem:[#allocation4 + $0x48] sm:$0xf]  ;;  %v8932_v59 = vld [vmem:[#allocation4 + $0x54] sm:$0xf0]  ;;  %v6469_v14 = vld [vmem:[#allocation4 + $0x1d8] sm:$0xf0] }
 0x136   :  { %v616_v36 = vadd.f32 0.041655596, %v615_v39  ;;  %v623_v21 = vadd.f32 0.008332121, %v622_v34  ;;  %v10439_v54 = vshrl.u32 %v739_v16, 30  ;;  %v6276_v2 = vor.u32 %v8932_v59, %v6275_v30 }
 0x137   :  { %v6595_v39 = vld [vmem:[#allocation4 + $0x2c8] sm:$0xf]  ;;  %v9012_v34 = vld [vmem:[#allocation4 + $0x2d4] sm:$0xf0]  ;;  %v9010_v45 = vld [vmem:[#allocation4 + $0x2cc] sm:$0xf] }
 0x138   :  { %v617_v49 = vmul.f32 %v616_v36, %v614_v55  ;;  %v624_v6 = vmul.f32 %v623_v21, %v614_v55  ;;  %v741_v23 = vshll.u32 %v10439_v54, 30  ;;  %v6596_v21 = vor.u32 %v9012_v34, %v6595_v39  ;;  %v6323_v16 = vld [vmem:[#allocation4 + $0xa8] sm:$0xf]  ;;  %v8942_v59 = vld [vmem:[#allocation4 + $0xac] sm:$0xf] }
 0x139   :  { %v764_v10 = vsub.s32 4, %v10439_v54  ;;  %v6259_v34 = vld [vmem:[#allocation4 + $0x28] sm:$0xf] }
 0x13a   :  { %v618_v37 = vadd.f32 -0.4999988, %v617_v49  ;;  %v625_v62 = vadd.f32 -0.16666654, %v624_v6  ;;  %v742_v61 = vsub.s32 %v738_v19, %v741_v23  ;;  %v8944_v49 = vld [vmem:[#allocation4 + $0xb4] sm:$0xf0] }
 0x13b   :  { %v6451_v6 = vld [vmem:[#allocation4 + $0x1a8] sm:$0xf]  ;;  %v8928_v19 = vld [vmem:[#allocation4 + $0x34] sm:$0xf0] }
 0x13c   :  { %v619_v17 = vmul.f32 %v618_v37, %v614_v55  ;;  %v626_v35 = vmul.f32 %v625_v62, %v614_v55  ;;  %vm743_vm12 = vcmp.lt.s32.totalorder %v742_v61, 0  ;;  %v744_v24 = vsub.s32 0, %v742_v61  ;;  %v6467_v55 = vld [vmem:[#allocation4 + $0x1c8] sm:$0xf]  ;;  %v8976_v62 = vld [vmem:[#allocation4 + $0x1b4] sm:$0xf0] }
 0x13d   :  { %v6468_v36 = vor.u32 %v8980_v15, %v6467_v55  ;;  %v6324_v37 = vor.u32 %v8944_v49, %v6323_v16  ;;  %v6579_v23 = vld [vmem:[#allocation4 + $0x2a8] sm:$0xf]  ;;  %v8996_v15 = vld [vmem:[#allocation4 + $0x254] sm:$0xf0] }
 0x13e   :  { %v620_v40 = vadd.f32 1.0, %v619_v17  ;;  %v627_v42 = vadd.f32 1.0, %v626_v35  ;;  %v745_v50 = vsel %vm743_vm12, %v744_v24, %v742_v61  ;;  %v6452_v35 = vor.u32 %v8976_v62, %v6451_v6  ;;  %v8940_v24 = vld [vmem:[#allocation4 + $0x94] sm:$0xf0]  ;;  %v6387_v16 = vld [vmem:[#allocation4 + $0x128] sm:$0xf] }
 0x13f   :  { %v746_v44 = vclz %v745_v50  ;;  %1694 = vmatpush.bf16.msra.mxu1 %v6468_v36  ;;  %v9004_v50 = vld [vmem:[#allocation4 + $0x294] sm:$0xf0]  ;;  %v6739_v6 = vld [vmem:[#allocation4 + $0x3e8] sm:$0xf] }
 0x140   :  { %v628_v1 = vmul.f32 %v627_v42, %v612_v18  ;;  %v636_v29 = vxor.u32 2147483648, %v620_v40  ;;  %v6339_v18 = vld [vmem:[#allocation4 + $0xc8] sm:$0xf]  ;;  %v8960_v49 = vld [vmem:[#allocation4 + $0x134] sm:$0xf0] }
 0x141   :  { %v6231_v8 = vadd.s32 4294967294, %v746_v44  ;;  %v6340_v12 = vor.u32 %v8948_v63, %v6339_v18  ;;  %v6307_v42 = vld [vmem:[#allocation4 + $0x88] sm:$0xf]  ;;  %v8992_v62 = vld [vmem:[#allocation4 + $0x234] sm:$0xf0] }
 0x142   :  { %v633_v31 = vxor.u32 2147483648, %v628_v1  ;;  %v637_v25 = vsel %vm635_vm14, %v636_v29, %v628_v1  ;;  %v8972_v1 = vld [vmem:[#allocation4 + $0x194] sm:$0xf0]  ;;  %v6563_v29 = vld [vmem:[#allocation4 + $0x288] sm:$0xf] }
 0x143   :  { %vm6232_vm1 = vcmp.lt.s32.totalorder %v6231_v8, 0  ;;  %1681 = vmatpush.bf16.msra.mxu0 %v6340_v12  ;;  %1695 = vmatpush.bf16.msra.mxu1 %v6452_v35  ;;  %v6531_v18 = vld [vmem:[#allocation4 + $0x248] sm:$0xf] }
 0x144   :  { %v634_v38 = vsel %vm632_vm13, %v620_v40, %v633_v31  ;;  %v749_v20 = vsel %vm6232_vm1, 0, %v6231_v8  ;;  %v6580_v40 = vor.u32 %v9008_v26, %v6579_v23  ;;  %v6308_v8 = vor.u32 %v8940_v24, %v6307_v42  ;;  %v9048_v26 = vld [vmem:[#allocation4 + $0x3f4] sm:$0xf0]  ;;  %v6243_v35 = vld [vmem:[#allocation4 + $0x8] sm:$0xf] }
 0x145   :  { %v638_v27 = vsel %vm631_vm15, %v634_v38, %v637_v25  ;;  %v750_v9 = vsub.s32 32, %v749_v20  ;;  %v754_v60 = vsub.s32 4294967266, %v749_v20  ;;  %v751_v51 = vshll.u32 %v742_v61, %v749_v20 }
 0x146   :  { %v639_v11 = vsel %vm629_vm0, nan, %v638_v27  ;;  %v765_v38 = vsel %vm642_vm2, %v764_v10, %v10439_v54  ;;  %v6436_v25 = vor.u32 %v8972_v1, %v6435_v47  ;;  %v6564_v20 = vor.u32 %v9004_v50, %v6563_v29  ;;  %v6499_v1 = vld [vmem:[#allocation4 + $0x208] sm:$0xf]  ;;  %v8988_v29 = vld [vmem:[#allocation4 + $0x214] sm:$0xf0] }
 0x147   :  { %v10448_v58 = vpack.c.bf16 %v639_v11, %v639_v11  ;;  %v752_v52 = vshrl.u32 %v734_v4, %v750_v9  ;;  %v755_v43 = vadd.s32 127, %v754_v60  ;;  %1682 = vmatpush.bf16.msra.mxu0 %v6324_v37  ;;  %v767_v4 = vsel %vm10454_vm3, 0, %v765_v38  ;;  %v6515_v37 = vld [vmem:[#allocation4 + $0x228] sm:$0xf] }
 0x148   :  { %1696 = vmatpush.bf16.msra.mxu1 %v6436_v25  ;;  %v784_v57 = vand.u32 3, %v767_v4  ;;  %v6532_v39 = vor.u32 %v8996_v15, %v6531_v18  ;;  %v6516_v10 = vor.u32 %v8992_v62, %v6515_v37  ;;  %v6740_v25 = vor.u32 %v9048_v26, %v6739_v6  ;;  %v6453_v18 = vld [vmem:[#allocation4 + $0x1b8] sm:$0xf0]  ;;  %v6691_v15 = vld [vmem:[#allocation4 + $0x388] sm:$0xf] }
 0x149   :  { %1610 = vmatmul.bf16.vlgmr.msra.gmra.mxu2 %v10448_v58  ;;  %v753_v48 = vor.u32 %v752_v52, %v751_v51  ;;  %v756_v5 = vshll.u32 %v755_v43, 23  ;;  %v6291_v51 = vld [vmem:[#allocation4 + $0x68] sm:$0xf]  ;;  %v8936_v52 = vld [vmem:[#allocation4 + $0x74] sm:$0xf0] }
 0x14a   :  { %1706 = vmatpush.bf16.msra.mxu2 %v6612_v32  ;;  %v6419_v43 = vld [vmem:[#allocation4 + $0x168] sm:$0xf]  ;;  %v6292_v54 = vor.u32 %v8936_v52, %v6291_v51  ;;  %v8964_v32 = vld [vmem:[#allocation4 + $0x154] sm:$0xf0]  ;;  %vm786_vm4 = vcmp.eq.s32.totalorder %v784_v57, 0  ;;  %vm789_vm5 = vcmp.eq.s32.totalorder %v784_v57, 2 }
 0x14b   :  { %v757_v3 = vor.u32 4788187, %v756_v5  ;;  %v760_v7 = vcvt.s32.f32 %v753_v48  ;;  %1683 = vmatpush.bf16.msra.mxu0 %v6308_v8  ;;  %vm785_vm6 = vcmp.lt.s32.totalorder %v784_v57, 2  ;;  %v6485_v51 = vld [vmem:[#allocation4 + $0x1f8] sm:$0xf0] }
 0x14c   :  { %v9014_v52 = vld [vmem:[#allocation4 + $0x2ec] sm:$0xf]  ;;  %v9040_v57 = vld [vmem:[#allocation4 + $0x3b4] sm:$0xf0]  ;;  %v6675_v62 = vld [vmem:[#allocation4 + $0x368] sm:$0xf] }
 0x14d   :  { %v758_v33 = vand.u32 2147483647, %v757_v3  ;;  %v8968_v3 = vld [vmem:[#allocation4 + $0x174] sm:$0xf0]  ;;  %v9002_v6 = vld [vmem:[#allocation4 + $0x28c] sm:$0xf] }
 0x14e   :  { %1707 = vmatpush.bf16.msra.mxu2 %v6596_v21  ;;  %v6420_v13 = vor.u32 %v8968_v3, %v6419_v43  ;;  %v6260_v21 = vor.u32 %v8928_v19, %v6259_v34  ;;  %v8978_v3 = vld [vmem:[#allocation4 + $0x1cc] sm:$0xf] }
 0x14f   :  { %v761_v53 = vmul.f32 %v760_v7, %v758_v33  ;;  %1684 = vmatpush.bf16.msra.mxu0 %v6292_v54  ;;  %v6341_v54 = vld [vmem:[#allocation4 + $0xd8] sm:$0xf0]  ;;  %v6472_v30 = vor.u32 %v8978_v3, %v6469_v14  ;;  %v8958_v3 = vld [vmem:[#allocation4 + $0x12c] sm:$0xf] }
 0x150   :  { %1697 = vmatpush.bf16.msra.mxu1 %v6420_v13  ;;  %v8990_v14 = vld [vmem:[#allocation4 + $0x22c] sm:$0xf] }
 0x151   :  { %v762_v28 = vxor.u32 2147483648, %v761_v53 }
 0x152   :  { %1708 = vmatpush.bf16.msra.mxu2 %v6580_v40  ;;  %v6371_v40 = vld [vmem:[#allocation4 + $0x108] sm:$0xf] }
 0x153   :  { %v763_v41 = vsel %vm642_vm2, %v762_v28, %v761_v53  ;;  %v6403_v53 = vld [vmem:[#allocation4 + $0x148] sm:$0xf]  ;;  %1685 = vmatpush.bf16.msra.mxu0 %v6276_v2 }
 0x154   :  { %v766_v17 = vsel %vm10454_vm3, %v9939_v46, %v763_v41  ;;  %v6404_v12 = vor.u32 %v8964_v32, %v6403_v53  ;;  %v6388_v41 = vor.u32 %v8960_v49, %v6387_v16  ;;  %v6613_v46 = vld [vmem:[#allocation4 + $0x2f8] sm:$0xf0]  ;;  %v8974_v32 = vld [vmem:[#allocation4 + $0x1ac] sm:$0xf] }
 0x155   :  { %v768_v61 = vmul.f32 %v766_v17, %v766_v17  ;;  %v6325_v53 = vld [vmem:[#allocation4 + $0xb8] sm:$0xf0]  ;;  %v6456_v19 = vor.u32 %v8974_v32, %v6453_v18  ;;  %v8970_v16 = vld [vmem:[#allocation4 + $0x18c] sm:$0xf] }
 0x156   :  { %1709 = vmatpush.bf16.msra.mxu2 %v6564_v20  ;;  %1698 = vmatpush.bf16.msra.mxu1 %v6404_v12  ;;  %v6357_v20 = vld [vmem:[#allocation4 + $0xf8] sm:$0xf0]  ;;  %v6328_v34 = vor.u32 %v8942_v59, %v6325_v53  ;;  %v8922_v32 = vld [vmem:[#allocation4 + $0xc] sm:$0xf] }
 0x157   :  { %v769_v44 = vmul.f32 -0.001358992, %v768_v61  ;;  %v776_v31 = vmul.f32 -0.00019511016, %v768_v61  ;;  %1686 = vmatpush.bf16.msra.mxu0 %v6260_v21  ;;  %v6309_v21 = vld [vmem:[#allocation4 + $0x98] sm:$0xf0] }
 0x158   :  { %v6437_v49 = vld [vmem:[#allocation4 + $0x198] sm:$0xf0] }
 0x159   :  { %1662 = vmatmul.bf16.vlgmr.msrb.gmra.mxu2 %v10448_v58  ;;  %v770_v27 = vadd.f32 0.041655596, %v769_v44  ;;  %v777_v11 = vadd.f32 0.008332121, %v776_v31  ;;  %v6723_v44 = vld [vmem:[#allocation4 + $0x3c8] sm:$0xf] }
 0x15a   :  { %1710 = vmatpush.bf16.msra.mxu2 %v6548_v0  ;;  %v9044_v31 = vld [vmem:[#allocation4 + $0x3d4] sm:$0xf0]  ;;  %1699 = vmatpush.bf16.msra.mxu1 %v6388_v41  ;;  %v6565_v41 = vld [vmem:[#allocation4 + $0x298] sm:$0xf0] }
 0x15b   :  { %v771_v9 = vmul.f32 %v770_v27, %v768_v61  ;;  %v778_v60 = vmul.f32 %v777_v11, %v768_v61  ;;  %v6500_v27 = vor.u32 %v8988_v29, %v6499_v1  ;;  %v8950_v11 = vld [vmem:[#allocation4 + $0xec] sm:$0xf]  ;;  %v6724_v13 = vor.u32 %v9044_v31, %v6723_v44  ;;  %v6659_v29 = vld [vmem:[#allocation4 + $0x348] sm:$0xf]  ;;  %v6245_v18 = vld [vmem:[#allocation4 + $0x18] sm:$0xf0] }
 0x15d   :  { %v772_v48 = vadd.f32 -0.4999988, %v771_v9  ;;  %v779_v5 = vadd.f32 -0.16666654, %v778_v60  ;;  %v6360_v9 = vor.u32 %v8950_v11, %v6357_v20  ;;  %v8982_v60 = vld [vmem:[#allocation4 + $0x1ec] sm:$0xf] }
 0x15e   :  { %1711 = vmatpush.bf16.msra.mxu2 %v6532_v39  ;;  %v6488_v43 = vor.u32 %v8982_v60, %v6485_v51  ;;  %v9036_v39 = vld [vmem:[#allocation4 + $0x394] sm:$0xf0]  ;;  %v6405_v11 = vld [vmem:[#allocation4 + $0x158] sm:$0xf0]  ;;  %v8994_v20 = vld [vmem:[#allocation4 + $0x24c] sm:$0xf] }
 0x15f   :  { %v773_v33 = vmul.f32 %v772_v48, %v768_v61  ;;  %v780_v7 = vmul.f32 %v779_v5, %v768_v61  ;;  %v8924_v61 = vld [vmem:[#allocation4 + $0x14] sm:$0xf0]  ;;  %v6616_v48 = vor.u32 %v9014_v52, %v6613_v46  ;;  %v8946_v5 = vld [vmem:[#allocation4 + $0xcc] sm:$0xf]  ;;  %v6692_v37 = vor.u32 %v9036_v39, %v6691_v15  ;;  %v6643_v51 = vld [vmem:[#allocation4 + $0x328] sm:$0xf] }
 0x160   :  { %v6244_v47 = vor.u32 %v8924_v61, %v6243_v35  ;;  %v6344_v0 = vor.u32 %v8946_v5, %v6341_v54  ;;  %v8934_v35 = vld [vmem:[#allocation4 + $0x6c] sm:$0xf]  ;;  %v6568_v61 = vor.u32 %v9002_v6, %v6565_v41  ;;  %v9024_v52 = vld [vmem:[#allocation4 + $0x334] sm:$0xf0]  ;;  %v6261_v54 = vld [vmem:[#allocation4 + $0x38] sm:$0xf0] }
 0x161   :  { %v774_v63 = vadd.f32 1.0, %v773_v33  ;;  %v781_v55 = vadd.f32 1.0, %v780_v7  ;;  %v6597_v33 = vld [vmem:[#allocation4 + $0x2d8] sm:$0xf0]  ;;  %v6707_v7 = vld [vmem:[#allocation4 + $0x3a8] sm:$0xf] }
 0x162   :  { %1712 = vmatpush.bf16.msra.mxu2 %v6516_v10  ;;  %1687 = vmatpush.bf16.msra.mxu0 %v6244_v47  ;;  %v6600_v2 = vor.u32 %v9010_v45, %v6597_v33  ;;  %v6708_v12 = vor.u32 %v9040_v57, %v6707_v7  ;;  %v6440_v10 = vor.u32 %v8970_v16, %v6437_v49  ;;  %v6549_v47 = vld [vmem:[#allocation4 + $0x278] sm:$0xf0]  ;;  %v6627_v7 = vld [vmem:[#allocation4 + $0x308] sm:$0xf]  ;;  %v9020_v57 = vld [vmem:[#allocation4 + $0x314] sm:$0xf0] }
 0x163   :  { %v782_v28 = vmul.f32 %v781_v55, %v766_v17  ;;  %v790_v36 = vxor.u32 2147483648, %v774_v63  ;;  %v8956_v17 = vld [vmem:[#allocation4 + $0x114] sm:$0xf0]  ;;  %v6581_v55 = vld [vmem:[#allocation4 + $0x2b8] sm:$0xf0]  ;;  %v6644_v33 = vor.u32 %v9024_v52, %v6643_v51  ;;  %v6628_v39 = vor.u32 %v9020_v57, %v6627_v7 }
 0x164   :  { %v6372_v8 = vor.u32 %v8956_v17, %v6371_v40  ;;  %v6293_v40 = vld [vmem:[#allocation4 + $0x78] sm:$0xf0]  ;;  %v8966_v17 = vld [vmem:[#allocation4 + $0x16c] sm:$0xf]  ;;  %v6859_v49 = vld [vmem:[#allocation4 + $0x4e0] sm:$0xf] }
 0x165   :  { %v787_v23 = vxor.u32 2147483648, %v782_v28  ;;  %v791_v24 = vsel %vm789_vm5, %v790_v36, %v782_v28  ;;  %1688 = vmatmul.bf16.vlgmr.msra.gmra.mxu0 %v10326_v56  ;;  %v8938_v28 = vld [vmem:[#allocation4 + $0x8c] sm:$0xf]  ;;  %v6296_v44 = vor.u32 %v8934_v35, %v6293_v40  ;;  %v6517_v45 = vld [vmem:[#allocation4 + $0x238] sm:$0xf0] }
 0x166   :  { %1700 = vmatpush.bf16.msra.mxu1 %v6372_v8  ;;  %1713 = vmatpush.bf16.msra.mxu2 %v6500_v27  ;;  %v6312_v26 = vor.u32 %v8938_v28, %v6309_v21  ;;  %v8930_v8 = vld [vmem:[#allocation4 + $0x4c] sm:$0xf]  ;;  %v6520_v53 = vor.u32 %v8990_v14, %v6517_v45  ;;  %v6501_v15 = vld [vmem:[#allocation4 + $0x218] sm:$0xf0]  ;;  %v9079_v6 = vld [vmem:[#allocation4 + $0x4ec] sm:$0xf0] }
 0x167   :  { %v788_v42 = vsel %vm786_vm4, %v774_v63, %v787_v23  ;;  %1732 = vmatpush.bf16.msrb.mxu0 %v6360_v9  ;;  %v9006_v63 = vld [vmem:[#allocation4 + $0x2ac] sm:$0xf]  ;;  %v9032_v23 = vld [vmem:[#allocation4 + $0x374] sm:$0xf0]  ;;  %v6533_v9 = vld [vmem:[#allocation4 + $0x258] sm:$0xf0] }
 0x168   :  { %v792_v50 = vsel %vm785_vm6, %v788_v42, %v791_v24  ;;  %v6584_v36 = vor.u32 %v9006_v63, %v6581_v55  ;;  %v6421_v42 = vld [vmem:[#allocation4 + $0x178] sm:$0xf0]  ;;  %v8998_v24 = vld [vmem:[#allocation4 + $0x26c] sm:$0xf]  ;;  %v6676_v1 = vor.u32 %v9032_v23, %v6675_v62  ;;  %v6536_v5 = vor.u32 %v8994_v20, %v6533_v9  ;;  %v6843_v41 = vld [vmem:[#allocation4 + $0x4c0] sm:$0xf] }
 0x169   :  { %v793_v38 = vsel %vm783_vm7, nan, %v792_v50  ;;  %1701 = vmatmul.bf16.vlgmr.msra.gmra.mxu1 %v10405_v22  ;;  %1714 = vmatmul.bf16.vlgmr.msra.gmra.mxu2 %v10448_v58  ;;  %v9028_v50 = vld [vmem:[#allocation4 + $0x354] sm:$0xf0]  ;;  %v6424_v31 = vor.u32 %v8966_v17, %v6421_v42  ;;  %v8962_v27 = vld [vmem:[#allocation4 + $0x14c] sm:$0xf]  ;;  %v6860_v23 = vor.u32 %v9079_v6, %v6859_v49 }
 0x16a   :  { %v10472_v4 = vpack.c.bf16 %v793_v38, %v793_v38  ;;  %1745 = vmatpush.bf16.msrb.mxu1 %v6488_v43  ;;  %1758 = vmatpush.bf16.msrb.mxu2 %v6616_v48  ;;  %v6552_v38 = vor.u32 %v8998_v24, %v6549_v47  ;;  %v6660_v60 = vor.u32 %v9028_v50, %v6659_v29  ;;  %v8926_v48 = vld [vmem:[#allocation4 + $0x2c] sm:$0xf]  ;;  %v6373_v55 = vld [vmem:[#allocation4 + $0x118] sm:$0xf0]  ;;  %v6987_v40 = vld [vmem:[#allocation4 + $0x5e0] sm:$0xf] }
 0x16b   :  { %1733 = vmatpush.bf16.msrb.mxu0 %v6344_v0  ;;  %v6408_v46 = vor.u32 %v8962_v27, %v6405_v11  ;;  %v9046_v0 = vld [vmem:[#allocation4 + $0x3ec] sm:$0xf]  ;;  %v6264_v59 = vor.u32 %v8926_v48, %v6261_v54  ;;  %v6709_v35 = vld [vmem:[#allocation4 + $0x3b8] sm:$0xf0]  ;;  %v9111_v17 = vld [vmem:[#allocation4 + $0x5ec] sm:$0xf0] }
 0x16c   :  { %1623 = vmatmul.bf16.vlgmr.msra.gmra.mxu3 %v10472_v4  ;;  %v8954_v63 = vld [vmem:[#allocation4 + $0x10c] sm:$0xf]  ;;  %v6827_v42 = vld [vmem:[#allocation4 + $0x4a0] sm:$0xf]  ;;  %v9071_v24 = vld [vmem:[#allocation4 + $0x4ac] sm:$0xf0]  ;;  %v6988_v47 = vor.u32 %v9111_v17, %v6987_v40 }
 0x16d   :  { %1719 = vmatpush.bf16.msra.mxu3 %v6740_v25  ;;  %v6277_v25 = vld [vmem:[#allocation4 + $0x58] sm:$0xf0]  ;;  %v9042_v28 = vld [vmem:[#allocation4 + $0x3cc] sm:$0xf]  ;;  %v6376_v21 = vor.u32 %v8954_v63, %v6373_v55  ;;  %v9107_v50 = vld [vmem:[#allocation4 + $0x5cc] sm:$0xf0] }
 0x16e   :  { %1746 = vmatpush.bf16.msrb.mxu1 %v6472_v30  ;;  %1759 = vmatpush.bf16.msrb.mxu2 %v6600_v2  ;;  %v6280_v43 = vor.u32 %v8930_v8, %v6277_v25  ;;  %v6741_v30 = vld [vmem:[#allocation4 + $0x3f8] sm:$0xf0]  ;;  %v6955_v25 = vld [vmem:[#allocation4 + $0x5a0] sm:$0xf]  ;;  %v9103_v27 = vld [vmem:[#allocation4 + $0x5ac] sm:$0xf0] }
 0x16f   :  { %1734 = vmatpush.bf16.msrb.mxu0 %v6328_v34  ;;  %v6744_v34 = vor.u32 %v9046_v0, %v6741_v30  ;;  %v9067_v11 = vld [vmem:[#allocation4 + $0x48c] sm:$0xf0]  ;;  %v6677_v51 = vld [vmem:[#allocation4 + $0x378] sm:$0xf0]  ;;  %v9026_v54 = vld [vmem:[#allocation4 + $0x34c] sm:$0xf] }
 0x170   :  { %v9063_v48 = vld [vmem:[#allocation4 + $0x46c] sm:$0xf0]  ;;  %v9022_v30 = vld [vmem:[#allocation4 + $0x32c] sm:$0xf]  ;;  %v9073_v40 = vld [vmem:[#allocation4 + $0x4c4] sm:$0xf] }
 0x171   :  { %1720 = vmatpush.bf16.msra.mxu3 %v6724_v13  ;;  %v6389_v13 = vld [vmem:[#allocation4 + $0x138] sm:$0xf0]  ;;  %v9059_v7 = vld [vmem:[#allocation4 + $0x44c] sm:$0xf0]  ;;  %v9018_v55 = vld [vmem:[#allocation4 + $0x30c] sm:$0xf] }
 0x172   :  { %1747 = vmatpush.bf16.msrb.mxu1 %v6456_v19  ;;  %1760 = vmatpush.bf16.msrb.mxu2 %v6584_v36  ;;  %v6392_v2 = vor.u32 %v8958_v3, %v6389_v13  ;;  %v6248_v19 = vor.u32 %v8922_v32, %v6245_v18  ;;  %v6725_v36 = vld [vmem:[#allocation4 + $0x3d8] sm:$0xf0]  ;;  %v10485_v13 = vld [vmem:[#allocation6] sm:$0xf]  ;;  %v9055_v32 = vld [vmem:[#allocation4 + $0x42c] sm:$0xf0] }
 0x173   :  { %1735 = vmatpush.bf16.msrb.mxu0 %v6312_v26  ;;  %v6728_v62 = vor.u32 %v9042_v28, %v6725_v36  ;;  %v9075_v26 = vld [vmem:[#allocation4 + $0x4cc] sm:$0xf0]  ;;  %v6661_v3 = vld [vmem:[#allocation4 + $0x358] sm:$0xf0]  ;;  %v928_v0 = vperm.slane %v10485_v13, 0 }
 0x174   :  { %v6664_v57 = vor.u32 %v9026_v54, %v6661_v3  ;;  %v6845_v17 = vld [vmem:[#allocation4 + $0x4d0] sm:$0xf0]  ;;  %v9131_v54 = vld [vmem:[#allocation4 + $0x68c] sm:$0xf0]  ;;  %v9061_v3 = vld [vmem:[#allocation4 + $0x464] sm:$0xf] }
 0x175   :  { %1721 = vmatpush.bf16.msra.mxu3 %v6708_v12  ;;  %v8986_v12 = vld [vmem:[#allocation4 + $0x20c] sm:$0xf] }
 0x176   :  { %1748 = vmatpush.bf16.msrb.mxu1 %v6440_v10  ;;  %1761 = vmatpush.bf16.msrb.mxu2 %v6568_v61  ;;  %v6504_v16 = vor.u32 %v8986_v12, %v6501_v15  ;;  %v9038_v10 = vld [vmem:[#allocation4 + $0x3ac] sm:$0xf]  ;;  %v6844_v61 = vor.u32 %v9075_v26, %v6843_v41  ;;  %v6629_v12 = vld [vmem:[#allocation4 + $0x318] sm:$0xf0]  ;;  %v9077_v41 = vld [vmem:[#allocation4 + $0x4e4] sm:$0xf] }
 0x177   :  { %1736 = vmatpush.bf16.msrb.mxu0 %v6296_v44  ;;  %v6712_v29 = vor.u32 %v9038_v10, %v6709_v35  ;;  %v9034_v44 = vld [vmem:[#allocation4 + $0x38c] sm:$0xf]  ;;  %v6632_v28 = vor.u32 %v9018_v55, %v6629_v12  ;;  %v9095_v26 = vld [vmem:[#allocation4 + $0x56c] sm:$0xf0]  ;;  %v7115_v10 = vld [vmem:[#allocation4 + $0x6e0] sm:$0xf] }
 0x179   :  { %1722 = vmatpush.bf16.msra.mxu3 %v6692_v37 }
 0x17a   :  { %1749 = vmatpush.bf16.msrb.mxu1 %v6424_v31  ;;  %1762 = vmatpush.bf16.msrb.mxu2 %v6552_v38  ;;  %v6693_v31 = vld [vmem:[#allocation4 + $0x398] sm:$0xf0]  ;;  %v6828_v38 = vor.u32 %v9071_v24, %v6827_v42  ;;  %v6848_v24 = vor.u32 %v9073_v40, %v6845_v17  ;;  %v7019_v40 = vld [vmem:[#allocation4 + $0x620] sm:$0xf]  ;;  %v929_v17 = vperm.slane %v10485_v13, 1 }
 0x17b   :  { %1737 = vmatpush.bf16.msrb.mxu0 %v6280_v43  ;;  %v6696_v9 = vor.u32 %v9034_v44, %v6693_v31  ;;  %v6939_v43 = vld [vmem:[#allocation4 + $0x580] sm:$0xf]  ;;  %v9069_v44 = vld [vmem:[#allocation4 + $0x4a4] sm:$0xf]  ;;  %v6829_v31 = vld [vmem:[#allocation4 + $0x4b0] sm:$0xf0] }
 0x17c   :  { %1675 = vmatmul.bf16.vlgmr.msrb.gmra.mxu3 %v10472_v4 }
 0x17d   :  { %1723 = vmatpush.bf16.msra.mxu3 %v6676_v1  ;;  %v6971_v1 = vld [vmem:[#allocation4 + $0x5c0] sm:$0xf] }
 0x17e   :  { %1750 = vmatpush.bf16.msrb.mxu1 %v6408_v46  ;;  %1763 = vmatpush.bf16.msrb.mxu2 %v6536_v5  ;;  %v6972_v8 = vor.u32 %v9107_v50, %v6971_v1  ;;  %v9099_v46 = vld [vmem:[#allocation4 + $0x58c] sm:$0xf0]  ;;  %v7099_v1 = vld [vmem:[#allocation4 + $0x6c0] sm:$0xf] }
 0x17f   :  { %1738 = vmatpush.bf16.msrb.mxu0 %v6264_v59  ;;  %v6940_v14 = vor.u32 %v9099_v46, %v6939_v43  ;;  %v6645_v59 = vld [vmem:[#allocation4 + $0x338] sm:$0xf0]  ;;  %v9139_v50 = vld [vmem:[#allocation4 + $0x6cc] sm:$0xf0]  ;;  %v6875_v46 = vld [vmem:[#allocation4 + $0x500] sm:$0xf] }
 0x180   :  { %v6648_v18 = vor.u32 %v9022_v30, %v6645_v59  ;;  %v7051_v59 = vld [vmem:[#allocation4 + $0x660] sm:$0xf] }
 0x181   :  { %1724 = vmatpush.bf16.msra.mxu3 %v6660_v60  ;;  %v9030_v60 = vld [vmem:[#allocation4 + $0x36c] sm:$0xf] }
 0x182   :  { %1751 = vmatpush.bf16.msrb.mxu1 %v6392_v2  ;;  %1764 = vmatpush.bf16.msrb.mxu2 %v6520_v53  ;;  %v6680_v5 = vor.u32 %v9030_v60, %v6677_v51  ;;  %v6763_v53 = vld [vmem:[#allocation4 + $0x420] sm:$0xf] }
 0x183   :  { %1739 = vmatpush.bf16.msrb.mxu0 %v6248_v19  ;;  %v6764_v15 = vor.u32 %v9055_v32, %v6763_v53  ;;  %v9051_v19 = vld [vmem:[#allocation4 + $0x40c] sm:$0xf0]  ;;  %v9057_v32 = vld [vmem:[#allocation4 + $0x444] sm:$0xf] }
 0x185   :  { %1725 = vmatpush.bf16.msra.mxu3 %v6644_v33  ;;  %v6779_v33 = vld [vmem:[#allocation4 + $0x440] sm:$0xf] }
 0x186   :  { %1752 = vmatpush.bf16.msrb.mxu1 %v6376_v21  ;;  %1765 = vmatpush.bf16.msrb.mxu2 %v6504_v16  ;;  %v6780_v2 = vor.u32 %v9059_v7, %v6779_v33  ;;  %v9109_v7 = vld [vmem:[#allocation4 + $0x5e4] sm:$0xf] }
 0x187   :  { %2592 = vmatpush.bf16.msra.mxu0 %v6860_v23  ;;  %v6923_v23 = vld [vmem:[#allocation4 + $0x560] sm:$0xf] }
 0x188   :  { %1740 = vmatmul.bf16.vlgmr.msrb.gmra.mxu0 %v10326_v56  ;;  %v6811_v56 = vld [vmem:[#allocation4 + $0x480] sm:$0xf]  ;;  %v6924_v35 = vor.u32 %v9095_v26, %v6923_v23  ;;  %v6957_v26 = vld [vmem:[#allocation4 + $0x5b0] sm:$0xf0] }
 0x189   :  { %1726 = vmatpush.bf16.msra.mxu3 %v6628_v39  ;;  %1753 = vmatmul.bf16.vlgmr.msrb.gmra.mxu1 %v10405_v22  ;;  %v6956_v22 = vor.u32 %v9103_v27, %v6955_v25  ;;  %v6812_v52 = vor.u32 %v9067_v11, %v6811_v56  ;;  %v6891_v25 = vld [vmem:[#allocation4 + $0x520] sm:$0xf]  ;;  %v9087_v27 = vld [vmem:[#allocation4 + $0x52c] sm:$0xf0] }
 0x18a   :  { %1766 = vmatmul.bf16.vlgmr.msrb.gmra.mxu2 %v10448_v58  ;;  %2605 = vmatpush.bf16.msra.mxu1 %v6988_v47  ;;  %v6795_v58 = vld [vmem:[#allocation4 + $0x460] sm:$0xf]  ;;  %v9091_v47 = vld [vmem:[#allocation4 + $0x54c] sm:$0xf0]  ;;  %v6892_v11 = vor.u32 %v9087_v27, %v6891_v25 }
 0x18b   :  { %2593 = vmatpush.bf16.msra.mxu0 %v6844_v61  ;;  %v6796_v45 = vor.u32 %v9063_v48, %v6795_v58  ;;  %v9143_v61 = vld [vmem:[#allocation4 + $0x6ec] sm:$0xf0]  ;;  %v7083_v56 = vld [vmem:[#allocation4 + $0x6a0] sm:$0xf] }
 0x18c   :  { %1727 = vmatmul.bf16.vlgmr.msra.gmra.mxu3 %v10472_v4  ;;  %v7116_v42 = vor.u32 %v9143_v61, %v7115_v10  ;;  %v9083_v58 = vld [vmem:[#allocation4 + $0x50c] sm:$0xf0]  ;;  %v7067_v48 = vld [vmem:[#allocation4 + $0x680] sm:$0xf] }
 0x18d   :  { %v10479_v37 = vpop.f32.mrf.mxu0  ;;  %1771 = vmatpush.bf16.msrb.mxu3 %v6744_v34  ;;  %v6747_v34 = vld [vmem:[#allocation4 + $0x400] sm:$0xf]  ;;  %v9115_v25 = vld [vmem:[#allocation4 + $0x60c] sm:$0xf0] }
 0x18e   :  { %2606 = vmatpush.bf16.msra.mxu1 %v6972_v8  ;;  %v1586_v63 = vadd.f32 %v10479_v37, %v928_v0  ;;  %v6748_v21 = vor.u32 %v9051_v19, %v6747_v34  ;;  %v6861_v37 = vld [vmem:[#allocation4 + $0x4f0] sm:$0xf0]  ;;  %2618 = vmatpush.bf16.msra.mxu2 %v7116_v42  ;;  %v7100_v8 = vor.u32 %v9139_v50, %v7099_v1  ;;  %v9097_v50 = vld [vmem:[#allocation4 + $0x584] sm:$0xf]  ;;  %v7243_v27 = vld [vmem:[#allocation4 + $0x7e0] sm:$0xf] }
 0x18f   :  { %2594 = vmatpush.bf16.msra.mxu0 %v6828_v38  ;;  %v6832_v38 = vor.u32 %v9069_v44, %v6829_v31  ;;  %v6941_v44 = vld [vmem:[#allocation4 + $0x590] sm:$0xf0] }
 0x191   :  { %1772 = vmatpush.bf16.msrb.mxu3 %v6728_v62  ;;  %v6864_v62 = vor.u32 %v9077_v41, %v6861_v37  ;;  %v6765_v41 = vld [vmem:[#allocation4 + $0x430] sm:$0xf0]  ;;  %v9101_v37 = vld [vmem:[#allocation4 + $0x5a4] sm:$0xf] }
 0x192   :  { %2607 = vmatpush.bf16.msra.mxu1 %v6956_v22  ;;  %2619 = vmatpush.bf16.msra.mxu2 %v7100_v8  ;;  %v6960_v61 = vor.u32 %v9101_v37, %v6957_v26  ;;  %v6944_v8 = vor.u32 %v9097_v50, %v6941_v44  ;;  %v930_v26 = vperm.slane %v10485_v13, 2  ;;  %v7179_v44 = vld [vmem:[#allocation4 + $0x760] sm:$0xf] }
 0x193   :  { %2595 = vmatpush.bf16.msra.mxu0 %v6812_v52  ;;  %v6813_v52 = vld [vmem:[#allocation4 + $0x490] sm:$0xf0] }
 0x195   :  { %v1587_v20 = vpop.f32.mrf.mxu0  ;;  %1773 = vmatpush.bf16.msrb.mxu3 %v6712_v29 }
 0x196   :  { %2608 = vmatpush.bf16.msra.mxu1 %v6940_v14  ;;  %v9135_v20 = vld [vmem:[#allocation4 + $0x6ac] sm:$0xf0]  ;;  %v6797_v14 = vld [vmem:[#allocation4 + $0x470] sm:$0xf0] }
 0x197   :  { %2596 = vmatpush.bf16.msra.mxu0 %v6796_v45  ;;  %v7084_v22 = vor.u32 %v9135_v20, %v7083_v56  ;;  %v7068_v45 = vor.u32 %v9131_v54, %v7067_v48  ;;  %v6800_v33 = vor.u32 %v9061_v3, %v6797_v14  ;;  %v9175_v20 = vld [vmem:[#allocation4 + $0x7ec] sm:$0xf0]  ;;  %v7117_v48 = vld [vmem:[#allocation4 + $0x6f0] sm:$0xf0]  ;;  %v7227_v3 = vld [vmem:[#allocation4 + $0x7c0] sm:$0xf] }
 0x198   :  { %v9171_v14 = vld [vmem:[#allocation4 + $0x7cc] sm:$0xf0] }
 0x199   :  { %1774 = vmatpush.bf16.msrb.mxu3 %v6696_v9  ;;  %v9065_v9 = vld [vmem:[#allocation4 + $0x484] sm:$0xf]  ;;  %2620 = vmatpush.bf16.msra.mxu2 %v7084_v22  ;;  %v6925_v22 = vld [vmem:[#allocation4 + $0x570] sm:$0xf0] }
 0x19a   :  { %2609 = vmatpush.bf16.msra.mxu1 %v6924_v35  ;;  %v6816_v43 = vor.u32 %v9065_v9, %v6813_v52  ;;  %v9093_v9 = vld [vmem:[#allocation4 + $0x564] sm:$0xf] }
 0x19b   :  { %2597 = vmatpush.bf16.msra.mxu0 %v6780_v2  ;;  %v9127_v2 = vld [vmem:[#allocation4 + $0x66c] sm:$0xf0] }
 0x19c   :  { %v7052_v53 = vor.u32 %v9127_v2, %v7051_v59 }
 0x19d   :  { %1775 = vmatpush.bf16.msrb.mxu3 %v6680_v5  ;;  %v10494_v60 = vpop.f32.mrf.mxu0  ;;  %v6876_v5 = vor.u32 %v9083_v58, %v6875_v46  ;;  %2621 = vmatpush.bf16.msra.mxu2 %v7068_v45  ;;  %v6928_v46 = vor.u32 %v9093_v9, %v6925_v22  ;;  %v9141_v58 = vld [vmem:[#allocation4 + $0x6e4] sm:$0xf]  ;;  %v7228_v45 = vor.u32 %v9171_v14, %v7227_v3  ;;  %v6851_v9 = vld [vmem:[#allocation4 + $0x4c8] sm:$0xf] }
 0x19e   :  { %v1638_v56 = vadd.f32 %v10494_v60, %v929_v17  ;;  %v7120_v54 = vor.u32 %v9141_v58, %v7117_v48  ;;  %v7069_v17 = vld [vmem:[#allocation4 + $0x690] sm:$0xf0]  ;;  %v9155_v58 = vld [vmem:[#allocation4 + $0x74c] sm:$0xf0] }
 0x19f   :  { %2598 = vmatpush.bf16.msra.mxu0 %v6764_v15 }
 0x1a1   :  { %1776 = vmatpush.bf16.msrb.mxu3 %v6664_v57  ;;  %v6989_v57 = vld [vmem:[#allocation4 + $0x5f0] sm:$0xf0]  ;;  %2622 = vmatpush.bf16.msra.mxu2 %v7052_v53 }
 0x1a2   :  { %v1598_v39 = vpop.f32.mrf.mxu1  ;;  %v6992_v30 = vor.u32 %v9109_v7, %v6989_v57  ;;  %v6909_v7 = vld [vmem:[#allocation4 + $0x550] sm:$0xf0]  ;;  %v9137_v57 = vld [vmem:[#allocation4 + $0x6c4] sm:$0xf] }
 0x1a3   :  { %v10489_v36 = vadd.f32 %v1598_v39, %v1586_v63  ;;  %2599 = vmatpush.bf16.msra.mxu0 %v6748_v21  ;;  %v9105_v63 = vld [vmem:[#allocation4 + $0x5c4] sm:$0xf]  ;;  %v6973_v39 = vld [vmem:[#allocation4 + $0x5d0] sm:$0xf0]  ;;  %v9123_v21 = vld [vmem:[#allocation4 + $0x64c] sm:$0xf0] }
 0x1a4   :  { %v6976_v19 = vor.u32 %v9105_v63, %v6973_v39  ;;  %v7101_v53 = vld [vmem:[#allocation4 + $0x6d0] sm:$0xf0]  ;;  %v9085_v39 = vld [vmem:[#allocation4 + $0x524] sm:$0xf] }
 0x1a5   :  { %1777 = vmatpush.bf16.msrb.mxu3 %v6648_v18  ;;  %v6781_v18 = vld [vmem:[#allocation4 + $0x450] sm:$0xf0]  ;;  %v1639_v55 = vpop.f32.mrf.mxu0  ;;  %v7104_v63 = vor.u32 %v9137_v57, %v7101_v53  ;;  %v9151_v57 = vld [vmem:[#allocation4 + $0x72c] sm:$0xf0]  ;;  %v9117_v53 = vld [vmem:[#allocation4 + $0x624] sm:$0xf] }
 0x1a6   :  { %v6784_v15 = vor.u32 %v9057_v32, %v6781_v18 }
 0x1a7   :  { %2644 = vmatpush.bf16.msrb.mxu0 %v6864_v62 }
 0x1a9   :  { %1778 = vmatpush.bf16.msrb.mxu3 %v6632_v28  ;;  %v7035_v28 = vld [vmem:[#allocation4 + $0x640] sm:$0xf] }
 0x1aa   :  { %v1600_v16 = vpop.f32.mrf.mxu1 }
 0x1ab   :  { %2645 = vmatpush.bf16.msrb.mxu0 %v6848_v24  ;;  %v7036_v16 = vor.u32 %v9123_v21, %v7035_v28  ;;  %v9049_v24 = vld [vmem:[#allocation4 + $0x404] sm:$0xf] }
 0x1ac   :  { %1779 = vmatmul.bf16.vlgmr.msrb.gmra.mxu3 %v10472_v4  ;;  %v6907_v4 = vld [vmem:[#allocation4 + $0x540] sm:$0xf] }
 0x1ad   :  { %v6908_v29 = vor.u32 %v9091_v47, %v6907_v4  ;;  %2623 = vmatpush.bf16.msra.mxu2 %v7036_v16  ;;  %v6749_v4 = vld [vmem:[#allocation4 + $0x410] sm:$0xf0] }
 0x1ae   :  { %v7085_v16 = vld [vmem:[#allocation4 + $0x6b0] sm:$0xf0] }
 0x1af   :  { %2610 = vmatpush.bf16.msra.mxu1 %v6908_v29  ;;  %2646 = vmatpush.bf16.msrb.mxu0 %v6832_v38  ;;  %v6752_v29 = vor.u32 %v9049_v24, %v6749_v4  ;;  %v7003_v38 = vld [vmem:[#allocation4 + $0x600] sm:$0xf]  ;;  %v6867_v24 = vld [vmem:[#allocation4 + $0x4e8] sm:$0xf]  ;;  %v9080_v4 = vld [vmem:[#allocation4 + $0x4f4] sm:$0xf0] }
 0x1b2   :  { %v10496_v51 = vpop.f32.mrf.mxu1 }
 0x1b3   :  { %2611 = vmatpush.bf16.msra.mxu1 %v6892_v11  ;;  %2647 = vmatpush.bf16.msrb.mxu0 %v6816_v43  ;;  %v7004_v11 = vor.u32 %v9115_v25, %v7003_v38  ;;  %v7244_v43 = vor.u32 %v9175_v20, %v7243_v27  ;;  %v1651_v60 = vadd.f32 %v10496_v51, %v1638_v56  ;;  %v9125_v27 = vld [vmem:[#allocation4 + $0x664] sm:$0xf]  ;;  %v7053_v56 = vld [vmem:[#allocation4 + $0x670] sm:$0xf0] }
 0x1b4   :  { %v6868_v20 = vor.u32 %v9080_v4, %v6867_v24  ;;  %v7056_v22 = vor.u32 %v9125_v27, %v7053_v56  ;;  %v9060_v27 = vld [vmem:[#allocation4 + $0x454] sm:$0xf0]  ;;  %v6979_v56 = vld [vmem:[#allocation4 + $0x5c8] sm:$0xf] }
 0x1b5   :  { %2631 = vmatpush.bf16.msra.mxu3 %v7244_v43  ;;  %v9076_v43 = vld [vmem:[#allocation4 + $0x4d4] sm:$0xf0] }
 0x1b7   :  { %2612 = vmatpush.bf16.msra.mxu1 %v6876_v5  ;;  %2648 = vmatpush.bf16.msrb.mxu0 %v6800_v33  ;;  %v9089_v33 = vld [vmem:[#allocation4 + $0x544] sm:$0xf] }
 0x1b8   :  { %v6912_v2 = vor.u32 %v9089_v33, %v6909_v7  ;;  %v7147_v7 = vld [vmem:[#allocation4 + $0x720] sm:$0xf] }
 0x1b9   :  { %2632 = vmatpush.bf16.msra.mxu3 %v7228_v45  ;;  %v6835_v45 = vld [vmem:[#allocation4 + $0x4a8] sm:$0xf] }
 0x1ba   :  { %v1652_v12 = vpop.f32.mrf.mxu1 }
 0x1bb   :  { %2657 = vmatpush.bf16.msrb.mxu1 %v6992_v30  ;;  %2649 = vmatpush.bf16.msrb.mxu0 %v6784_v15  ;;  %v7211_v12 = vld [vmem:[#allocation4 + $0x7a0] sm:$0xf]  ;;  %v9167_v15 = vld [vmem:[#allocation4 + $0x7ac] sm:$0xf0] }
 0x1bc   :  { %v7212_v51 = vor.u32 %v9167_v15, %v7211_v12  ;;  %v7131_v15 = vld [vmem:[#allocation4 + $0x700] sm:$0xf] }
 0x1be   :  { %2633 = vmatpush.bf16.msra.mxu3 %v7212_v51  ;;  %v9147_v51 = vld [vmem:[#allocation4 + $0x70c] sm:$0xf0] }
 0x1bf   :  { %2658 = vmatpush.bf16.msrb.mxu1 %v6976_v19  ;;  %v9133_v19 = vld [vmem:[#allocation4 + $0x6a4] sm:$0xf] }
 0x1c0   :  { %v7088_v37 = vor.u32 %v9133_v19, %v7085_v16  ;;  %v9068_v19 = vld [vmem:[#allocation4 + $0x494] sm:$0xf0] }
 0x1c3   :  { %2659 = vmatpush.bf16.msrb.mxu1 %v6960_v61  ;;  %v9081_v61 = vld [vmem:[#allocation4 + $0x504] sm:$0xf] }
 0x1c7   :  { %2660 = vmatpush.bf16.msrb.mxu1 %v6944_v8 }
 0x1cb   :  { %2661 = vmatpush.bf16.msrb.mxu1 %v6928_v46  ;;  %v7163_v46 = vld [vmem:[#allocation4 + $0x740] sm:$0xf] }
 0x1cc   :  { %v10492_v49 = vpop.f32.mrf.mxu2  ;;  %v7164_v48 = vor.u32 %v9155_v58, %v7163_v46  ;;  %v6771_v58 = vld [vmem:[#allocation4 + $0x428] sm:$0xf] }
 0x1cd   :  { %v1612_v34 = vadd.f32 %v10492_v49, %v10489_v36  ;;  %v9119_v36 = vld [vmem:[#allocation4 + $0x62c] sm:$0xf0] }
 0x1ce   :  { %v7020_v42 = vor.u32 %v9119_v36, %v7019_v40  ;;  %v6877_v40 = vld [vmem:[#allocation4 + $0x510] sm:$0xf0] }
 0x1cf   :  { %2662 = vmatpush.bf16.msrb.mxu1 %v6912_v2  ;;  %v6880_v36 = vor.u32 %v9081_v61, %v6877_v40  ;;  %v9072_v2 = vld [vmem:[#allocation4 + $0x4b4] sm:$0xf0]  ;;  %v7245_v61 = vld [vmem:[#allocation4 + $0x7f0] sm:$0xf0] }
 0x1d0   :  { %2624 = vmatpush.bf16.msra.mxu2 %v7020_v42  ;;  %v6836_v12 = vor.u32 %v9072_v2, %v6835_v45  ;;  %v9161_v45 = vld [vmem:[#allocation4 + $0x784] sm:$0xf]  ;;  %v6755_v2 = vld [vmem:[#allocation4 + $0x408] sm:$0xf] }
 0x1d4   :  { %v1613_v6 = vpop.f32.mrf.mxu2  ;;  %2625 = vmatpush.bf16.msra.mxu2 %v7004_v11 }
 0x1d5   :  { %v9053_v6 = vld [vmem:[#allocation4 + $0x424] sm:$0xf] }
 0x1d6   :  { %v6768_v23 = vor.u32 %v9053_v6, %v6765_v41 }
 0x1d8   :  { %2650 = vmatpush.bf16.msrb.mxu0 %v6768_v23  ;;  %2670 = vmatpush.bf16.msrb.mxu2 %v7120_v54  ;;  %v7037_v54 = vld [vmem:[#allocation4 + $0x650] sm:$0xf0] }
 0x1dc   :  { %v10498_v0 = vpop.f32.mrf.mxu2  ;;  %2651 = vmatpush.bf16.msrb.mxu0 %v6752_v29  ;;  %2671 = vmatpush.bf16.msrb.mxu2 %v7104_v63 }
 0x1dd   :  { %v1664_v18 = vadd.f32 %v10498_v0, %v1651_v60  ;;  %v7195_v0 = vld [vmem:[#allocation4 + $0x780] sm:$0xf]  ;;  %v6852_v60 = vor.u32 %v9076_v43, %v6851_v9  ;;  %v9165_v9 = vld [vmem:[#allocation4 + $0x7a4] sm:$0xf] }
 0x1e0   :  { %2672 = vmatpush.bf16.msrb.mxu2 %v7088_v37  ;;  %v7005_v37 = vld [vmem:[#allocation4 + $0x610] sm:$0xf0] }
 0x1e2   :  { %v10506_v47 = vpop.f32.mrf.mxu0 }
 0x1e3   :  { %v1690_v38 = vadd.f32 %v10506_v47, %v930_v26 }
 0x1e4   :  { %v1665_v35 = vpop.f32.mrf.mxu2 }
 0x1e6   :  { %v10508_v1 = vpop.f32.mrf.mxu1 }
 0x1e7   :  { %v1703_v47 = vadd.f32 %v10508_v1, %v1690_v38  ;;  %v6787_v38 = vld [vmem:[#allocation4 + $0x448] sm:$0xf] }
 0x1e8   :  { %v6788_v43 = vor.u32 %v9060_v27, %v6787_v38 }
 0x1ea   :  { %v1691_v30 = vpop.f32.mrf.mxu0 }
 0x1ec   :  { %v10511_v5 = vpop.f32.mrf.mxu2 }
 0x1ee   :  { %v1704_v59 = vpop.f32.mrf.mxu1 }
 0x1ef   :  { %v1624_v62 = vpop.f32.mrf.mxu3  ;;  %v1716_v59 = vadd.f32 %v10511_v5, %v1703_v47  ;;  %v7132_v5 = vor.u32 %v9147_v51, %v7131_v15  ;;  %v9104_v47 = vld [vmem:[#allocation4 + $0x5b4] sm:$0xf0]  ;;  %v7181_v15 = vld [vmem:[#allocation4 + $0x770] sm:$0xf0] }
 0x1f0   :  { %v10502_v10 = vadd.f32 %v1624_v62, %v1612_v34  ;;  %v6893_v34 = vld [vmem:[#allocation4 + $0x530] sm:$0xf0]  ;;  %v9163_v62 = vld [vmem:[#allocation4 + $0x78c] sm:$0xf0] }
 0x1f1   :  { %v6896_v21 = vor.u32 %v9085_v39, %v6893_v34  ;;  %v7196_v35 = vor.u32 %v9163_v62, %v7195_v0  ;;  %v6819_v34 = vld [vmem:[#allocation4 + $0x488] sm:$0xf] }
 0x1f2   :  { %v1784_v49 = vsub.f32 0.0, %v10502_v10  ;;  %v6820_v62 = vor.u32 %v9068_v19, %v6819_v34 }
 0x1f3   :  { %2663 = vmatpush.bf16.msrb.mxu1 %v6896_v21  ;;  %2634 = vmatpush.bf16.msra.mxu3 %v7196_v35  ;;  %v6803_v21 = vld [vmem:[#allocation4 + $0x468] sm:$0xf]  ;;  %v9173_v35 = vld [vmem:[#allocation4 + $0x7e4] sm:$0xf] }
 0x1f4   :  { %v1788_v31 = vmul.f32 1.442695, %v1784_v49  ;;  %v1717_v41 = vpop.f32.mrf.mxu2  ;;  %v9129_v49 = vld [vmem:[#allocation4 + $0x684] sm:$0xf] }
 0x1f5   :  { %v7072_v29 = vor.u32 %v9129_v49, %v7069_v17  ;;  %v9113_v41 = vld [vmem:[#allocation4 + $0x604] sm:$0xf]  ;;  %v6995_v49 = vld [vmem:[#allocation4 + $0x5e8] sm:$0xf]  ;;  %v9112_v17 = vld [vmem:[#allocation4 + $0x5f4] sm:$0xf0] }
 0x1f6   :  { %9616 = vpow2.f32 %v1788_v31  ;;  %v9159_v31 = vld [vmem:[#allocation4 + $0x76c] sm:$0xf0]  ;;  %v7008_v26 = vor.u32 %v9113_v41, %v7005_v37 }
 0x1f7   :  { %v1626_v52 = vpop.f32.mrf.mxu3  ;;  %2664 = vmatpush.bf16.msrb.mxu1 %v6880_v36  ;;  %2673 = vmatpush.bf16.msrb.mxu2 %v7072_v29  ;;  %v7180_v25 = vor.u32 %v9159_v31, %v7179_v44  ;;  %v9169_v29 = vld [vmem:[#allocation4 + $0x7c4] sm:$0xf] }
 0x1f9   :  { %2635 = vmatpush.bf16.msra.mxu3 %v7180_v25 }
 0x1fb   :  { %2674 = vmatpush.bf16.msrb.mxu2 %v7056_v22  ;;  %v7213_v22 = vld [vmem:[#allocation4 + $0x7b0] sm:$0xf0] }
 0x1fc   :  { %v9617_v32 = vpop.eup %9616 }
 0x1fd   :  { %v1796_v55 = vadd.f32 1.0, %v9617_v32  ;;  %v7021_v32 = vld [vmem:[#allocation4 + $0x630] sm:$0xf0]  ;;  %2636 = vmatpush.bf16.msra.mxu3 %v7164_v48 }
 0x1fe   :  { %v7024_v63 = vor.u32 %v9117_v53, %v7021_v32  ;;  %v9052_v53 = vld [vmem:[#allocation4 + $0x414] sm:$0xf0]  ;;  %v6947_v32 = vld [vmem:[#allocation4 + $0x588] sm:$0xf] }
 0x1ff   :  { %9618 = vrcp.f32 %v1796_v55  ;;  %v1676_v28 = vpop.f32.mrf.mxu3  ;;  %v6756_v34 = vor.u32 %v9052_v53, %v6755_v2  ;;  %v9062_v2 = vld [vmem:[#allocation4 + $0x46c] sm:$0xf]  ;;  %v6805_v53 = vld [vmem:[#allocation4 + $0x478] sm:$0xf0] }
 0x200   :  { %v10515_v6 = vadd.f32 %v1676_v28, %v1664_v18  ;;  %v7148_v18 = vor.u32 %v9151_v57, %v7147_v7  ;;  %v7197_v7 = vld [vmem:[#allocation4 + $0x790] sm:$0xf0] }
 0x202   :  { %v1785_v23 = vsub.f32 0.0, %v10515_v6  ;;  %2637 = vmatpush.bf16.msra.mxu3 %v7148_v18  ;;  %v7200_v18 = vor.u32 %v9161_v45, %v7197_v7  ;;  %v9084_v7 = vld [vmem:[#allocation4 + $0x514] sm:$0xf0] }
 0x204   :  { %v1790_v42 = vmul.f32 1.442695, %v1785_v23  ;;  %v9064_v23 = vld [vmem:[#allocation4 + $0x474] sm:$0xf0] }
 0x205   :  { %v9619_v50 = vpop.eup %9618  ;;  %v10525_v14 = vpop.f32.mrf.mxu0  ;;  %v6804_v31 = vor.u32 %v9064_v23, %v6803_v21  ;;  %v9096_v21 = vld [vmem:[#allocation4 + $0x574] sm:$0xf0]  ;;  %v6853_v23 = vld [vmem:[#allocation4 + $0x4d8] sm:$0xf0] }
 0x206   :  { %v1804_v8 = vmul.f32 %v9619_v50, %v10502_v10  ;;  %9620 = vpow2.f32 %v1790_v42  ;;  %v9121_v10 = vld [vmem:[#allocation4 + $0x644] sm:$0xf]  ;;  %v10527_v33 = vpop.f32.mrf.mxu1  ;;  %v7248_v42 = vor.u32 %v9173_v35, %v7245_v61  ;;  %2638 = vmatpush.bf16.msra.mxu3 %v7132_v5  ;;  %v7229_v50 = vld [vmem:[#allocation4 + $0x7d0] sm:$0xf0] }
 0x207   :  { %v1678_v11 = vpop.f32.mrf.mxu3  ;;  %v7040_v3 = vor.u32 %v9121_v10, %v7037_v54  ;;  %v9056_v10 = vld [vmem:[#allocation4 + $0x434] sm:$0xf0]  ;;  %v6963_v54 = vld [vmem:[#allocation4 + $0x5a8] sm:$0xf]  ;;  %v9153_v35 = vld [vmem:[#allocation4 + $0x744] sm:$0xf] }
 0x208   :  { %v10521_v52 = vpack.c.bf16 %v1804_v8, %v1804_v8  ;;  %v6996_v8 = vor.u32 %v9112_v17, %v6995_v49  ;;  %v9108_v11 = vld [vmem:[#allocation4 + $0x5d4] sm:$0xf0]  ;;  %v6772_v57 = vor.u32 %v9056_v10, %v6771_v58  ;;  %v7165_v61 = vld [vmem:[#allocation4 + $0x750] sm:$0xf0] }
 0x209   :  { %2675 = vmatpush.bf16.msrb.mxu2 %v7040_v3  ;;  %v6980_v46 = vor.u32 %v9108_v11, %v6979_v56  ;;  %v7216_v3 = vor.u32 %v9165_v9, %v7213_v22  ;;  %v9136_v22 = vld [vmem:[#allocation4 + $0x6b4] sm:$0xf0]  ;;  %v7133_v10 = vld [vmem:[#allocation4 + $0x710] sm:$0xf0] }
 0x20a   :  { %2600 = vmatmul.bf16.vlgmr.msra.gmra.mxu0 %v10521_v52  ;;  %2683 = vmatpush.bf16.msrb.mxu3 %v7248_v42  ;;  %v6915_v42 = vld [vmem:[#allocation4 + $0x548] sm:$0xf] }
 0x20b   :  { %2696 = vmatpush.bf16.msra.mxu0 %v6868_v20  ;;  %v7232_v20 = vor.u32 %v9169_v29, %v7229_v50  ;;  %v9140_v50 = vld [vmem:[#allocation4 + $0x6d4] sm:$0xf0] }
 0x20c   :  { %v9621_v30 = vpop.eup %9620 }
 0x20d   :  { %v1797_v1 = vadd.f32 1.0, %v9621_v30  ;;  %2676 = vmatpush.bf16.msrb.mxu2 %v7024_v63  ;;  %v10533_v16 = vpop.f32.mrf.mxu2  ;;  %v1743_v0 = vpop.f32.mrf.mxu0  ;;  %v6964_v30 = vor.u32 %v9104_v47, %v6963_v54  ;;  %v9078_v63 = vld [vmem:[#allocation4 + $0x4ec] sm:$0xf] }
 0x20e   :  { %v1756_v40 = vpop.f32.mrf.mxu1  ;;  %2684 = vmatpush.bf16.msrb.mxu3 %v7232_v20  ;;  %v9144_v0 = vld [vmem:[#allocation4 + $0x6f4] sm:$0xf0] }
 0x20f   :  { %9622 = vrcp.f32 %v1797_v1  ;;  %v1728_v55 = vpop.f32.mrf.mxu3  ;;  %2697 = vmatpush.bf16.msra.mxu0 %v6852_v60  ;;  %v9100_v1 = vld [vmem:[#allocation4 + $0x594] sm:$0xf0] }
 0x210   :  { %v10530_v39 = vadd.f32 %v1728_v55, %v1716_v59  ;;  %v931_v59 = vperm.slane %v10485_v13, 3  ;;  %v6869_v55 = vld [vmem:[#allocation4 + $0x4f8] sm:$0xf0]  ;;  %v6948_v19 = vor.u32 %v9100_v1, %v6947_v32  ;;  %v7123_v13 = vld [vmem:[#allocation4 + $0x6e8] sm:$0xf] }
 0x211   :  { %2677 = vmatpush.bf16.msrb.mxu2 %v7008_v26  ;;  %v6872_v5 = vor.u32 %v9078_v63, %v6869_v55  ;;  %v7124_v49 = vor.u32 %v9144_v0, %v7123_v13  ;;  %v9088_v20 = vld [vmem:[#allocation4 + $0x534] sm:$0xf0]  ;;  %v9110_v1 = vld [vmem:[#allocation4 + $0x5ec] sm:$0xf]  ;;  %v6981_v13 = vld [vmem:[#allocation4 + $0x5d8] sm:$0xf0] }
 0x212   :  { %v1786_v28 = vsub.f32 0.0, %v10530_v39  ;;  %2685 = vmatpush.bf16.msrb.mxu3 %v7216_v3  ;;  %v1742_v51 = vadd.f32 %v10525_v14, %v931_v59  ;;  %v6883_v3 = vld [vmem:[#allocation4 + $0x508] sm:$0xf] }
 0x213   :  { %2698 = vmatpush.bf16.msra.mxu0 %v6836_v12  ;;  %v9157_v12 = vld [vmem:[#allocation4 + $0x764] sm:$0xf]  ;;  %v6884_v63 = vor.u32 %v9084_v7, %v6883_v3  ;;  %v7043_v0 = vld [vmem:[#allocation4 + $0x648] sm:$0xf]  ;;  %v9090_v7 = vld [vmem:[#allocation4 + $0x54c] sm:$0xf] }
 0x214   :  { %v1792_v36 = vmul.f32 1.442695, %v1786_v28  ;;  %v6931_v28 = vld [vmem:[#allocation4 + $0x568] sm:$0xf]  ;;  %v7184_v41 = vor.u32 %v9157_v12, %v7181_v15  ;;  %v1755_v40 = vadd.f32 %v10527_v33, %v1742_v51  ;;  %v9149_v33 = vld [vmem:[#allocation4 + $0x724] sm:$0xf]  ;;  %v6808_v15 = vor.u32 %v9062_v2, %v6805_v53 }
 0x215   :  { %v9623_v24 = vpop.eup %9622  ;;  %v6932_v14 = vor.u32 %v9096_v21, %v6931_v28  ;;  %v7059_v51 = vld [vmem:[#allocation4 + $0x668] sm:$0xf]  ;;  %v6789_v28 = vld [vmem:[#allocation4 + $0x458] sm:$0xf0]  ;;  %v9106_v21 = vld [vmem:[#allocation4 + $0x5cc] sm:$0xf] }
 0x216   :  { %v1805_v4 = vmul.f32 %v9623_v24, %v10515_v6  ;;  %9624 = vpow2.f32 %v1792_v36  ;;  %v1769_v6 = vpop.f32.mrf.mxu2  ;;  %2686 = vmatpush.bf16.msrb.mxu3 %v7200_v18  ;;  %v9092_v24 = vld [vmem:[#allocation4 + $0x554] sm:$0xf0]  ;;  %v1768_v29 = vadd.f32 %v10533_v16, %v1755_v40  ;;  %v6899_v16 = vld [vmem:[#allocation4 + $0x528] sm:$0xf]  ;;  %v6997_v18 = vld [vmem:[#allocation4 + $0x5f8] sm:$0xf0] }
 0x217   :  { %v1730_v44 = vpop.f32.mrf.mxu3  ;;  %2699 = vmatpush.bf16.msra.mxu0 %v6820_v62  ;;  %v9074_v62 = vld [vmem:[#allocation4 + $0x4cc] sm:$0xf]  ;;  %v6916_v38 = vor.u32 %v9092_v24, %v6915_v42  ;;  %v7091_v6 = vld [vmem:[#allocation4 + $0x6a8] sm:$0xf]  ;;  %v6900_v47 = vor.u32 %v9088_v20, %v6899_v16  ;;  %v9176_v16 = vld [vmem:[#allocation4 + $0x7f4] sm:$0xf0] }
 0x218   :  { %v10536_v25 = vpack.c.bf16 %v1805_v4, %v1805_v4  ;;  %v6856_v17 = vor.u32 %v9074_v62, %v6853_v23  ;;  %v7107_v4 = vld [vmem:[#allocation4 + $0x6c8] sm:$0xf]  ;;  %v6837_v44 = vld [vmem:[#allocation4 + $0x4b8] sm:$0xf0]  ;;  %v6984_v23 = vor.u32 %v9106_v21, %v6981_v13  ;;  %v9094_v20 = vld [vmem:[#allocation4 + $0x56c] sm:$0xf] }
 0x219   :  { %v7108_v56 = vor.u32 %v9140_v50, %v7107_v4  ;;  %v7027_v24 = vld [vmem:[#allocation4 + $0x628] sm:$0xf]  ;;  %v9050_v50 = vld [vmem:[#allocation4 + $0x40c] sm:$0xf]  ;;  %v7077_v13 = vld [vmem:[#allocation4 + $0x698] sm:$0xf0] }
 0x21a   :  { %2613 = vmatmul.bf16.vlgmr.msra.gmra.mxu1 %v10536_v25  ;;  %2652 = vmatmul.bf16.vlgmr.msrb.gmra.mxu0 %v10521_v52  ;;  %v9130_v21 = vld [vmem:[#allocation4 + $0x68c] sm:$0xf] }
 0x21b   :  { %2700 = vmatpush.bf16.msra.mxu0 %v6804_v31  ;;  %2709 = vmatpush.bf16.msra.mxu1 %v6996_v8  ;;  %v7168_v31 = vor.u32 %v9153_v35, %v7165_v61  ;;  %v7149_v8 = vld [vmem:[#allocation4 + $0x730] sm:$0xf0]  ;;  %v9054_v35 = vld [vmem:[#allocation4 + $0x42c] sm:$0xf]  ;;  %v6773_v61 = vld [vmem:[#allocation4 + $0x438] sm:$0xf0] }
 0x21c   :  { %v9625_v48 = vpop.eup %9624  ;;  %2687 = vmatpush.bf16.msrb.mxu3 %v7184_v41  ;;  %v7152_v58 = vor.u32 %v9149_v33, %v7149_v8  ;;  %v6776_v42 = vor.u32 %v9054_v35, %v6773_v61  ;;  %v7061_v35 = vld [vmem:[#allocation4 + $0x678] sm:$0xf0] }
 0x21d   :  { %v1798_v60 = vadd.f32 1.0, %v9625_v48  ;;  %v9145_v48 = vld [vmem:[#allocation4 + $0x704] sm:$0xf] }
 0x21e   :  { %v7136_v32 = vor.u32 %v9145_v48, %v7133_v10 }
 0x21f   :  { %9626 = vrcp.f32 %v1798_v60  ;;  %2701 = vmatpush.bf16.msra.mxu0 %v6788_v43  ;;  %2710 = vmatpush.bf16.msra.mxu1 %v6980_v46  ;;  %v9066_v43 = vld [vmem:[#allocation4 + $0x48c] sm:$0xf]  ;;  %v6821_v46 = vld [vmem:[#allocation4 + $0x498] sm:$0xf0]  ;;  %v7092_v60 = vor.u32 %v9136_v22, %v7091_v6 }
 0x220   :  { %2688 = vmatpush.bf16.msrb.mxu3 %v7168_v31  ;;  %v6824_v45 = vor.u32 %v9066_v43, %v6821_v46  ;;  %v6949_v31 = vld [vmem:[#allocation4 + $0x598] sm:$0xf0]  ;;  %v9142_v43 = vld [vmem:[#allocation4 + $0x6ec] sm:$0xf] }
 0x221   :  { %v6933_v22 = vld [vmem:[#allocation4 + $0x578] sm:$0xf0] }
 0x222   :  { %v7125_v46 = vld [vmem:[#allocation4 + $0x6f8] sm:$0xf0] }
 0x223   :  { %2702 = vmatpush.bf16.msra.mxu0 %v6772_v57  ;;  %2711 = vmatpush.bf16.msra.mxu1 %v6964_v30  ;;  %v7075_v57 = vld [vmem:[#allocation4 + $0x688] sm:$0xf]  ;;  %v9132_v30 = vld [vmem:[#allocation4 + $0x694] sm:$0xf0]  ;;  %v7128_v3 = vor.u32 %v9142_v43, %v7125_v46  ;;  %v7237_v43 = vld [vmem:[#allocation4 + $0x7d8] sm:$0xf0] }
 0x224   :  { %2689 = vmatpush.bf16.msrb.mxu3 %v7152_v58  ;;  %v7076_v12 = vor.u32 %v9132_v30, %v7075_v57  ;;  %v6917_v57 = vld [vmem:[#allocation4 + $0x558] sm:$0xf0]  ;;  %v9138_v30 = vld [vmem:[#allocation4 + $0x6cc] sm:$0xf] }
 0x225   :  { %v9627_v37 = vpop.eup %9626  ;;  %v6920_v2 = vor.u32 %v9090_v7, %v6917_v57  ;;  %v7189_v7 = vld [vmem:[#allocation4 + $0x778] sm:$0xf0] }
 0x226   :  { %v1806_v26 = vmul.f32 %v9627_v37, %v10530_v39  ;;  %v9070_v39 = vld [vmem:[#allocation4 + $0x4ac] sm:$0xf] }
 0x227   :  { %2703 = vmatpush.bf16.msra.mxu0 %v6756_v34  ;;  %2712 = vmatpush.bf16.msra.mxu1 %v6948_v19  ;;  %v6840_v11 = vor.u32 %v9070_v39, %v6837_v44  ;;  %v7000_v34 = vor.u32 %v9110_v1, %v6997_v18  ;;  %v9128_v19 = vld [vmem:[#allocation4 + $0x674] sm:$0xf0]  ;;  %v6757_v39 = vld [vmem:[#allocation4 + $0x418] sm:$0xf0]  ;;  %v9098_v44 = vld [vmem:[#allocation4 + $0x58c] sm:$0xf] }
 0x228   :  { %v10544_v36 = vpack.c.bf16 %v1806_v26, %v1806_v26  ;;  %2690 = vmatpush.bf16.msrb.mxu3 %v7136_v32  ;;  %v7060_v41 = vor.u32 %v9128_v19, %v7059_v51  ;;  %v9124_v26 = vld [vmem:[#allocation4 + $0x654] sm:$0xf0]  ;;  %v6760_v8 = vor.u32 %v9050_v50, %v6757_v39  ;;  %v7219_v32 = vld [vmem:[#allocation4 + $0x7a8] sm:$0xf]  ;;  %v9086_v18 = vld [vmem:[#allocation4 + $0x52c] sm:$0xf] }
 0x229   :  { %v9168_v1 = vld [vmem:[#allocation4 + $0x7b4] sm:$0xf0]  ;;  %v9118_v39 = vld [vmem:[#allocation4 + $0x62c] sm:$0xf] }
 0x22a   :  { %2626 = vmatmul.bf16.vlgmr.msra.gmra.mxu2 %v10544_v36  ;;  %2665 = vmatmul.bf16.vlgmr.msrb.gmra.mxu1 %v10536_v25  ;;  %v9164_v19 = vld [vmem:[#allocation4 + $0x794] sm:$0xf0] }
 0x22b   :  { %2748 = vmatpush.bf16.msrb.mxu0 %v6872_v5  ;;  %2713 = vmatpush.bf16.msra.mxu1 %v6932_v14  ;;  %v9058_v5 = vld [vmem:[#allocation4 + $0x44c] sm:$0xf]  ;;  %v9152_v50 = vld [vmem:[#allocation4 + $0x734] sm:$0xf0] }
 0x22c   :  { %2704 = vmatmul.bf16.vlgmr.msra.gmra.mxu0 %v10521_v52  ;;  %2722 = vmatpush.bf16.msra.mxu2 %v7124_v49  ;;  %v6792_v37 = vor.u32 %v9058_v5, %v6789_v28  ;;  %v9102_v14 = vld [vmem:[#allocation4 + $0x5ac] sm:$0xf]  ;;  %v6965_v49 = vld [vmem:[#allocation4 + $0x5b8] sm:$0xf0] }
 0x22d   :  { %v6968_v4 = vor.u32 %v9102_v14, %v6965_v49  ;;  %v9082_v5 = vld [vmem:[#allocation4 + $0x50c] sm:$0xf]  ;;  %v6885_v28 = vld [vmem:[#allocation4 + $0x518] sm:$0xf0]  ;;  %v7171_v14 = vld [vmem:[#allocation4 + $0x748] sm:$0xf] }
 0x22e   :  { %v9156_v49 = vld [vmem:[#allocation4 + $0x754] sm:$0xf0] }
 0x22f   :  { %v1780_v27 = vpop.f32.mrf.mxu3  ;;  %2749 = vmatpush.bf16.msrb.mxu0 %v6856_v17  ;;  %2714 = vmatpush.bf16.msra.mxu1 %v6916_v38  ;;  %v7044_v17 = vor.u32 %v9124_v26, %v7043_v0  ;;  %v7011_v38 = vld [vmem:[#allocation4 + $0x608] sm:$0xf]  ;;  %v7080_v0 = vor.u32 %v9130_v21, %v7077_v13  ;;  %v9126_v26 = vld [vmem:[#allocation4 + $0x66c] sm:$0xf]  ;;  %v7323_v13 = vld [vmem:[#allocation4 + $0x880] sm:$0xf] }
 0x230   :  { %v10550_v9 = vadd.f32 %v1780_v27, %v1768_v29  ;;  %2723 = vmatpush.bf16.msra.mxu2 %v7108_v56  ;;  %v9120_v29 = vld [vmem:[#allocation4 + $0x634] sm:$0xf0]  ;;  %v6952_v56 = vor.u32 %v9098_v44, %v6949_v31  ;;  %v7029_v44 = vld [vmem:[#allocation4 + $0x638] sm:$0xf0] }
 0x231   :  { %v7028_v33 = vor.u32 %v9120_v29, %v7027_v24  ;;  %v9116_v27 = vld [vmem:[#allocation4 + $0x614] sm:$0xf0]  ;;  %v7172_v24 = vor.u32 %v9156_v49, %v7171_v14  ;;  %v7155_v29 = vld [vmem:[#allocation4 + $0x728] sm:$0xf]  ;;  %v7291_v14 = vld [vmem:[#allocation4 + $0x840] sm:$0xf] }
 0x232   :  { %v1787_v54 = vsub.f32 0.0, %v10550_v9  ;;  %v7012_v48 = vor.u32 %v9116_v27, %v7011_v38  ;;  %v7156_v31 = vor.u32 %v9152_v50, %v7155_v29  ;;  %v9148_v38 = vld [vmem:[#allocation4 + $0x714] sm:$0xf0]  ;;  %v9114_v27 = vld [vmem:[#allocation4 + $0x60c] sm:$0xf] }
 0x233   :  { %2750 = vmatpush.bf16.msrb.mxu0 %v6840_v11  ;;  %2715 = vmatpush.bf16.msra.mxu1 %v6900_v47  ;;  %v7251_v11 = vld [vmem:[#allocation4 + $0x7e8] sm:$0xf]  ;;  %v6936_v47 = vor.u32 %v9094_v20, %v6933_v22  ;;  %v9170_v22 = vld [vmem:[#allocation4 + $0x7cc] sm:$0xf]  ;;  %v9187_v49 = vld [vmem:[#allocation4 + $0x84c] sm:$0xf0] }
 0x234   :  { %v1794_v59 = vmul.f32 1.442695, %v1787_v54  ;;  %2724 = vmatpush.bf16.msra.mxu2 %v7092_v60  ;;  %v7252_v10 = vor.u32 %v9176_v16, %v7251_v11  ;;  %v7235_v60 = vld [vmem:[#allocation4 + $0x7c8] sm:$0xf]  ;;  %v9174_v11 = vld [vmem:[#allocation4 + $0x7ec] sm:$0xf]  ;;  %v7240_v46 = vor.u32 %v9170_v22, %v7237_v43 }
 0x235   :  { %v7253_v16 = vld [vmem:[#allocation4 + $0x7f8] sm:$0xf0]  ;;  %v9235_v29 = vld [vmem:[#allocation4 + $0x9cc] sm:$0xf0]  ;;  %v7275_v50 = vld [vmem:[#allocation4 + $0x820] sm:$0xf] }
 0x236   :  { %9628 = vpow2.f32 %v1794_v59  ;;  %v7109_v59 = vld [vmem:[#allocation4 + $0x6d8] sm:$0xf0] }
 0x237   :  { %v1782_v55 = vpop.f32.mrf.mxu3  ;;  %2751 = vmatpush.bf16.msrb.mxu0 %v6824_v45  ;;  %2716 = vmatpush.bf16.msra.mxu1 %v6884_v63  ;;  %v9172_v45 = vld [vmem:[#allocation4 + $0x7d4] sm:$0xf0]  ;;  %v7112_v53 = vor.u32 %v9138_v30, %v7109_v59  ;;  %v6901_v63 = vld [vmem:[#allocation4 + $0x538] sm:$0xf0]  ;;  %v9154_v30 = vld [vmem:[#allocation4 + $0x74c] sm:$0xf] }
 0x238   :  { %2725 = vmatpush.bf16.msra.mxu2 %v7076_v12  ;;  %v9134_v55 = vld [vmem:[#allocation4 + $0x6ac] sm:$0xf]  ;;  %v7093_v12 = vld [vmem:[#allocation4 + $0x6b8] sm:$0xf0] }
 0x239   :  { %v7096_v51 = vor.u32 %v9134_v55, %v7093_v12  ;;  %v7173_v59 = vld [vmem:[#allocation4 + $0x758] sm:$0xf0]  ;;  %v7371_v55 = vld [vmem:[#allocation4 + $0x8e0] sm:$0xf]  ;;  %v9207_v12 = vld [vmem:[#allocation4 + $0x8ec] sm:$0xf0] }
 0x23a   :  { %2678 = vmatmul.bf16.vlgmr.msrb.gmra.mxu2 %v10544_v36  ;;  %2717 = vmatmul.bf16.vlgmr.msra.gmra.mxu1 %v10536_v25 }
 0x23b   :  { %2752 = vmatpush.bf16.msrb.mxu0 %v6808_v15  ;;  %2761 = vmatpush.bf16.msrb.mxu1 %v7000_v34  ;;  %v7220_v15 = vor.u32 %v9168_v1, %v7219_v32  ;;  %v7203_v34 = vld [vmem:[#allocation4 + $0x788] sm:$0xf]  ;;  %v9146_v1 = vld [vmem:[#allocation4 + $0x70c] sm:$0xf] }
 0x23c   :  { %v9629_v62 = vpop.eup %9628  ;;  %2726 = vmatpush.bf16.msra.mxu2 %v7060_v41  ;;  %v7204_v41 = vor.u32 %v9164_v19, %v7203_v34 }
 0x23d   :  { %v1799_v40 = vadd.f32 1.0, %v9629_v62  ;;  %v7187_v62 = vld [vmem:[#allocation4 + $0x768] sm:$0xf] }
 0x23f   :  { %9630 = vrcp.f32 %v1799_v40  ;;  %2753 = vmatpush.bf16.msrb.mxu0 %v6792_v37  ;;  %2762 = vmatpush.bf16.msrb.mxu1 %v6984_v23  ;;  %v6888_v37 = vor.u32 %v9082_v5, %v6885_v28  ;;  %v9160_v23 = vld [vmem:[#allocation4 + $0x774] sm:$0xf0]  ;;  %v7064_v40 = vor.u32 %v9126_v26, %v7061_v35  ;;  %v7339_v5 = vld [vmem:[#allocation4 + $0x8a0] sm:$0xf]  ;;  %v9199_v28 = vld [vmem:[#allocation4 + $0x8ac] sm:$0xf0] }
 0x240   :  { %2727 = vmatpush.bf16.msra.mxu2 %v7044_v17  ;;  %v7188_v61 = vor.u32 %v9160_v23, %v7187_v62  ;;  %v9122_v17 = vld [vmem:[#allocation4 + $0x64c] sm:$0xf]  ;;  %v7340_v21 = vor.u32 %v9199_v28, %v7339_v5  ;;  %v7307_v62 = vld [vmem:[#allocation4 + $0x860] sm:$0xf]  ;;  %v9191_v23 = vld [vmem:[#allocation4 + $0x86c] sm:$0xf0] }
 0x241   :  { %v7499_v26 = vld [vmem:[#allocation4 + $0x9e0] sm:$0xf]  ;;  %v7308_v35 = vor.u32 %v9191_v23, %v7307_v62  ;;  %v9215_v5 = vld [vmem:[#allocation4 + $0x92c] sm:$0xf0] }
 0x242   :  { %v7595_v28 = vld [vmem:[#allocation4 + $0xaa0] sm:$0xf] }
 0x243   :  { %2754 = vmatpush.bf16.msrb.mxu0 %v6776_v42  ;;  %2763 = vmatpush.bf16.msrb.mxu1 %v6968_v4  ;;  %v7045_v42 = vld [vmem:[#allocation4 + $0x658] sm:$0xf0] }
 0x244   :  { %2728 = vmatpush.bf16.msra.mxu2 %v7028_v33  ;;  %v7048_v4 = vor.u32 %v9122_v17, %v7045_v42  ;;  %v7032_v33 = vor.u32 %v9118_v39, %v7029_v44  ;;  %v7483_v17 = vld [vmem:[#allocation4 + $0x9c0] sm:$0xf]  ;;  %v9183_v39 = vld [vmem:[#allocation4 + $0x82c] sm:$0xf0] }
 0x245   :  { %v9631_v6 = vpop.eup %9630  ;;  %v7484_v44 = vor.u32 %v9235_v29, %v7483_v17 }
 0x246   :  { %v1807_v58 = vmul.f32 %v9631_v6, %v10550_v9  ;;  %v7236_v9 = vor.u32 %v9172_v45, %v7235_v60  ;;  %v7256_v6 = vor.u32 %v9174_v11, %v7253_v16  ;;  %v9158_v45 = vld [vmem:[#allocation4 + $0x76c] sm:$0xf]  ;;  %v7451_v11 = vld [vmem:[#allocation4 + $0x980] sm:$0xf] }
 0x247   :  { %2755 = vmatpush.bf16.msrb.mxu0 %v6760_v8  ;;  %2764 = vmatpush.bf16.msrb.mxu1 %v6952_v56  ;;  %v7139_v8 = vld [vmem:[#allocation4 + $0x708] sm:$0xf]  ;;  %v7013_v56 = vld [vmem:[#allocation4 + $0x618] sm:$0xf0]  ;;  %v7192_v57 = vor.u32 %v9158_v45, %v7189_v7  ;;  %v7627_v45 = vld [vmem:[#allocation4 + $0xae0] sm:$0xf] }
 0x248   :  { %v10556_v54 = vpack.c.bf16 %v1807_v58, %v1807_v58  ;;  %2729 = vmatpush.bf16.msra.mxu2 %v7012_v48  ;;  %v7140_v20 = vor.u32 %v9148_v38, %v7139_v8  ;;  %v9166_v58 = vld [vmem:[#allocation4 + $0x7ac] sm:$0xf]  ;;  %v7221_v48 = vld [vmem:[#allocation4 + $0x7b8] sm:$0xf0]  ;;  %v7276_v8 = vor.u32 %v9183_v39, %v7275_v50 }
 0x24a   :  { %2639 = vmatmul.bf16.vlgmr.msra.gmra.mxu3 %v10556_v54  ;;  %2756 = vmatmul.bf16.vlgmr.msrb.gmra.mxu0 %v10521_v52  ;;  %v6904_v52 = vor.u32 %v9086_v18, %v6901_v63 }
 0x24b   :  { %2735 = vmatpush.bf16.msra.mxu3 %v7252_v10  ;;  %2765 = vmatpush.bf16.msrb.mxu1 %v6936_v47  ;;  %v7224_v10 = vor.u32 %v9166_v58, %v7221_v48  ;;  %v9162_v47 = vld [vmem:[#allocation4 + $0x78c] sm:$0xf] }
 0x24c   :  { %2774 = vmatpush.bf16.msrb.mxu2 %v7128_v3  ;;  %v7205_v3 = vld [vmem:[#allocation4 + $0x798] sm:$0xf0] }
 0x24d   :  { %2730 = vmatmul.bf16.vlgmr.msra.gmra.mxu2 %v10544_v36  ;;  %v7208_v60 = vor.u32 %v9162_v47, %v7205_v3  ;;  %v7435_v3 = vld [vmem:[#allocation4 + $0x960] sm:$0xf] }
 0x24f   :  { %2736 = vmatpush.bf16.msra.mxu3 %v7236_v9  ;;  %2766 = vmatpush.bf16.msrb.mxu1 %v6920_v2  ;;  %v7176_v9 = vor.u32 %v9154_v30, %v7173_v59  ;;  %v9150_v2 = vld [vmem:[#allocation4 + $0x72c] sm:$0xf]  ;;  %v9201_v30 = vld [vmem:[#allocation4 + $0x8c4] sm:$0xf]  ;;  %v7357_v59 = vld [vmem:[#allocation4 + $0x8d0] sm:$0xf0] }
 0x250   :  { %2775 = vmatpush.bf16.msrb.mxu2 %v7112_v53  ;;  %v7157_v53 = vld [vmem:[#allocation4 + $0x738] sm:$0xf0] }
 0x251   :  { %v7160_v32 = vor.u32 %v9150_v2, %v7157_v53  ;;  %v7360_v53 = vor.u32 %v9201_v30, %v7357_v59  ;;  %v9229_v30 = vld [vmem:[#allocation4 + $0x9a4] sm:$0xf] }
 0x253   :  { %2737 = vmatpush.bf16.msra.mxu3 %v7220_v15  ;;  %2767 = vmatpush.bf16.msrb.mxu1 %v6904_v52  ;;  %v7372_v15 = vor.u32 %v9207_v12, %v7371_v55  ;;  %v7355_v52 = vld [vmem:[#allocation4 + $0x8c0] sm:$0xf]  ;;  %v9267_v12 = vld [vmem:[#allocation4 + $0xacc] sm:$0xf0] }
 0x254   :  { %2776 = vmatpush.bf16.msrb.mxu2 %v7096_v51  ;;  %v9203_v51 = vld [vmem:[#allocation4 + $0x8cc] sm:$0xf0] }
 0x255   :  { %3608 = vmatpush.bf16.msra.mxu0 %v7372_v15  ;;  %v7356_v19 = vor.u32 %v9203_v51, %v7355_v52  ;;  %v9197_v15 = vld [vmem:[#allocation4 + $0x8a4] sm:$0xf]  ;;  %v7341_v52 = vld [vmem:[#allocation4 + $0x8b0] sm:$0xf0] }
 0x257   :  { %2738 = vmatpush.bf16.msra.mxu3 %v7204_v41  ;;  %2768 = vmatpush.bf16.msrb.mxu1 %v6888_v37  ;;  %v9195_v41 = vld [vmem:[#allocation4 + $0x88c] sm:$0xf0] }
 0x258   :  { %2777 = vmatpush.bf16.msrb.mxu2 %v7080_v0  ;;  %v7324_v37 = vor.u32 %v9195_v41, %v7323_v13  ;;  %v9263_v13 = vld [vmem:[#allocation4 + $0xaac] sm:$0xf0]  ;;  %v9193_v41 = vld [vmem:[#allocation4 + $0x884] sm:$0xf] }
 0x259   :  { %3609 = vmatpush.bf16.msra.mxu0 %v7356_v19  ;;  %v7403_v19 = vld [vmem:[#allocation4 + $0x920] sm:$0xf]  ;;  %v7596_v23 = vor.u32 %v9263_v13, %v7595_v28 }
 0x25a   :  { %2691 = vmatmul.bf16.vlgmr.msrb.gmra.mxu3 %v10556_v54  ;;  %2769 = vmatmul.bf16.vlgmr.msrb.gmra.mxu1 %v10536_v25  ;;  %v7016_v25 = vor.u32 %v9114_v27, %v7013_v56  ;;  %v7259_v27 = vld [vmem:[#allocation4 + $0x800] sm:$0xf]  ;;  %v9179_v56 = vld [vmem:[#allocation4 + $0x80c] sm:$0xf0] }
 0x25b   :  { %2739 = vmatpush.bf16.msra.mxu3 %v7188_v61  ;;  %v9239_v61 = vld [vmem:[#allocation4 + $0x9ec] sm:$0xf0]  ;;  %v7260_v16 = vor.u32 %v9179_v56, %v7259_v27  ;;  %v7515_v13 = vld [vmem:[#allocation4 + $0xa00] sm:$0xf] }
 0x25c   :  { %2778 = vmatpush.bf16.msrb.mxu2 %v7064_v40  ;;  %v7500_v40 = vor.u32 %v9239_v61, %v7499_v26 }
 0x25d   :  { %3610 = vmatpush.bf16.msra.mxu0 %v7340_v21  ;;  %v7404_v21 = vor.u32 %v9215_v5, %v7403_v19 }
 0x25e   :  { %3621 = vmatpush.bf16.msra.mxu1 %v7500_v40  ;;  %v7387_v40 = vld [vmem:[#allocation4 + $0x900] sm:$0xf] }
 0x25f   :  { %2740 = vmatpush.bf16.msra.mxu3 %v7172_v24 }
 0x260   :  { %2779 = vmatpush.bf16.msrb.mxu2 %v7048_v4  ;;  %v7292_v4 = vor.u32 %v9187_v49, %v7291_v14  ;;  %v9211_v14 = vld [vmem:[#allocation4 + $0x90c] sm:$0xf0]  ;;  %v7579_v49 = vld [vmem:[#allocation4 + $0xa80] sm:$0xf] }
 0x261   :  { %3611 = vmatpush.bf16.msra.mxu0 %v7324_v37  ;;  %v7325_v37 = vld [vmem:[#allocation4 + $0x890] sm:$0xf0]  ;;  %v7388_v17 = vor.u32 %v9211_v14, %v7387_v40 }
 0x262   :  { %3622 = vmatpush.bf16.msra.mxu1 %v7484_v44  ;;  %v7328_v26 = vor.u32 %v9193_v41, %v7325_v37  ;;  %v9237_v44 = vld [vmem:[#allocation4 + $0x9e4] sm:$0xf]  ;;  %v9243_v41 = vld [vmem:[#allocation4 + $0xa0c] sm:$0xf0]  ;;  %v7437_v14 = vld [vmem:[#allocation4 + $0x970] sm:$0xf0] }
 0x263   :  { %2741 = vmatpush.bf16.msra.mxu3 %v7156_v31  ;;  %v7467_v31 = vld [vmem:[#allocation4 + $0x9a0] sm:$0xf]  ;;  %v7516_v37 = vor.u32 %v9243_v41, %v7515_v13  ;;  %v9253_v13 = vld [vmem:[#allocation4 + $0xa64] sm:$0xf]  ;;  %v7565_v41 = vld [vmem:[#allocation4 + $0xa70] sm:$0xf0] }
 0x264   :  { %2780 = vmatpush.bf16.msrb.mxu2 %v7032_v33  ;;  %v9231_v33 = vld [vmem:[#allocation4 + $0x9ac] sm:$0xf0] }
 0x265   :  { %3612 = vmatpush.bf16.msra.mxu0 %v7308_v35  ;;  %v7468_v38 = vor.u32 %v9231_v33, %v7467_v31  ;;  %v10582_v35 = vld [vmem:[#allocation6 + $0x4] sm:$0xf]  ;;  %v7501_v31 = vld [vmem:[#allocation4 + $0x9f0] sm:$0xf0] }
 0x266   :  { %v1944_v29 = vperm.slane %v10582_v35, 0  ;;  %v7504_v33 = vor.u32 %v9237_v44, %v7501_v31  ;;  %v1945_v19 = vperm.slane %v10582_v35, 1  ;;  %v9217_v44 = vld [vmem:[#allocation4 + $0x944] sm:$0xf]  ;;  %v7421_v31 = vld [vmem:[#allocation4 + $0x950] sm:$0xf0] }
 0x267   :  { %2742 = vmatpush.bf16.msra.mxu3 %v7140_v20  ;;  %3623 = vmatpush.bf16.msra.mxu1 %v7468_v38  ;;  %v9227_v20 = vld [vmem:[#allocation4 + $0x98c] sm:$0xf0] }
 0x268   :  { %2781 = vmatpush.bf16.msrb.mxu2 %v7016_v25  ;;  %v9205_v25 = vld [vmem:[#allocation4 + $0x8e4] sm:$0xf]  ;;  %v7452_v43 = vor.u32 %v9227_v20, %v7451_v11  ;;  %v9255_v38 = vld [vmem:[#allocation4 + $0xa6c] sm:$0xf0] }
 0x269   :  { %3613 = vmatpush.bf16.msra.mxu0 %v7292_v4  ;;  %v7309_v4 = vld [vmem:[#allocation4 + $0x870] sm:$0xf0]  ;;  %v9185_v11 = vld [vmem:[#allocation4 + $0x844] sm:$0xf] }
 0x26a   :  { %2743 = vmatmul.bf16.vlgmr.msra.gmra.mxu3 %v10556_v54  ;;  %v9233_v20 = vld [vmem:[#allocation4 + $0x9c4] sm:$0xf] }
 0x26b   :  { %2787 = vmatpush.bf16.msrb.mxu3 %v7256_v6  ;;  %2782 = vmatmul.bf16.vlgmr.msrb.gmra.mxu2 %v10544_v36  ;;  %v7141_v36 = vld [vmem:[#allocation4 + $0x718] sm:$0xf0]  ;;  %v7373_v6 = vld [vmem:[#allocation4 + $0x8f0] sm:$0xf0] }
 0x26c   :  { %v7144_v18 = vor.u32 %v9146_v1, %v7141_v36  ;;  %3624 = vmatpush.bf16.msra.mxu1 %v7452_v43  ;;  %v7419_v1 = vld [vmem:[#allocation4 + $0x940] sm:$0xf]  ;;  %v9219_v36 = vld [vmem:[#allocation4 + $0x94c] sm:$0xf0] }
 0x26d   :  { %3614 = vmatpush.bf16.msra.mxu0 %v7276_v8  ;;  %v7420_v55 = vor.u32 %v9219_v36, %v7419_v1  ;;  %v7563_v8 = vld [vmem:[#allocation4 + $0xa60] sm:$0xf]  ;;  %v9247_v36 = vld [vmem:[#allocation4 + $0xa2c] sm:$0xf0] }
 0x26e   :  { %v7564_v56 = vor.u32 %v9255_v38, %v7563_v8 }
 0x26f   :  { %2788 = vmatpush.bf16.msrb.mxu3 %v7240_v46  ;;  %v7376_v46 = vor.u32 %v9205_v25, %v7373_v6 }
 0x271   :  { %3615 = vmatpush.bf16.msra.mxu0 %v7260_v16  ;;  %v7293_v16 = vld [vmem:[#allocation4 + $0x850] sm:$0xf0] }
 0x272   :  { %v7296_v43 = vor.u32 %v9185_v11, %v7293_v16  ;;  %v7613_v11 = vld [vmem:[#allocation4 + $0xad0] sm:$0xf0] }
 0x273   :  { %2789 = vmatpush.bf16.msrb.mxu3 %v7224_v10 }
 0x275   :  { %3660 = vmatpush.bf16.msrb.mxu0 %v7376_v46  ;;  %v7485_v46 = vld [vmem:[#allocation4 + $0x9d0] sm:$0xf0] }
 0x277   :  { %2790 = vmatpush.bf16.msrb.mxu3 %v7208_v60  ;;  %v9223_v60 = vld [vmem:[#allocation4 + $0x96c] sm:$0xf0] }
 0x278   :  { %v7436_v7 = vor.u32 %v9223_v60, %v7435_v3  ;;  %v7547_v3 = vld [vmem:[#allocation4 + $0xa40] sm:$0xf]  ;;  %v9251_v60 = vld [vmem:[#allocation4 + $0xa4c] sm:$0xf0] }
 0x279   :  { %3661 = vmatpush.bf16.msrb.mxu0 %v7360_v53 }
 0x27a   :  { %3625 = vmatpush.bf16.msra.mxu1 %v7436_v7  ;;  %v9181_v7 = vld [vmem:[#allocation4 + $0x824] sm:$0xf] }
 0x27b   :  { %2791 = vmatpush.bf16.msrb.mxu3 %v7192_v57  ;;  %v9271_v57 = vld [vmem:[#allocation4 + $0xaec] sm:$0xf0] }
 0x27c   :  { %v7628_v2 = vor.u32 %v9271_v57, %v7627_v45  ;;  %v7548_v45 = vor.u32 %v9251_v60, %v7547_v3  ;;  %v7277_v57 = vld [vmem:[#allocation4 + $0x830] sm:$0xf0]  ;;  %v9213_v3 = vld [vmem:[#allocation4 + $0x924] sm:$0xf] }
 0x27d   :  { %v7405_v60 = vld [vmem:[#allocation4 + $0x930] sm:$0xf0] }
 0x27e   :  { %3634 = vmatpush.bf16.msra.mxu2 %v7628_v2  ;;  %3626 = vmatpush.bf16.msra.mxu1 %v7420_v55  ;;  %v7469_v2 = vld [vmem:[#allocation4 + $0x9b0] sm:$0xf0] }
 0x27f   :  { %2792 = vmatpush.bf16.msrb.mxu3 %v7176_v9  ;;  %v7472_v53 = vor.u32 %v9229_v30, %v7469_v2  ;;  %v9291_v2 = vld [vmem:[#allocation4 + $0xb8c] sm:$0xf0] }
 0x282   :  { %3627 = vmatpush.bf16.msra.mxu1 %v7404_v21 }
 0x283   :  { %2793 = vmatpush.bf16.msrb.mxu3 %v7160_v32 }
 0x286   :  { %3628 = vmatpush.bf16.msra.mxu1 %v7388_v17  ;;  %v7629_v17 = vld [vmem:[#allocation4 + $0xaf0] sm:$0xf0] }
 0x287   :  { %2794 = vmatpush.bf16.msrb.mxu3 %v7144_v18  ;;  %v10566_v63 = vpop.f32.mrf.mxu0  ;;  %v7611_v18 = vld [vmem:[#allocation4 + $0xac0] sm:$0xf] }
 0x288   :  { %v7612_v51 = vor.u32 %v9267_v12, %v7611_v18  ;;  %v2602_v25 = vadd.f32 %v10566_v63, %v1944_v29  ;;  %v9177_v12 = vld [vmem:[#allocation4 + $0x804] sm:$0xf]  ;;  %v7739_v29 = vld [vmem:[#allocation4 + $0xbc0] sm:$0xf] }
 0x28a   :  { %2795 = vmatmul.bf16.vlgmr.msrb.gmra.mxu3 %v10556_v54  ;;  %3635 = vmatpush.bf16.msra.mxu2 %v7612_v51 }
 0x28b   :  { %3673 = vmatpush.bf16.msrb.mxu1 %v7504_v33  ;;  %v9265_v33 = vld [vmem:[#allocation4 + $0xac4] sm:$0xf] }
 0x28e   :  { %3636 = vmatpush.bf16.msra.mxu2 %v7596_v23  ;;  %v7755_v23 = vld [vmem:[#allocation4 + $0xbe0] sm:$0xf] }
 0x28f   :  { %v2603_v34 = vpop.f32.mrf.mxu0 }
 0x290   :  { %v7344_v34 = vor.u32 %v9197_v15, %v7341_v52  ;;  %v7261_v15 = vld [vmem:[#allocation4 + $0x810] sm:$0xf0]  ;;  %v9225_v52 = vld [vmem:[#allocation4 + $0x984] sm:$0xf] }
 0x292   :  { %3662 = vmatpush.bf16.msrb.mxu0 %v7344_v34  ;;  %v7264_v34 = vor.u32 %v9177_v12, %v7261_v15  ;;  %v7581_v12 = vld [vmem:[#allocation4 + $0xa90] sm:$0xf0]  ;;  %v7379_v15 = vld [vmem:[#allocation4 + $0x8e8] sm:$0xf] }
 0x296   :  { %3663 = vmatpush.bf16.msrb.mxu0 %v7328_v26  ;;  %v9303_v26 = vld [vmem:[#allocation4 + $0xbec] sm:$0xf0] }
 0x297   :  { %v10568_v0 = vpop.f32.mrf.mxu1  ;;  %v10570_v54 = vpop.f32.mrf.mxu0  ;;  %v7756_v40 = vor.u32 %v9303_v26, %v7755_v23  ;;  %v7568_v26 = vor.u32 %v9253_v13, %v7565_v41  ;;  %v7299_v13 = vld [vmem:[#allocation4 + $0x848] sm:$0xf] }
 0x298   :  { %v2654_v8 = vadd.f32 %v10570_v54, %v1945_v19  ;;  %v9287_v19 = vld [vmem:[#allocation4 + $0xb6c] sm:$0xf0] }
 0x299   :  { %3647 = vmatpush.bf16.msra.mxu3 %v7756_v40 }
 0x29f   :  { %v2616_v42 = vpop.f32.mrf.mxu1  ;;  %v2655_v24 = vpop.f32.mrf.mxu0 }
 0x2a0   :  { %v9259_v42 = vld [vmem:[#allocation4 + $0xa8c] sm:$0xf0]  ;;  %v9189_v24 = vld [vmem:[#allocation4 + $0x864] sm:$0xf] }
 0x2a1   :  { %v7580_v50 = vor.u32 %v9259_v42, %v7579_v49  ;;  %v7312_v39 = vor.u32 %v9189_v24, %v7309_v4  ;;  %v9269_v49 = vld [vmem:[#allocation4 + $0xae4] sm:$0xf] }
 0x2a2   :  { %v7632_v4 = vor.u32 %v9269_v49, %v7629_v17  ;;  %v9204_v49 = vld [vmem:[#allocation4 + $0x8d4] sm:$0xf0] }
 0x2a3   :  { %3637 = vmatpush.bf16.msra.mxu2 %v7580_v50  ;;  %3664 = vmatpush.bf16.msrb.mxu0 %v7312_v39  ;;  %v9299_v50 = vld [vmem:[#allocation4 + $0xbcc] sm:$0xf0] }
 0x2a4   :  { %v7740_v39 = vor.u32 %v9299_v50, %v7739_v29  ;;  %v7549_v50 = vld [vmem:[#allocation4 + $0xa50] sm:$0xf0] }
 0x2a6   :  { %3648 = vmatpush.bf16.msra.mxu3 %v7740_v39 }
 0x2a7   :  { %v10572_v22 = vpop.f32.mrf.mxu1  ;;  %3638 = vmatpush.bf16.msra.mxu2 %v7564_v56  ;;  %3665 = vmatpush.bf16.msrb.mxu0 %v7296_v43  ;;  %v7424_v56 = vor.u32 %v9217_v44, %v7421_v31  ;;  %v7723_v43 = vld [vmem:[#allocation4 + $0xba0] sm:$0xf] }
 0x2a8   :  { %v7659_v44 = vld [vmem:[#allocation4 + $0xb20] sm:$0xf] }
 0x2a9   :  { %v10574_v58 = vpop.f32.mrf.mxu0 }
 0x2ab   :  { %3639 = vmatpush.bf16.msra.mxu2 %v7548_v45  ;;  %v7408_v45 = vor.u32 %v9213_v3, %v7405_v60 }
 0x2ad   :  { %v10576_v48 = vpop.f32.mrf.mxu2 }
 0x2af   :  { %v2668_v10 = vpop.f32.mrf.mxu1 }
 0x2b0   :  { %v7488_v10 = vor.u32 %v9233_v20, %v7485_v46  ;;  %v7616_v20 = vor.u32 %v9265_v33, %v7613_v11  ;;  %v9295_v46 = vld [vmem:[#allocation4 + $0xbac] sm:$0xf0] }
 0x2b1   :  { %v2707_v47 = vpop.f32.mrf.mxu0  ;;  %v9279_v33 = vld [vmem:[#allocation4 + $0xb2c] sm:$0xf0] }
 0x2b2   :  { %v2615_v47 = vadd.f32 %v10568_v0, %v2602_v25  ;;  %3674 = vmatpush.bf16.msrb.mxu1 %v7488_v10  ;;  %v7531_v0 = vld [vmem:[#allocation4 + $0xa20] sm:$0xf] }
 0x2b3   :  { %v7532_v55 = vor.u32 %v9247_v36, %v7531_v0  ;;  %v7389_v0 = vld [vmem:[#allocation4 + $0x910] sm:$0xf0]  ;;  %v9257_v36 = vld [vmem:[#allocation4 + $0xa84] sm:$0xf] }
 0x2b4   :  { %v2628_v59 = vadd.f32 %v10576_v48, %v2615_v47  ;;  %v7453_v48 = vld [vmem:[#allocation4 + $0x990] sm:$0xf0]  ;;  %v7724_v47 = vor.u32 %v9295_v46, %v7723_v43 }
 0x2b5   :  { %v2629_v9 = vpop.f32.mrf.mxu2  ;;  %v7456_v28 = vor.u32 %v9225_v52, %v7453_v48  ;;  %3640 = vmatpush.bf16.msra.mxu2 %v7532_v55  ;;  %v9208_v52 = vld [vmem:[#allocation4 + $0x8f4] sm:$0xf0]  ;;  %v7691_v48 = vld [vmem:[#allocation4 + $0xb60] sm:$0xf] }
 0x2b6   :  { %v7280_v9 = vor.u32 %v9181_v7, %v7277_v57  ;;  %3675 = vmatpush.bf16.msrb.mxu1 %v7472_v53  ;;  %v9261_v7 = vld [vmem:[#allocation4 + $0xaa4] sm:$0xf]  ;;  %v7597_v57 = vld [vmem:[#allocation4 + $0xab0] sm:$0xf0]  ;;  %3649 = vmatpush.bf16.msra.mxu3 %v7724_v47  ;;  %v7380_v40 = vor.u32 %v9208_v52, %v7379_v15  ;;  %v9275_v47 = vld [vmem:[#allocation4 + $0xb0c] sm:$0xf0] }
 0x2b7   :  { %v10578_v32 = vpop.f32.mrf.mxu1  ;;  %v9209_v53 = vld [vmem:[#allocation4 + $0x904] sm:$0xf] }
 0x2b8   :  { %3666 = vmatpush.bf16.msrb.mxu0 %v7280_v9  ;;  %v7392_v55 = vor.u32 %v9209_v53, %v7389_v0  ;;  %v9297_v52 = vld [vmem:[#allocation4 + $0xbc4] sm:$0xf] }
 0x2b9   :  { %3641 = vmatpush.bf16.msra.mxu2 %v7516_v37  ;;  %v1946_v37 = vperm.slane %v10582_v35, 2 }
 0x2ba   :  { %3676 = vmatpush.bf16.msrb.mxu1 %v7456_v28 }
 0x2bb   :  { %v2706_v39 = vadd.f32 %v10574_v58, %v1946_v37 }
 0x2bc   :  { %3667 = vmatpush.bf16.msrb.mxu0 %v7264_v34 }
 0x2bd   :  { %v10580_v62 = vpop.f32.mrf.mxu2  ;;  %3686 = vmatpush.bf16.msrb.mxu2 %v7632_v4  ;;  %v9249_v4 = vld [vmem:[#allocation4 + $0xa44] sm:$0xf] }
 0x2bf   :  { %v2720_v61 = vpop.f32.mrf.mxu1 }
 0x2c0   :  { %v9221_v61 = vld [vmem:[#allocation4 + $0x964] sm:$0xf] }
 0x2c1   :  { %v7440_v24 = vor.u32 %v9221_v61, %v7437_v14  ;;  %3687 = vmatpush.bf16.msrb.mxu2 %v7616_v20  ;;  %v7363_v14 = vld [vmem:[#allocation4 + $0x8c8] sm:$0xf] }
 0x2c2   :  { %v7364_v31 = vor.u32 %v9204_v49, %v7363_v14  ;;  %v7347_v20 = vld [vmem:[#allocation4 + $0x8a8] sm:$0xf]  ;;  %v7725_v14 = vld [vmem:[#allocation4 + $0xbb0] sm:$0xf0] }
 0x2c3   :  { %3677 = vmatpush.bf16.msrb.mxu1 %v7440_v24  ;;  %v9283_v24 = vld [vmem:[#allocation4 + $0xb4c] sm:$0xf0] }
 0x2c5   :  { %v2681_v6 = vpop.f32.mrf.mxu2 }
 0x2c6   :  { %v2667_v6 = vadd.f32 %v10572_v22, %v2654_v8  ;;  %v7707_v22 = vld [vmem:[#allocation4 + $0xb80] sm:$0xf]  ;;  %v9245_v8 = vld [vmem:[#allocation4 + $0xa24] sm:$0xf] }
 0x2c7   :  { %v10585_v27 = vpop.f32.mrf.mxu0  ;;  %3678 = vmatpush.bf16.msrb.mxu1 %v7424_v56  ;;  %v7533_v56 = vld [vmem:[#allocation4 + $0xa30] sm:$0xf0] }
 0x2c8   :  { %v2680_v54 = vadd.f32 %v10580_v62, %v2667_v6  ;;  %v7660_v6 = vor.u32 %v9279_v33, %v7659_v44  ;;  %v7536_v46 = vor.u32 %v9245_v8, %v7533_v56  ;;  %v9289_v44 = vld [vmem:[#allocation4 + $0xb84] sm:$0xf] }
 0x2cb   :  { %3679 = vmatpush.bf16.msrb.mxu1 %v7408_v45  ;;  %v7517_v45 = vld [vmem:[#allocation4 + $0xa10] sm:$0xf0] }
 0x2cd   :  { %v2640_v63 = vpop.f32.mrf.mxu3 }
 0x2ce   :  { %v10590_v1 = vadd.f32 %v2640_v63, %v2628_v59  ;;  %v7600_v59 = vor.u32 %v9261_v7, %v7597_v57  ;;  %v7708_v63 = vor.u32 %v9291_v2, %v7707_v22  ;;  %v9301_v7 = vld [vmem:[#allocation4 + $0xbe4] sm:$0xf]  ;;  %v7757_v2 = vld [vmem:[#allocation4 + $0xbf0] sm:$0xf0] }
 0x2cf   :  { %v2759_v18 = vpop.f32.mrf.mxu0  ;;  %3680 = vmatpush.bf16.msrb.mxu1 %v7392_v55  ;;  %v7507_v55 = vld [vmem:[#allocation4 + $0x9e8] sm:$0xf] }
 0x2d0   :  { %v2800_v51 = vsub.f32 0.0, %v10590_v1  ;;  %v10594_v5 = vpop.f32.mrf.mxu2  ;;  %3688 = vmatpush.bf16.msrb.mxu2 %v7600_v59  ;;  %3650 = vmatpush.bf16.msra.mxu3 %v7708_v63  ;;  %v9196_v59 = vld [vmem:[#allocation4 + $0x894] sm:$0xf0]  ;;  %v7760_v63 = vor.u32 %v9301_v7, %v7757_v2 }
 0x2d2   :  { %v2804_v21 = vmul.f32 1.442695, %v2800_v51  ;;  %v7584_v51 = vor.u32 %v9257_v36, %v7581_v12  ;;  %v7315_v36 = vld [vmem:[#allocation4 + $0x868] sm:$0xf]  ;;  %v9240_v12 = vld [vmem:[#allocation4 + $0x9f4] sm:$0xf0] }
 0x2d4   :  { %9632 = vpow2.f32 %v2804_v21  ;;  %3689 = vmatpush.bf16.msrb.mxu2 %v7584_v51  ;;  %v7692_v21 = vor.u32 %v9287_v19, %v7691_v48  ;;  %v7741_v51 = vld [vmem:[#allocation4 + $0xbd0] sm:$0xf0] }
 0x2d5   :  { %v2642_v42 = vpop.f32.mrf.mxu3  ;;  %v7744_v48 = vor.u32 %v9297_v52, %v7741_v51  ;;  %v9220_v51 = vld [vmem:[#allocation4 + $0x954] sm:$0xf0] }
 0x2d6   :  { %3651 = vmatpush.bf16.msra.mxu3 %v7692_v21  ;;  %v7675_v42 = vld [vmem:[#allocation4 + $0xb40] sm:$0xf]  ;;  %v7508_v21 = vor.u32 %v9240_v12, %v7507_v55  ;;  %v9277_v55 = vld [vmem:[#allocation4 + $0xb24] sm:$0xf] }
 0x2d7   :  { %v10597_v38 = vpop.f32.mrf.mxu1  ;;  %v7676_v29 = vor.u32 %v9283_v24, %v7675_v42  ;;  %v7283_v24 = vld [vmem:[#allocation4 + $0x828] sm:$0xf] }
 0x2d8   :  { %v2733_v16 = vpop.f32.mrf.mxu2  ;;  %3690 = vmatpush.bf16.msrb.mxu2 %v7568_v26  ;;  %v7491_v26 = vld [vmem:[#allocation4 + $0x9c8] sm:$0xf] }
 0x2d9   :  { %v2719_v16 = vadd.f32 %v10578_v32, %v2706_v39  ;;  %v9232_v39 = vld [vmem:[#allocation4 + $0x9b4] sm:$0xf0] }
 0x2da   :  { %v9633_v25 = vpop.eup %9632  ;;  %3652 = vmatpush.bf16.msra.mxu3 %v7676_v29  ;;  %v9184_v29 = vld [vmem:[#allocation4 + $0x834] sm:$0xf0] }
 0x2db   :  { %v2812_v10 = vadd.f32 1.0, %v9633_v25  ;;  %v9200_v25 = vld [vmem:[#allocation4 + $0x8b4] sm:$0xf0]  ;;  %v2732_v58 = vadd.f32 %v10594_v5, %v2719_v16  ;;  %v7284_v8 = vor.u32 %v9184_v29, %v7283_v24  ;;  %v7333_v29 = vld [vmem:[#allocation4 + $0x898] sm:$0xf0] }
 0x2dc   :  { %v7348_v60 = vor.u32 %v9200_v25, %v7347_v20  ;;  %v9180_v16 = vld [vmem:[#allocation4 + $0x814] sm:$0xf0]  ;;  %v7459_v20 = vld [vmem:[#allocation4 + $0x988] sm:$0xf] }
 0x2dd   :  { %9634 = vrcp.f32 %v2812_v10  ;;  %v2692_v30 = vpop.f32.mrf.mxu3  ;;  %v7643_v10 = vld [vmem:[#allocation4 + $0xb00] sm:$0xf]  ;;  %v9228_v25 = vld [vmem:[#allocation4 + $0x994] sm:$0xf0] }
 0x2de   :  { %v10601_v9 = vadd.f32 %v2692_v30, %v2680_v54  ;;  %v9241_v54 = vld [vmem:[#allocation4 + $0xa04] sm:$0xf]  ;;  %v7331_v30 = vld [vmem:[#allocation4 + $0x888] sm:$0xf]  ;;  %3653 = vmatpush.bf16.msra.mxu3 %v7660_v6  ;;  %v7644_v22 = vor.u32 %v9275_v47, %v7643_v10  ;;  %v9206_v6 = vld [vmem:[#allocation4 + $0x8ec] sm:$0xf] }
 0x2df   :  { %v2772_v62 = vpop.f32.mrf.mxu1  ;;  %v7520_v5 = vor.u32 %v9241_v54, %v7517_v45  ;;  %v7332_v0 = vor.u32 %v9196_v59, %v7331_v30  ;;  %v1947_v47 = vperm.slane %v10582_v35, 3  ;;  %v7443_v54 = vld [vmem:[#allocation4 + $0x968] sm:$0xf]  ;;  %v9224_v45 = vld [vmem:[#allocation4 + $0x974] sm:$0xf0] }
 0x2e0   :  { %v2801_v18 = vsub.f32 0.0, %v10601_v9  ;;  %v7635_v30 = vld [vmem:[#allocation4 + $0xae8] sm:$0xf]  ;;  %v9272_v59 = vld [vmem:[#allocation4 + $0xaf4] sm:$0xf0] }
 0x2e1   :  { %v2758_v35 = vadd.f32 %v10585_v27, %v1947_v47  ;;  %v9264_v24 = vld [vmem:[#allocation4 + $0xab4] sm:$0xf0]  ;;  %v7571_v47 = vld [vmem:[#allocation4 + $0xa68] sm:$0xf] }
 0x2e2   :  { %v2806_v34 = vmul.f32 1.442695, %v2801_v18  ;;  %v9192_v18 = vld [vmem:[#allocation4 + $0x874] sm:$0xf0]  ;;  %3654 = vmatpush.bf16.msra.mxu3 %v7644_v22  ;;  %v9202_v22 = vld [vmem:[#allocation4 + $0x8cc] sm:$0xf] }
 0x2e3   :  { %v9635_v28 = vpop.eup %9634 }
 0x2e4   :  { %v2820_v23 = vmul.f32 %v9635_v28, %v10590_v1  ;;  %9636 = vpow2.f32 %v2806_v34  ;;  %v7552_v1 = vor.u32 %v9249_v4, %v7549_v50  ;;  %v7316_v28 = vor.u32 %v9192_v18, %v7315_v36  ;;  %v7475_v50 = vld [vmem:[#allocation4 + $0x9a8] sm:$0xf] }
 0x2e5   :  { %v2694_v61 = vpop.f32.mrf.mxu3  ;;  %v7476_v56 = vor.u32 %v9232_v39, %v7475_v50  ;;  %v7444_v18 = vor.u32 %v9224_v45, %v7443_v54  ;;  %v9186_v54 = vld [vmem:[#allocation4 + $0x84c] sm:$0xf]  ;;  %v7301_v45 = vld [vmem:[#allocation4 + $0x858] sm:$0xf0] }
 0x2e6   :  { %v10606_v17 = vpack.c.bf16 %v2820_v23, %v2820_v23  ;;  %3691 = vmatpush.bf16.msrb.mxu2 %v7552_v1  ;;  %3699 = vmatpush.bf16.msrb.mxu3 %v7760_v63  ;;  %v9188_v23 = vld [vmem:[#allocation4 + $0x854] sm:$0xf0]  ;;  %v9281_v63 = vld [vmem:[#allocation4 + $0xb44] sm:$0xf] }
 0x2e7   :  { %v9236_v61 = vld [vmem:[#allocation4 + $0x9d4] sm:$0xf0]  ;;  %v7300_v49 = vor.u32 %v9188_v23, %v7299_v13  ;;  %v9273_v13 = vld [vmem:[#allocation4 + $0xb04] sm:$0xf] }
 0x2e8   :  { %3616 = vmatmul.bf16.vlgmr.msra.gmra.mxu0 %v10606_v17  ;;  %v7492_v42 = vor.u32 %v9236_v61, %v7491_v26 }
 0x2e9   :  { %3712 = vmatpush.bf16.msra.mxu0 %v7380_v40  ;;  %v9293_v40 = vld [vmem:[#allocation4 + $0xba4] sm:$0xf] }
 0x2ea   :  { %v9637_v11 = vpop.eup %9636  ;;  %3692 = vmatpush.bf16.msrb.mxu2 %v7536_v46  ;;  %3700 = vmatpush.bf16.msrb.mxu3 %v7744_v48  ;;  %v9285_v46 = vld [vmem:[#allocation4 + $0xb64] sm:$0xf]  ;;  %v7661_v48 = vld [vmem:[#allocation4 + $0xb30] sm:$0xf0] }
 0x2eb   :  { %v2813_v43 = vadd.f32 1.0, %v9637_v11  ;;  %v7267_v11 = vld [vmem:[#allocation4 + $0x808] sm:$0xf]  ;;  %v7664_v27 = vor.u32 %v9277_v55, %v7661_v48  ;;  %v9178_v48 = vld [vmem:[#allocation4 + $0x80c] sm:$0xf] }
 0x2ed   :  { %9638 = vrcp.f32 %v2813_v43  ;;  %3713 = vmatpush.bf16.msra.mxu0 %v7364_v31  ;;  %v2744_v3 = vpop.f32.mrf.mxu3  ;;  %v7709_v31 = vld [vmem:[#allocation4 + $0xb90] sm:$0xf0]  ;;  %v7381_v43 = vld [vmem:[#allocation4 + $0x8f8] sm:$0xf0] }
 0x2ee   :  { %v10612_v57 = vadd.f32 %v2744_v3, %v2732_v58  ;;  %v10614_v32 = vpop.f32.mrf.mxu2  ;;  %3693 = vmatpush.bf16.msrb.mxu2 %v7520_v5  ;;  %v7712_v33 = vor.u32 %v9289_v44, %v7709_v31  ;;  %v7693_v58 = vld [vmem:[#allocation4 + $0xb70] sm:$0xf0]  ;;  %v7268_v3 = vor.u32 %v9180_v16, %v7267_v11  ;;  %v7384_v7 = vor.u32 %v9206_v6, %v7381_v43  ;;  %v7365_v5 = vld [vmem:[#allocation4 + $0x8d8] sm:$0xf0]  ;;  %v9190_v16 = vld [vmem:[#allocation4 + $0x86c] sm:$0xf] }
 0x2ef   :  { %v7696_v10 = vor.u32 %v9285_v46, %v7693_v58  ;;  %v7368_v52 = vor.u32 %v9202_v22, %v7365_v5  ;;  %v7509_v6 = vld [vmem:[#allocation4 + $0x9f8] sm:$0xf0]  ;;  %v7304_v22 = vor.u32 %v9186_v54, %v7301_v45  ;;  %v9210_v54 = vld [vmem:[#allocation4 + $0x90c] sm:$0xf] }
 0x2f0   :  { %v2802_v53 = vsub.f32 0.0, %v10612_v57  ;;  %v7397_v45 = vld [vmem:[#allocation4 + $0x918] sm:$0xf0] }
 0x2f1   :  { %3714 = vmatpush.bf16.msra.mxu0 %v7348_v60  ;;  %v7460_v60 = vor.u32 %v9228_v25, %v7459_v20  ;;  %v7317_v20 = vld [vmem:[#allocation4 + $0x878] sm:$0xf0]  ;;  %v9238_v25 = vld [vmem:[#allocation4 + $0x9ec] sm:$0xf] }
 0x2f2   :  { %v2808_v62 = vmul.f32 1.442695, %v2802_v53  ;;  %v7677_v53 = vld [vmem:[#allocation4 + $0xb50] sm:$0xf0] }
 0x2f3   :  { %v9639_v15 = vpop.eup %9638  ;;  %v7680_v36 = vor.u32 %v9281_v63, %v7677_v53  ;;  %v9252_v53 = vld [vmem:[#allocation4 + $0xa54] sm:$0xf0] }
 0x2f4   :  { %v2821_v34 = vmul.f32 %v9639_v15, %v10601_v9  ;;  %9640 = vpow2.f32 %v2808_v62  ;;  %v7728_v9 = vor.u32 %v9293_v40, %v7725_v14  ;;  %v7427_v62 = vld [vmem:[#allocation4 + $0x948] sm:$0xf]  ;;  %v7636_v15 = vor.u32 %v9272_v59, %v7635_v30  ;;  %v7493_v30 = vld [vmem:[#allocation4 + $0x9d8] sm:$0xf0] }
 0x2f5   :  { %3715 = vmatpush.bf16.msra.mxu0 %v7332_v0  ;;  %v2746_v19 = vpop.f32.mrf.mxu3  ;;  %v7428_v26 = vor.u32 %v9220_v51, %v7427_v62  ;;  %v7411_v14 = vld [vmem:[#allocation4 + $0x928] sm:$0xf]  ;;  %v7477_v62 = vld [vmem:[#allocation4 + $0x9b8] sm:$0xf0] }
 0x2f6   :  { %v10618_v41 = vpack.c.bf16 %v2821_v34, %v2821_v34  ;;  %v2785_v37 = vpop.f32.mrf.mxu2  ;;  %3701 = vmatpush.bf16.msrb.mxu3 %v7728_v9  ;;  %v7619_v34 = vld [vmem:[#allocation4 + $0xac8] sm:$0xf]  ;;  %v2771_v19 = vadd.f32 %v10597_v38, %v2758_v35  ;;  %v9216_v9 = vld [vmem:[#allocation4 + $0x934] sm:$0xf0] }
 0x2f7   :  { %v7645_v37 = vld [vmem:[#allocation4 + $0xb10] sm:$0xf0]  ;;  %v7412_v39 = vor.u32 %v9216_v9, %v7411_v14  ;;  %v7445_v14 = vld [vmem:[#allocation4 + $0x978] sm:$0xf0]  ;;  %v9270_v9 = vld [vmem:[#allocation4 + $0xaec] sm:$0xf] }
 0x2f8   :  { %3629 = vmatmul.bf16.vlgmr.msra.gmra.mxu1 %v10618_v41  ;;  %3668 = vmatmul.bf16.vlgmr.msrb.gmra.mxu0 %v10606_v17  ;;  %v2784_v23 = vadd.f32 %v10614_v32, %v2771_v19  ;;  %v7648_v50 = vor.u32 %v9273_v13, %v7645_v37  ;;  %v7269_v19 = vld [vmem:[#allocation4 + $0x818] sm:$0xf0]  ;;  %v7523_v13 = vld [vmem:[#allocation4 + $0xa08] sm:$0xf]  ;;  %v9244_v37 = vld [vmem:[#allocation4 + $0xa14] sm:$0xf0] }
 0x2f9   :  { %3716 = vmatpush.bf16.msra.mxu0 %v7316_v28  ;;  %3725 = vmatpush.bf16.msra.mxu1 %v7508_v21  ;;  %v9268_v28 = vld [vmem:[#allocation4 + $0xad4] sm:$0xf0]  ;;  %v7349_v21 = vld [vmem:[#allocation4 + $0x8b8] sm:$0xf0] }
 0x2fa   :  { %v9641_v4 = vpop.eup %9640  ;;  %3702 = vmatpush.bf16.msrb.mxu3 %v7712_v33  ;;  %v7620_v38 = vor.u32 %v9268_v28, %v7619_v34  ;;  %v9212_v33 = vld [vmem:[#allocation4 + $0x914] sm:$0xf0]  ;;  %v9226_v28 = vld [vmem:[#allocation4 + $0x98c] sm:$0xf] }
 0x2fb   :  { %v2814_v1 = vadd.f32 1.0, %v9641_v4  ;;  %v9194_v4 = vld [vmem:[#allocation4 + $0x88c] sm:$0xf]  ;;  %v9248_v34 = vld [vmem:[#allocation4 + $0xa34] sm:$0xf0] }
 0x2fc   :  { %v7336_v31 = vor.u32 %v9194_v4, %v7333_v29  ;;  %v7524_v4 = vor.u32 %v9244_v37, %v7523_v13  ;;  %v9276_v13 = vld [vmem:[#allocation4 + $0xb14] sm:$0xf0]  ;;  %v9242_v37 = vld [vmem:[#allocation4 + $0xa0c] sm:$0xf] }
 0x2fd   :  { %9642 = vrcp.f32 %v2814_v1  ;;  %3717 = vmatpush.bf16.msra.mxu0 %v7300_v49  ;;  %3726 = vmatpush.bf16.msra.mxu1 %v7492_v42  ;;  %v7603_v49 = vld [vmem:[#allocation4 + $0xaa8] sm:$0xf] }
 0x2fe   :  { %3703 = vmatpush.bf16.msrb.mxu3 %v7696_v10  ;;  %v7395_v1 = vld [vmem:[#allocation4 + $0x908] sm:$0xf]  ;;  %v7604_v44 = vor.u32 %v9264_v24, %v7603_v49  ;;  %v7320_v10 = vor.u32 %v9190_v16, %v7317_v20  ;;  %v7637_v49 = vld [vmem:[#allocation4 + $0xaf8] sm:$0xf0] }
 0x2ff   :  { %v7396_v43 = vor.u32 %v9212_v33, %v7395_v1  ;;  %v7747_v1 = vld [vmem:[#allocation4 + $0xbc8] sm:$0xf]  ;;  %v7429_v33 = vld [vmem:[#allocation4 + $0x958] sm:$0xf0] }
 0x300   :  { %v7731_v20 = vld [vmem:[#allocation4 + $0xba8] sm:$0xf] }
 0x301   :  { %3718 = vmatpush.bf16.msra.mxu0 %v7284_v8  ;;  %3727 = vmatpush.bf16.msra.mxu1 %v7476_v56  ;;  %v7587_v8 = vld [vmem:[#allocation4 + $0xa88] sm:$0xf]  ;;  %v9260_v56 = vld [vmem:[#allocation4 + $0xa94] sm:$0xf0] }
 0x302   :  { %3704 = vmatpush.bf16.msrb.mxu3 %v7680_v36  ;;  %v7588_v58 = vor.u32 %v9260_v56, %v7587_v8  ;;  %v7285_v36 = vld [vmem:[#allocation4 + $0x838] sm:$0xf0]  ;;  %v9266_v8 = vld [vmem:[#allocation4 + $0xacc] sm:$0xf] }
 0x303   :  { %v9643_v2 = vpop.eup %9642  ;;  %v7621_v56 = vld [vmem:[#allocation4 + $0xad8] sm:$0xf0] }
 0x304   :  { %v2822_v0 = vmul.f32 %v9643_v2, %v10612_v57  ;;  %v9198_v57 = vld [vmem:[#allocation4 + $0x8ac] sm:$0xf]  ;;  %v7555_v2 = vld [vmem:[#allocation4 + $0xa48] sm:$0xf]  ;;  %v7624_v16 = vor.u32 %v9266_v8, %v7621_v56  ;;  %v7685_v56 = vld [vmem:[#allocation4 + $0xb58] sm:$0xf0] }
 0x305   :  { %3719 = vmatpush.bf16.msra.mxu0 %v7268_v3  ;;  %3728 = vmatpush.bf16.msra.mxu1 %v7460_v60  ;;  %v7352_v40 = vor.u32 %v9198_v57, %v7349_v21  ;;  %v7512_v3 = vor.u32 %v9238_v25, %v7509_v6  ;;  %v9256_v60 = vld [vmem:[#allocation4 + $0xa74] sm:$0xf0]  ;;  %v7556_v55 = vor.u32 %v9252_v53, %v7555_v2  ;;  %v7461_v57 = vld [vmem:[#allocation4 + $0x998] sm:$0xf0]  ;;  %v9214_v6 = vld [vmem:[#allocation4 + $0x92c] sm:$0xf] }
 0x306   :  { %v10625_v12 = vpack.c.bf16 %v2822_v0, %v2822_v0  ;;  %3705 = vmatpush.bf16.msrb.mxu3 %v7664_v27  ;;  %v7572_v59 = vor.u32 %v9256_v60, %v7571_v47  ;;  %v9182_v0 = vld [vmem:[#allocation4 + $0x82c] sm:$0xf]  ;;  %v7272_v27 = vor.u32 %v9178_v48, %v7269_v19  ;;  %v9296_v25 = vld [vmem:[#allocation4 + $0xbb4] sm:$0xf0] }
 0x307   :  { %v9292_v60 = vld [vmem:[#allocation4 + $0xb94] sm:$0xf0]  ;;  %v9254_v53 = vld [vmem:[#allocation4 + $0xa6c] sm:$0xf] }
 0x308   :  { %3642 = vmatmul.bf16.vlgmr.msra.gmra.mxu2 %v10625_v12  ;;  %3681 = vmatmul.bf16.vlgmr.msrb.gmra.mxu1 %v10618_v41  ;;  %v9280_v48 = vld [vmem:[#allocation4 + $0xb34] sm:$0xf0]  ;;  %v9246_v19 = vld [vmem:[#allocation4 + $0xa2c] sm:$0xf] }
 0x309   :  { %3764 = vmatpush.bf16.msrb.mxu0 %v7384_v7  ;;  %3729 = vmatpush.bf16.msra.mxu1 %v7444_v18  ;;  %v9234_v7 = vld [vmem:[#allocation4 + $0x9cc] sm:$0xf] }
 0x30a   :  { %3720 = vmatmul.bf16.vlgmr.msra.gmra.mxu0 %v10606_v17  ;;  %3738 = vmatpush.bf16.msra.mxu2 %v7636_v15  ;;  %v7496_v63 = vor.u32 %v9234_v7, %v7493_v30  ;;  %v9230_v18 = vld [vmem:[#allocation4 + $0x9ac] sm:$0xf]  ;;  %v7288_v15 = vor.u32 %v9182_v0, %v7285_v36  ;;  %v7589_v30 = vld [vmem:[#allocation4 + $0xa98] sm:$0xf0] }
 0x30b   :  { %3706 = vmatpush.bf16.msrb.mxu3 %v7648_v50  ;;  %v7480_v51 = vor.u32 %v9230_v18, %v7477_v62  ;;  %v9258_v7 = vld [vmem:[#allocation4 + $0xa8c] sm:$0xf]  ;;  %v7573_v0 = vld [vmem:[#allocation4 + $0xa78] sm:$0xf0]  ;;  %v7683_v18 = vld [vmem:[#allocation4 + $0xb48] sm:$0xf] }
 0x30c   :  { %v7592_v2 = vor.u32 %v9258_v7, %v7589_v30  ;;  %v9284_v62 = vld [vmem:[#allocation4 + $0xb54] sm:$0xf0]  ;;  %v9282_v8 = vld [vmem:[#allocation4 + $0xb4c] sm:$0xf]  ;;  %v7835_v30 = vld [vmem:[#allocation4 + $0xc80] sm:$0xf] }
 0x30d   :  { %v2796_v61 = vpop.f32.mrf.mxu3  ;;  %3765 = vmatpush.bf16.msrb.mxu0 %v7368_v52  ;;  %3730 = vmatpush.bf16.msra.mxu1 %v7428_v26  ;;  %v7539_v52 = vld [vmem:[#allocation4 + $0xa28] sm:$0xf] }
 0x30e   :  { %v10632_v42 = vadd.f32 %v2796_v61, %v2784_v23  ;;  %3739 = vmatpush.bf16.msra.mxu2 %v7620_v38  ;;  %v7540_v21 = vor.u32 %v9248_v34, %v7539_v52  ;;  %v7464_v23 = vor.u32 %v9226_v28, %v7461_v57  ;;  %v7763_v26 = vld [vmem:[#allocation4 + $0xbe8] sm:$0xf]  ;;  %v9304_v61 = vld [vmem:[#allocation4 + $0xbf4] sm:$0xf0]  ;;  %v9222_v38 = vld [vmem:[#allocation4 + $0x96c] sm:$0xf]  ;;  %v7684_v52 = vor.u32 %v9284_v62, %v7683_v18 }
 0x30f   :  { %v7764_v29 = vor.u32 %v9304_v61, %v7763_v26  ;;  %v7667_v34 = vld [vmem:[#allocation4 + $0xb28] sm:$0xf]  ;;  %v7541_v28 = vld [vmem:[#allocation4 + $0xa38] sm:$0xf0]  ;;  %v9302_v26 = vld [vmem:[#allocation4 + $0xbec] sm:$0xf] }
 0x310   :  { %v2803_v32 = vsub.f32 0.0, %v10632_v42  ;;  %v7668_v57 = vor.u32 %v9280_v48, %v7667_v34  ;;  %v7765_v61 = vld [vmem:[#allocation4 + $0xbf8] sm:$0xf0]  ;;  %v7803_v18 = vld [vmem:[#allocation4 + $0xc40] sm:$0xf] }
 0x311   :  { %3766 = vmatpush.bf16.msrb.mxu0 %v7352_v40  ;;  %3731 = vmatpush.bf16.msra.mxu1 %v7412_v39  ;;  %v7640_v39 = vor.u32 %v9270_v9, %v7637_v49  ;;  %v7749_v9 = vld [vmem:[#allocation4 + $0xbd8] sm:$0xf0]  ;;  %v9315_v62 = vld [vmem:[#allocation4 + $0xc4c] sm:$0xf0]  ;;  %v7787_v48 = vld [vmem:[#allocation4 + $0xc20] sm:$0xf] }
 0x312   :  { %v2810_v11 = vmul.f32 1.442695, %v2803_v32  ;;  %3740 = vmatpush.bf16.msra.mxu2 %v7604_v44  ;;  %v7448_v32 = vor.u32 %v9222_v38, %v7445_v14  ;;  %v9300_v44 = vld [vmem:[#allocation4 + $0xbd4] sm:$0xf0]  ;;  %v9298_v14 = vld [vmem:[#allocation4 + $0xbcc] sm:$0xf] }
 0x313   :  { %v7752_v49 = vor.u32 %v9298_v14, %v7749_v9  ;;  %v9363_v34 = vld [vmem:[#allocation4 + $0xdcc] sm:$0xf0] }
 0x314   :  { %9644 = vpow2.f32 %v2810_v11 }
 0x315   :  { %v2798_v46 = vpop.f32.mrf.mxu3  ;;  %3767 = vmatpush.bf16.msrb.mxu0 %v7336_v31  ;;  %3732 = vmatpush.bf16.msra.mxu1 %v7396_v43  ;;  %v9218_v31 = vld [vmem:[#allocation4 + $0x94c] sm:$0xf]  ;;  %v7413_v43 = vld [vmem:[#allocation4 + $0x938] sm:$0xf0] }
 0x316   :  { %3741 = vmatpush.bf16.msra.mxu2 %v7588_v58  ;;  %v7432_v11 = vor.u32 %v9218_v31, %v7429_v33  ;;  %v9262_v46 = vld [vmem:[#allocation4 + $0xaac] sm:$0xf]  ;;  %v7605_v58 = vld [vmem:[#allocation4 + $0xab8] sm:$0xf0] }
 0x317   :  { %v7608_v47 = vor.u32 %v9262_v46, %v7605_v58  ;;  %v7701_v31 = vld [vmem:[#allocation4 + $0xb78] sm:$0xf0]  ;;  %v7883_v46 = vld [vmem:[#allocation4 + $0xce0] sm:$0xf]  ;;  %v9335_v58 = vld [vmem:[#allocation4 + $0xcec] sm:$0xf0] }
 0x318   :  { %3694 = vmatmul.bf16.vlgmr.msrb.gmra.mxu2 %v10625_v12  ;;  %3733 = vmatmul.bf16.vlgmr.msra.gmra.mxu1 %v10618_v41 }
 0x319   :  { %3768 = vmatpush.bf16.msrb.mxu0 %v7320_v10  ;;  %3777 = vmatpush.bf16.msrb.mxu1 %v7512_v3  ;;  %v7732_v10 = vor.u32 %v9296_v25, %v7731_v20  ;;  %v7715_v3 = vld [vmem:[#allocation4 + $0xb88] sm:$0xf]  ;;  %v9274_v25 = vld [vmem:[#allocation4 + $0xb0c] sm:$0xf] }
 0x31a   :  { %v9645_v5 = vpop.eup %9644  ;;  %3742 = vmatpush.bf16.msra.mxu2 %v7572_v59  ;;  %v7716_v59 = vor.u32 %v9292_v60, %v7715_v3 }
 0x31b   :  { %v2815_v35 = vadd.f32 1.0, %v9645_v5  ;;  %v7699_v5 = vld [vmem:[#allocation4 + $0xb68] sm:$0xf] }
 0x31d   :  { %9646 = vrcp.f32 %v2815_v35  ;;  %3769 = vmatpush.bf16.msrb.mxu0 %v7304_v22  ;;  %3778 = vmatpush.bf16.msrb.mxu1 %v7496_v63  ;;  %v7400_v22 = vor.u32 %v9210_v54, %v7397_v45  ;;  %v9288_v63 = vld [vmem:[#allocation4 + $0xb74] sm:$0xf0]  ;;  %v7576_v35 = vor.u32 %v9254_v53, %v7573_v0  ;;  %v7851_v54 = vld [vmem:[#allocation4 + $0xca0] sm:$0xf]  ;;  %v9327_v45 = vld [vmem:[#allocation4 + $0xcac] sm:$0xf0] }
 0x31e   :  { %3743 = vmatpush.bf16.msra.mxu2 %v7556_v55  ;;  %v7700_v36 = vor.u32 %v9288_v63, %v7699_v5  ;;  %v9250_v55 = vld [vmem:[#allocation4 + $0xa4c] sm:$0xf]  ;;  %v7852_v7 = vor.u32 %v9327_v45, %v7851_v54  ;;  %v7819_v5 = vld [vmem:[#allocation4 + $0xc60] sm:$0xf]  ;;  %v9319_v63 = vld [vmem:[#allocation4 + $0xc6c] sm:$0xf0] }
 0x31f   :  { %v8011_v53 = vld [vmem:[#allocation4 + $0xde0] sm:$0xf]  ;;  %v7820_v0 = vor.u32 %v9319_v63, %v7819_v5  ;;  %v9343_v54 = vld [vmem:[#allocation4 + $0xd2c] sm:$0xf0] }
 0x320   :  { %v8107_v45 = vld [vmem:[#allocation4 + $0xea0] sm:$0xf] }
 0x321   :  { %3770 = vmatpush.bf16.msrb.mxu0 %v7288_v15  ;;  %3779 = vmatpush.bf16.msrb.mxu1 %v7480_v51  ;;  %v7557_v15 = vld [vmem:[#allocation4 + $0xa58] sm:$0xf0] }
 0x322   :  { %3744 = vmatpush.bf16.msra.mxu2 %v7540_v21  ;;  %v7560_v51 = vor.u32 %v9250_v55, %v7557_v15  ;;  %v7544_v21 = vor.u32 %v9246_v19, %v7541_v28  ;;  %v7995_v55 = vld [vmem:[#allocation4 + $0xdc0] sm:$0xf]  ;;  %v9311_v19 = vld [vmem:[#allocation4 + $0xc2c] sm:$0xf0] }
 0x323   :  { %v9647_v40 = vpop.eup %9646  ;;  %v7996_v28 = vor.u32 %v9363_v34, %v7995_v55 }
 0x324   :  { %v2823_v24 = vmul.f32 %v9647_v40, %v10632_v42  ;;  %v7748_v42 = vor.u32 %v9300_v44, %v7747_v1  ;;  %v7768_v40 = vor.u32 %v9302_v26, %v7765_v61  ;;  %v9286_v44 = vld [vmem:[#allocation4 + $0xb6c] sm:$0xf]  ;;  %v7963_v26 = vld [vmem:[#allocation4 + $0xd80] sm:$0xf] }
 0x325   :  { %3771 = vmatpush.bf16.msrb.mxu0 %v7272_v27  ;;  %3780 = vmatpush.bf16.msrb.mxu1 %v7464_v23  ;;  %v7651_v27 = vld [vmem:[#allocation4 + $0xb08] sm:$0xf]  ;;  %v7525_v23 = vld [vmem:[#allocation4 + $0xa18] sm:$0xf0]  ;;  %v7704_v33 = vor.u32 %v9286_v44, %v7701_v31  ;;  %v8139_v44 = vld [vmem:[#allocation4 + $0xee0] sm:$0xf] }
 0x326   :  { %v10638_v50 = vpack.c.bf16 %v2823_v24, %v2823_v24  ;;  %3745 = vmatpush.bf16.msra.mxu2 %v7524_v4  ;;  %v7652_v38 = vor.u32 %v9276_v13, %v7651_v27  ;;  %v9294_v24 = vld [vmem:[#allocation4 + $0xbac] sm:$0xf]  ;;  %v7733_v4 = vld [vmem:[#allocation4 + $0xbb8] sm:$0xf0]  ;;  %v7788_v27 = vor.u32 %v9311_v19, %v7787_v48  ;;  %v9365_v19 = vld [vmem:[#allocation4 + $0xde4] sm:$0xf] }
 0x328   :  { %3655 = vmatmul.bf16.vlgmr.msra.gmra.mxu3 %v10638_v50  ;;  %3772 = vmatmul.bf16.vlgmr.msrb.gmra.mxu0 %v10606_v17  ;;  %v7416_v17 = vor.u32 %v9214_v6, %v7413_v43 }
 0x329   :  { %3751 = vmatpush.bf16.msra.mxu3 %v7764_v29  ;;  %3781 = vmatpush.bf16.msrb.mxu1 %v7448_v32  ;;  %v7736_v29 = vor.u32 %v9294_v24, %v7733_v4  ;;  %v9290_v32 = vld [vmem:[#allocation4 + $0xb8c] sm:$0xf] }
 0x32a   :  { %3790 = vmatpush.bf16.msrb.mxu2 %v7640_v39  ;;  %v7717_v39 = vld [vmem:[#allocation4 + $0xb98] sm:$0xf0] }
 0x32b   :  { %3746 = vmatmul.bf16.vlgmr.msra.gmra.mxu2 %v10625_v12  ;;  %v7720_v1 = vor.u32 %v9290_v32, %v7717_v39  ;;  %v7947_v39 = vld [vmem:[#allocation4 + $0xd60] sm:$0xf] }
 0x32d   :  { %3752 = vmatpush.bf16.msra.mxu3 %v7748_v42  ;;  %3782 = vmatpush.bf16.msrb.mxu1 %v7432_v11  ;;  %v7688_v42 = vor.u32 %v9282_v8, %v7685_v56  ;;  %v9278_v11 = vld [vmem:[#allocation4 + $0xb2c] sm:$0xf]  ;;  %v9329_v8 = vld [vmem:[#allocation4 + $0xcc4] sm:$0xf]  ;;  %v7869_v56 = vld [vmem:[#allocation4 + $0xcd0] sm:$0xf0] }
 0x32e   :  { %3791 = vmatpush.bf16.msrb.mxu2 %v7624_v16  ;;  %v7669_v16 = vld [vmem:[#allocation4 + $0xb38] sm:$0xf0] }
 0x32f   :  { %v7672_v20 = vor.u32 %v9278_v11, %v7669_v16  ;;  %v7872_v11 = vor.u32 %v9329_v8, %v7869_v56  ;;  %v9357_v8 = vld [vmem:[#allocation4 + $0xda4] sm:$0xf] }
 0x331   :  { %3753 = vmatpush.bf16.msra.mxu3 %v7732_v10  ;;  %3783 = vmatpush.bf16.msrb.mxu1 %v7416_v17  ;;  %v7884_v10 = vor.u32 %v9335_v58, %v7883_v46  ;;  %v7867_v17 = vld [vmem:[#allocation4 + $0xcc0] sm:$0xf]  ;;  %v9395_v58 = vld [vmem:[#allocation4 + $0xecc] sm:$0xf0] }
 0x332   :  { %3792 = vmatpush.bf16.msrb.mxu2 %v7608_v47  ;;  %v9331_v47 = vld [vmem:[#allocation4 + $0xccc] sm:$0xf0] }
 0x333   :  { %4624 = vmatpush.bf16.msra.mxu0 %v7884_v10  ;;  %v7868_v60 = vor.u32 %v9331_v47, %v7867_v17  ;;  %v9325_v10 = vld [vmem:[#allocation4 + $0xca4] sm:$0xf]  ;;  %v7853_v17 = vld [vmem:[#allocation4 + $0xcb0] sm:$0xf0] }
 0x335   :  { %3754 = vmatpush.bf16.msra.mxu3 %v7716_v59  ;;  %3784 = vmatpush.bf16.msrb.mxu1 %v7400_v22  ;;  %v9323_v59 = vld [vmem:[#allocation4 + $0xc8c] sm:$0xf0] }
 0x336   :  { %3793 = vmatpush.bf16.msrb.mxu2 %v7592_v2  ;;  %v7836_v22 = vor.u32 %v9323_v59, %v7835_v30  ;;  %v9391_v30 = vld [vmem:[#allocation4 + $0xeac] sm:$0xf0]  ;;  %v9321_v59 = vld [vmem:[#allocation4 + $0xc84] sm:$0xf] }
 0x337   :  { %4625 = vmatpush.bf16.msra.mxu0 %v7868_v60  ;;  %v7915_v60 = vld [vmem:[#allocation4 + $0xd20] sm:$0xf]  ;;  %v8108_v5 = vor.u32 %v9391_v30, %v8107_v45 }
 0x338   :  { %3707 = vmatmul.bf16.vlgmr.msrb.gmra.mxu3 %v10638_v50  ;;  %3785 = vmatmul.bf16.vlgmr.msrb.gmra.mxu1 %v10618_v41  ;;  %v7528_v41 = vor.u32 %v9242_v37, %v7525_v23  ;;  %v7771_v37 = vld [vmem:[#allocation4 + $0xc00] sm:$0xf]  ;;  %v9307_v23 = vld [vmem:[#allocation4 + $0xc0c] sm:$0xf0] }
 0x339   :  { %3755 = vmatpush.bf16.msra.mxu3 %v7700_v36  ;;  %v9367_v36 = vld [vmem:[#allocation4 + $0xdec] sm:$0xf0]  ;;  %v7772_v61 = vor.u32 %v9307_v23, %v7771_v37  ;;  %v9313_v23 = vld [vmem:[#allocation4 + $0xc44] sm:$0xf]  ;;  %v8027_v45 = vld [vmem:[#allocation4 + $0xe00] sm:$0xf] }
 0x33a   :  { %3794 = vmatpush.bf16.msrb.mxu2 %v7576_v35  ;;  %v8012_v35 = vor.u32 %v9367_v36, %v8011_v53  ;;  %v10662_v53 = vld [vmem:[#allocation6 + $0x8] sm:$0xf]  ;;  %v7899_v36 = vld [vmem:[#allocation4 + $0xd00] sm:$0xf] }
 0x33b   :  { %4626 = vmatpush.bf16.msra.mxu0 %v7852_v7  ;;  %v7916_v7 = vor.u32 %v9343_v54, %v7915_v60  ;;  %v8267_v30 = vld [vmem:[#allocation4 + $0xfe0] sm:$0xf] }
 0x33c   :  { %4637 = vmatpush.bf16.msra.mxu1 %v8012_v35  ;;  %v9339_v35 = vld [vmem:[#allocation4 + $0xd0c] sm:$0xf0] }
 0x33d   :  { %3756 = vmatpush.bf16.msra.mxu3 %v7684_v52  ;;  %v7900_v55 = vor.u32 %v9339_v35, %v7899_v36  ;;  %v7949_v35 = vld [vmem:[#allocation4 + $0xd70] sm:$0xf0] }
 0x33e   :  { %3795 = vmatpush.bf16.msrb.mxu2 %v7560_v51  ;;  %v7804_v51 = vor.u32 %v9315_v62, %v7803_v18  ;;  %v8091_v18 = vld [vmem:[#allocation4 + $0xe80] sm:$0xf] }
 0x33f   :  { %4627 = vmatpush.bf16.msra.mxu0 %v7836_v22  ;;  %v7837_v22 = vld [vmem:[#allocation4 + $0xc90] sm:$0xf0] }
 0x340   :  { %4638 = vmatpush.bf16.msra.mxu1 %v7996_v28  ;;  %v7840_v63 = vor.u32 %v9321_v59, %v7837_v22  ;;  %v8013_v28 = vld [vmem:[#allocation4 + $0xdf0] sm:$0xf0] }
 0x341   :  { %3757 = vmatpush.bf16.msra.mxu3 %v7668_v57  ;;  %v7979_v57 = vld [vmem:[#allocation4 + $0xda0] sm:$0xf] }
 0x342   :  { %3796 = vmatpush.bf16.msrb.mxu2 %v7544_v21  ;;  %v9359_v21 = vld [vmem:[#allocation4 + $0xdac] sm:$0xf0] }
 0x343   :  { %4628 = vmatpush.bf16.msra.mxu0 %v7820_v0  ;;  %v7980_v13 = vor.u32 %v9359_v21, %v7979_v57  ;;  %v2960_v57 = vperm.slane %v10662_v53, 0  ;;  %v8016_v21 = vor.u32 %v9365_v19, %v8013_v28  ;;  %v9345_v28 = vld [vmem:[#allocation4 + $0xd44] sm:$0xf] }
 0x345   :  { %3758 = vmatpush.bf16.msra.mxu3 %v7652_v38  ;;  %4639 = vmatpush.bf16.msra.mxu1 %v7980_v13  ;;  %v9355_v38 = vld [vmem:[#allocation4 + $0xd8c] sm:$0xf0] }
 0x346   :  { %3797 = vmatpush.bf16.msrb.mxu2 %v7528_v41  ;;  %v9333_v41 = vld [vmem:[#allocation4 + $0xce4] sm:$0xf]  ;;  %v7964_v9 = vor.u32 %v9355_v38, %v7963_v26  ;;  %v9383_v13 = vld [vmem:[#allocation4 + $0xe6c] sm:$0xf0]  ;;  %v7805_v26 = vld [vmem:[#allocation4 + $0xc50] sm:$0xf0] }
 0x347   :  { %4629 = vmatpush.bf16.msra.mxu0 %v7804_v51  ;;  %v7821_v51 = vld [vmem:[#allocation4 + $0xc70] sm:$0xf0] }
 0x348   :  { %3759 = vmatmul.bf16.vlgmr.msra.gmra.mxu3 %v10638_v50 }
 0x349   :  { %3803 = vmatpush.bf16.msrb.mxu3 %v7768_v40  ;;  %3798 = vmatmul.bf16.vlgmr.msrb.gmra.mxu2 %v10625_v12  ;;  %v7653_v12 = vld [vmem:[#allocation4 + $0xb18] sm:$0xf0]  ;;  %v7885_v40 = vld [vmem:[#allocation4 + $0xcf0] sm:$0xf0] }
 0x34a   :  { %v7656_v6 = vor.u32 %v9274_v25, %v7653_v12  ;;  %4640 = vmatpush.bf16.msra.mxu1 %v7964_v9  ;;  %v9347_v25 = vld [vmem:[#allocation4 + $0xd4c] sm:$0xf0]  ;;  %v8123_v12 = vld [vmem:[#allocation4 + $0xec0] sm:$0xf] }
 0x34b   :  { %4630 = vmatpush.bf16.msra.mxu0 %v7788_v27  ;;  %v8124_v47 = vor.u32 %v9395_v58, %v8123_v12  ;;  %v8075_v27 = vld [vmem:[#allocation4 + $0xe60] sm:$0xf]  ;;  %v7773_v58 = vld [vmem:[#allocation4 + $0xc10] sm:$0xf0] }
 0x34c   :  { %v8076_v37 = vor.u32 %v9383_v13, %v8075_v27  ;;  %v8125_v13 = vld [vmem:[#allocation4 + $0xed0] sm:$0xf0] }
 0x34d   :  { %3804 = vmatpush.bf16.msrb.mxu3 %v7752_v49  ;;  %v7888_v49 = vor.u32 %v9333_v41, %v7885_v40  ;;  %v7808_v41 = vor.u32 %v9313_v23, %v7805_v26  ;;  %v7997_v40 = vld [vmem:[#allocation4 + $0xdd0] sm:$0xf0] }
 0x34f   :  { %4631 = vmatpush.bf16.msra.mxu0 %v7772_v61  ;;  %v9361_v61 = vld [vmem:[#allocation4 + $0xdc4] sm:$0xf] }
 0x351   :  { %3805 = vmatpush.bf16.msrb.mxu3 %v7736_v29 }
 0x353   :  { %4676 = vmatpush.bf16.msrb.mxu0 %v7888_v49 }
 0x355   :  { %3806 = vmatpush.bf16.msrb.mxu3 %v7720_v1  ;;  %v9351_v1 = vld [vmem:[#allocation4 + $0xd6c] sm:$0xf0] }
 0x356   :  { %v7948_v31 = vor.u32 %v9351_v1, %v7947_v39  ;;  %v9379_v39 = vld [vmem:[#allocation4 + $0xe4c] sm:$0xf0] }
 0x357   :  { %4677 = vmatpush.bf16.msrb.mxu0 %v7872_v11 }
 0x358   :  { %4641 = vmatpush.bf16.msra.mxu1 %v7948_v31  ;;  %v9309_v31 = vld [vmem:[#allocation4 + $0xc24] sm:$0xf] }
 0x359   :  { %3807 = vmatpush.bf16.msrb.mxu3 %v7704_v33  ;;  %v9399_v33 = vld [vmem:[#allocation4 + $0xeec] sm:$0xf0] }
 0x35d   :  { %3808 = vmatpush.bf16.msrb.mxu3 %v7688_v42  ;;  %v8140_v42 = vor.u32 %v9399_v33, %v8139_v44  ;;  %v7789_v33 = vld [vmem:[#allocation4 + $0xc30] sm:$0xf0] }
 0x35e   :  { %v7792_v56 = vor.u32 %v9309_v31, %v7789_v33  ;;  %v8109_v33 = vld [vmem:[#allocation4 + $0xeb0] sm:$0xf0] }
 0x35f   :  { %4650 = vmatpush.bf16.msra.mxu2 %v8140_v42  ;;  %v7981_v42 = vld [vmem:[#allocation4 + $0xdb0] sm:$0xf0] }
 0x361   :  { %3809 = vmatpush.bf16.msrb.mxu3 %v7672_v20  ;;  %v7931_v20 = vld [vmem:[#allocation4 + $0xd40] sm:$0xf] }
 0x362   :  { %v7932_v46 = vor.u32 %v9347_v25, %v7931_v20  ;;  %v9375_v25 = vld [vmem:[#allocation4 + $0xe2c] sm:$0xf0] }
 0x363   :  { %4651 = vmatpush.bf16.msra.mxu2 %v8124_v47 }
 0x364   :  { %4642 = vmatpush.bf16.msra.mxu1 %v7932_v46 }
 0x365   :  { %3810 = vmatpush.bf16.msrb.mxu3 %v7656_v6  ;;  %v10648_v43 = vpop.f32.mrf.mxu0 }
 0x366   :  { %v3618_v9 = vadd.f32 %v10648_v43, %v2960_v57  ;;  %v8043_v43 = vld [vmem:[#allocation4 + $0xe20] sm:$0xf]  ;;  %v7933_v57 = vld [vmem:[#allocation4 + $0xd50] sm:$0xf0] }
 0x367   :  { %4652 = vmatpush.bf16.msra.mxu2 %v8108_v5  ;;  %v8044_v46 = vor.u32 %v9375_v25, %v8043_v43  ;;  %v9431_v5 = vld [vmem:[#allocation4 + $0xfec] sm:$0xf0]  ;;  %v7936_v27 = vor.u32 %v9345_v28, %v7933_v57  ;;  %v7901_v43 = vld [vmem:[#allocation4 + $0xd10] sm:$0xf0]  ;;  %v9385_v25 = vld [vmem:[#allocation4 + $0xe84] sm:$0xf] }
 0x368   :  { %3811 = vmatmul.bf16.vlgmr.msrb.gmra.mxu3 %v10638_v50  ;;  %4643 = vmatpush.bf16.msra.mxu1 %v7916_v7  ;;  %v9371_v7 = vld [vmem:[#allocation4 + $0xe0c] sm:$0xf0]  ;;  %v8268_v36 = vor.u32 %v9431_v5, %v8267_v30  ;;  %v8077_v30 = vld [vmem:[#allocation4 + $0xe70] sm:$0xf0]  ;;  %v2962_v5 = vperm.slane %v10662_v53, 2 }
 0x369   :  { %v8028_v22 = vor.u32 %v9371_v7, %v8027_v45  ;;  %v9381_v7 = vld [vmem:[#allocation4 + $0xe64] sm:$0xf]  ;;  %v9407_v57 = vld [vmem:[#allocation4 + $0xf2c] sm:$0xf0] }
 0x36a   :  { %4663 = vmatpush.bf16.msra.mxu3 %v8268_v36 }
 0x36c   :  { %4644 = vmatpush.bf16.msra.mxu1 %v7900_v55  ;;  %v2961_v55 = vperm.slane %v10662_v53, 1 }
 0x36d   :  { %v3619_v3 = vpop.f32.mrf.mxu0 }
 0x36e   :  { %v7856_v3 = vor.u32 %v9325_v10, %v7853_v17  ;;  %v9353_v10 = vld [vmem:[#allocation4 + $0xd84] sm:$0xf] }
 0x370   :  { %4678 = vmatpush.bf16.msrb.mxu0 %v7856_v3  ;;  %4689 = vmatpush.bf16.msrb.mxu1 %v8016_v21  ;;  %v7965_v3 = vld [vmem:[#allocation4 + $0xd90] sm:$0xf0]  ;;  %v9393_v21 = vld [vmem:[#allocation4 + $0xec4] sm:$0xf] }
 0x371   :  { %v7968_v54 = vor.u32 %v9353_v10, %v7965_v3  ;;  %v8128_v26 = vor.u32 %v9393_v21, %v8125_v13  ;;  %v8203_v3 = vld [vmem:[#allocation4 + $0xf60] sm:$0xf]  ;;  %v9373_v21 = vld [vmem:[#allocation4 + $0xe24] sm:$0xf] }
 0x374   :  { %4679 = vmatpush.bf16.msrb.mxu0 %v7840_v63  ;;  %v9349_v63 = vld [vmem:[#allocation4 + $0xd64] sm:$0xf] }
 0x375   :  { %v10650_v2 = vpop.f32.mrf.mxu1  ;;  %v10652_v50 = vpop.f32.mrf.mxu0 }
 0x376   :  { %v3631_v1 = vadd.f32 %v10650_v2, %v3618_v9  ;;  %v9305_v2 = vld [vmem:[#allocation4 + $0xc04] sm:$0xf] }
 0x377   :  { %v7776_v47 = vor.u32 %v9305_v2, %v7773_v58  ;;  %v8093_v2 = vld [vmem:[#allocation4 + $0xe90] sm:$0xf0] }
 0x37d   :  { %v3632_v15 = vpop.f32.mrf.mxu1  ;;  %v3671_v52 = vpop.f32.mrf.mxu0 }
 0x37e   :  { %v9387_v15 = vld [vmem:[#allocation4 + $0xe8c] sm:$0xf0]  ;;  %v9317_v52 = vld [vmem:[#allocation4 + $0xc64] sm:$0xf] }
 0x37f   :  { %v8092_v34 = vor.u32 %v9387_v15, %v8091_v18  ;;  %v7824_v48 = vor.u32 %v9317_v52, %v7821_v51  ;;  %v9397_v18 = vld [vmem:[#allocation4 + $0xee4] sm:$0xf]  ;;  %v7952_v15 = vor.u32 %v9349_v63, %v7949_v35 }
 0x381   :  { %4653 = vmatpush.bf16.msra.mxu2 %v8092_v34  ;;  %4680 = vmatpush.bf16.msrb.mxu0 %v7824_v48  ;;  %v8251_v34 = vld [vmem:[#allocation4 + $0xfc0] sm:$0xf]  ;;  %v9427_v48 = vld [vmem:[#allocation4 + $0xfcc] sm:$0xf0] }
 0x382   :  { %v8252_v19 = vor.u32 %v9427_v48, %v8251_v34  ;;  %v9377_v34 = vld [vmem:[#allocation4 + $0xe44] sm:$0xf]  ;;  %v8061_v48 = vld [vmem:[#allocation4 + $0xe50] sm:$0xf0] }
 0x384   :  { %4664 = vmatpush.bf16.msra.mxu3 %v8252_v19  ;;  %v8064_v19 = vor.u32 %v9377_v34, %v8061_v48  ;;  %v7987_v34 = vld [vmem:[#allocation4 + $0xda8] sm:$0xf] }
 0x385   :  { %v10654_v14 = vpop.f32.mrf.mxu1  ;;  %4654 = vmatpush.bf16.msra.mxu2 %v8076_v37  ;;  %4681 = vmatpush.bf16.msrb.mxu0 %v7808_v41  ;;  %v3670_v37 = vadd.f32 %v10652_v50, %v2961_v55  ;;  %v8235_v41 = vld [vmem:[#allocation4 + $0xfa0] sm:$0xf]  ;;  %v9411_v55 = vld [vmem:[#allocation4 + $0xf4c] sm:$0xf0] }
 0x387   :  { %v10656_v24 = vpop.f32.mrf.mxu0 }
 0x388   :  { %v3722_v28 = vadd.f32 %v10656_v24, %v2962_v5 }
 0x389   :  { %4682 = vmatpush.bf16.msrb.mxu0 %v7792_v56 }
 0x38b   :  { %v10658_v4 = vpop.f32.mrf.mxu2 }
 0x38c   :  { %v3644_v11 = vadd.f32 %v10658_v4, %v3631_v1  ;;  %v9389_v1 = vld [vmem:[#allocation4 + $0xea4] sm:$0xf] }
 0x38d   :  { %v3684_v29 = vpop.f32.mrf.mxu1  ;;  %4683 = vmatpush.bf16.msrb.mxu0 %v7776_v47  ;;  %v9336_v47 = vld [vmem:[#allocation4 + $0xcf4] sm:$0xf0] }
 0x38e   :  { %v8000_v29 = vor.u32 %v9361_v61, %v7997_v40  ;;  %v9423_v40 = vld [vmem:[#allocation4 + $0xfac] sm:$0xf0] }
 0x38f   :  { %v3723_v32 = vpop.f32.mrf.mxu0 }
 0x390   :  { %v8059_v32 = vld [vmem:[#allocation4 + $0xe40] sm:$0xf]  ;;  %4690 = vmatpush.bf16.msrb.mxu1 %v8000_v29  ;;  %v8236_v29 = vor.u32 %v9423_v40, %v8235_v41  ;;  %v7859_v41 = vld [vmem:[#allocation4 + $0xca8] sm:$0xf]  ;;  %v9328_v40 = vld [vmem:[#allocation4 + $0xcb4] sm:$0xf0] }
 0x391   :  { %v8060_v44 = vor.u32 %v9379_v39, %v8059_v32  ;;  %v9341_v32 = vld [vmem:[#allocation4 + $0xd24] sm:$0xf]  ;;  %v7917_v39 = vld [vmem:[#allocation4 + $0xd30] sm:$0xf0] }
 0x392   :  { %v7920_v31 = vor.u32 %v9341_v32, %v7917_v39  ;;  %4665 = vmatpush.bf16.msra.mxu3 %v8236_v29  ;;  %v8155_v29 = vld [vmem:[#allocation4 + $0xf00] sm:$0xf]  ;;  %v9403_v32 = vld [vmem:[#allocation4 + $0xf0c] sm:$0xf0]  ;;  %v9369_v39 = vld [vmem:[#allocation4 + $0xe04] sm:$0xf] }
 0x393   :  { %v3645_v16 = vpop.f32.mrf.mxu2  ;;  %4655 = vmatpush.bf16.msra.mxu2 %v8060_v44 }
 0x394   :  { %v7984_v16 = vor.u32 %v9357_v8, %v7981_v42  ;;  %v8112_v8 = vor.u32 %v9389_v1, %v8109_v33  ;;  %v8219_v42 = vld [vmem:[#allocation4 + $0xf80] sm:$0xf]  ;;  %v8029_v1 = vld [vmem:[#allocation4 + $0xe10] sm:$0xf0]  ;;  %v8156_v33 = vor.u32 %v9403_v32, %v8155_v29  ;;  %v7893_v29 = vld [vmem:[#allocation4 + $0xcf8] sm:$0xf0] }
 0x395   :  { %v10660_v6 = vpop.f32.mrf.mxu1  ;;  %v2963_v32 = vperm.slane %v10662_v53, 3 }
 0x396   :  { %4691 = vmatpush.bf16.msrb.mxu1 %v7984_v16 }
 0x397   :  { %4656 = vmatpush.bf16.msra.mxu2 %v8044_v46 }
 0x39a   :  { %4692 = vmatpush.bf16.msrb.mxu1 %v7968_v54 }
 0x39b   :  { %v10664_v0 = vpop.f32.mrf.mxu2  ;;  %4657 = vmatpush.bf16.msra.mxu2 %v8028_v22  ;;  %v8080_v22 = vor.u32 %v9381_v7, %v8077_v30  ;;  %v7811_v30 = vld [vmem:[#allocation4 + $0xc48] sm:$0xf] }
 0x39d   :  { %v3736_v62 = vpop.f32.mrf.mxu1 }
 0x39e   :  { %v8141_v62 = vld [vmem:[#allocation4 + $0xef0] sm:$0xf0]  ;;  %4693 = vmatpush.bf16.msrb.mxu1 %v7952_v15 }
 0x39f   :  { %v8144_v52 = vor.u32 %v9397_v18, %v8141_v62  ;;  %v7875_v18 = vld [vmem:[#allocation4 + $0xcc8] sm:$0xf]  ;;  %v8187_v62 = vld [vmem:[#allocation4 + $0xf40] sm:$0xf] }
 0x3a1   :  { %4702 = vmatpush.bf16.msrb.mxu2 %v8144_v52  ;;  %v9332_v52 = vld [vmem:[#allocation4 + $0xcd4] sm:$0xf0] }
 0x3a2   :  { %4694 = vmatpush.bf16.msrb.mxu1 %v7936_v27  ;;  %v7876_v27 = vor.u32 %v9332_v52, %v7875_v18  ;;  %v8237_v18 = vld [vmem:[#allocation4 + $0xfb0] sm:$0xf0]  ;;  %v7795_v52 = vld [vmem:[#allocation4 + $0xc28] sm:$0xf] }
 0x3a3   :  { %v3697_v49 = vpop.f32.mrf.mxu2 }
 0x3a4   :  { %v3683_v49 = vadd.f32 %v10654_v14, %v3670_v37  ;;  %v8045_v37 = vld [vmem:[#allocation4 + $0xe30] sm:$0xf0] }
 0x3a5   :  { %v10667_v38 = vpop.f32.mrf.mxu0  ;;  %4703 = vmatpush.bf16.msrb.mxu2 %v8128_v26 }
 0x3a6   :  { %v3696_v50 = vadd.f32 %v10664_v0, %v3683_v49  ;;  %4695 = vmatpush.bf16.msrb.mxu1 %v7920_v31  ;;  %v7891_v0 = vld [vmem:[#allocation4 + $0xce8] sm:$0xf]  ;;  %v7860_v31 = vor.u32 %v9328_v40, %v7859_v41  ;;  %v9356_v41 = vld [vmem:[#allocation4 + $0xd94] sm:$0xf0]  ;;  %v9413_v40 = vld [vmem:[#allocation4 + $0xf64] sm:$0xf]  ;;  %v3774_v53 = vadd.f32 %v10667_v38, %v2963_v32 }
 0x3a7   :  { %v7892_v35 = vor.u32 %v9336_v47, %v7891_v0  ;;  %v9425_v0 = vld [vmem:[#allocation4 + $0xfc4] sm:$0xf]  ;;  %v8083_v32 = vld [vmem:[#allocation4 + $0xe68] sm:$0xf] }
 0x3a9   :  { %4704 = vmatpush.bf16.msrb.mxu2 %v8112_v8  ;;  %v8269_v8 = vld [vmem:[#allocation4 + $0xff0] sm:$0xf0] }
 0x3ab   :  { %v3656_v20 = vpop.f32.mrf.mxu3 }
 0x3ac   :  { %v10672_v12 = vadd.f32 %v3656_v20, %v3644_v11  ;;  %v9419_v11 = vld [vmem:[#allocation4 + $0xf8c] sm:$0xf0]  ;;  %v9337_v20 = vld [vmem:[#allocation4 + $0xd04] sm:$0xf] }
 0x3ad   :  { %v3775_v17 = vpop.f32.mrf.mxu0  ;;  %v8220_v14 = vor.u32 %v9419_v11, %v8219_v42  ;;  %v7904_v46 = vor.u32 %v9337_v20, %v7901_v43  ;;  %v7843_v42 = vld [vmem:[#allocation4 + $0xc88] sm:$0xf]  ;;  %v9324_v11 = vld [vmem:[#allocation4 + $0xc94] sm:$0xf0] }
 0x3ae   :  { %v3816_v60 = vsub.f32 0.0, %v10672_v12  ;;  %v10675_v4 = vpop.f32.mrf.mxu2  ;;  %v8096_v17 = vor.u32 %v9385_v25, %v8093_v2  ;;  %v7827_v43 = vld [vmem:[#allocation4 + $0xc68] sm:$0xf]  ;;  %v7844_v25 = vor.u32 %v9324_v11, %v7843_v42  ;;  %v8189_v42 = vld [vmem:[#allocation4 + $0xf50] sm:$0xf0] }
 0x3af   :  { %4666 = vmatpush.bf16.msra.mxu3 %v8220_v14  ;;  %4696 = vmatpush.bf16.msrb.mxu1 %v7904_v46  ;;  %v8032_v14 = vor.u32 %v9369_v39, %v8029_v1  ;;  %v9320_v46 = vld [vmem:[#allocation4 + $0xc74] sm:$0xf0]  ;;  %v8019_v2 = vld [vmem:[#allocation4 + $0xde8] sm:$0xf] }
 0x3b0   :  { %v3820_v59 = vmul.f32 1.442695, %v3816_v60  ;;  %v9415_v60 = vld [vmem:[#allocation4 + $0xf6c] sm:$0xf0]  ;;  %4705 = vmatpush.bf16.msrb.mxu2 %v8096_v17  ;;  %v8253_v17 = vld [vmem:[#allocation4 + $0xfd0] sm:$0xf0] }
 0x3b1   :  { %v8204_v45 = vor.u32 %v9415_v60, %v8203_v3  ;;  %v8256_v3 = vor.u32 %v9425_v0, %v8253_v17 }
 0x3b2   :  { %9648 = vpow2.f32 %v3820_v59 }
 0x3b3   :  { %v3658_v51 = vpop.f32.mrf.mxu3  ;;  %4667 = vmatpush.bf16.msra.mxu3 %v8204_v45  ;;  %v7828_v45 = vor.u32 %v9320_v46, %v7827_v43 }
 0x3b4   :  { %4706 = vmatpush.bf16.msrb.mxu2 %v8080_v22  ;;  %v8188_v51 = vor.u32 %v9411_v55, %v8187_v62  ;;  %v8003_v22 = vld [vmem:[#allocation4 + $0xdc8] sm:$0xf] }
 0x3b5   :  { %v10679_v23 = vpop.f32.mrf.mxu1 }
 0x3b6   :  { %v3749_v61 = vpop.f32.mrf.mxu2 }
 0x3b7   :  { %4668 = vmatpush.bf16.msra.mxu3 %v8188_v51  ;;  %v3735_v61 = vadd.f32 %v10660_v6, %v3722_v28  ;;  %v9312_v51 = vld [vmem:[#allocation4 + $0xc34] sm:$0xf0]  ;;  %v9417_v28 = vld [vmem:[#allocation4 + $0xf84] sm:$0xf] }
 0x3b8   :  { %v9649_v9 = vpop.eup %9648  ;;  %4707 = vmatpush.bf16.msrb.mxu2 %v8064_v19  ;;  %v9360_v19 = vld [vmem:[#allocation4 + $0xdb4] sm:$0xf0] }
 0x3b9   :  { %v3828_v44 = vadd.f32 1.0, %v9649_v9  ;;  %v8048_v9 = vor.u32 %v9373_v21, %v8045_v37  ;;  %v3748_v24 = vadd.f32 %v10675_v4, %v3735_v61  ;;  %v7779_v37 = vld [vmem:[#allocation4 + $0xc08] sm:$0xf] }
 0x3ba   :  { %v7971_v61 = vld [vmem:[#allocation4 + $0xd88] sm:$0xf] }
 0x3bb   :  { %9650 = vrcp.f32 %v3828_v44  ;;  %v3708_v56 = vpop.f32.mrf.mxu3  ;;  %v7972_v1 = vor.u32 %v9356_v41, %v7971_v61  ;;  %v7829_v61 = vld [vmem:[#allocation4 + $0xc78] sm:$0xf0]  ;;  %v9366_v41 = vld [vmem:[#allocation4 + $0xdec] sm:$0xf] }
 0x3bc   :  { %v10683_v16 = vadd.f32 %v3708_v56, %v3696_v50  ;;  %v9429_v50 = vld [vmem:[#allocation4 + $0xfe4] sm:$0xf]  ;;  %4708 = vmatpush.bf16.msrb.mxu2 %v8048_v9  ;;  %v8205_v9 = vld [vmem:[#allocation4 + $0xf70] sm:$0xf0] }
 0x3bd   :  { %v3788_v10 = vpop.f32.mrf.mxu1  ;;  %v8272_v4 = vor.u32 %v9429_v50, %v8269_v8  ;;  %v8147_v50 = vld [vmem:[#allocation4 + $0xee8] sm:$0xf]  ;;  %v9409_v8 = vld [vmem:[#allocation4 + $0xf44] sm:$0xf] }
 0x3be   :  { %v3817_v58 = vsub.f32 0.0, %v10683_v16  ;;  %v8192_v43 = vor.u32 %v9409_v8, %v8189_v42 }
 0x3c0   :  { %v3822_v54 = vmul.f32 1.442695, %v3817_v58  ;;  %v9368_v58 = vld [vmem:[#allocation4 + $0xdf4] sm:$0xf0]  ;;  %4709 = vmatpush.bf16.msrb.mxu2 %v8032_v14 }
 0x3c1   :  { %v9651_v59 = vpop.eup %9650  ;;  %v8020_v7 = vor.u32 %v9368_v58, %v8019_v2  ;;  %v9400_v14 = vld [vmem:[#allocation4 + $0xef4] sm:$0xf0]  ;;  %v9405_v2 = vld [vmem:[#allocation4 + $0xf24] sm:$0xf]  ;;  %v8173_v58 = vld [vmem:[#allocation4 + $0xf30] sm:$0xf0] }
 0x3c2   :  { %v3836_v63 = vmul.f32 %v9651_v59, %v10672_v12  ;;  %9652 = vpow2.f32 %v3822_v54  ;;  %v8171_v12 = vld [vmem:[#allocation4 + $0xf20] sm:$0xf]  ;;  %v9316_v59 = vld [vmem:[#allocation4 + $0xc54] sm:$0xf0]  ;;  %v8148_v0 = vor.u32 %v9400_v14, %v8147_v50  ;;  %v8176_v38 = vor.u32 %v9405_v2, %v8173_v58  ;;  %v8005_v50 = vld [vmem:[#allocation4 + $0xdd8] sm:$0xf0] }
 0x3c3   :  { %v3710_v36 = vpop.f32.mrf.mxu3  ;;  %v8172_v13 = vor.u32 %v9407_v57, %v8171_v12  ;;  %v8221_v12 = vld [vmem:[#allocation4 + $0xf90] sm:$0xf0]  ;;  %v7989_v2 = vld [vmem:[#allocation4 + $0xdb8] sm:$0xf0] }
 0x3c4   :  { %v10688_v15 = vpack.c.bf16 %v3836_v63, %v3836_v63  ;;  %v9364_v36 = vld [vmem:[#allocation4 + $0xdd4] sm:$0xf0]  ;;  %v8224_v21 = vor.u32 %v9417_v28, %v8221_v12  ;;  %v7907_v28 = vld [vmem:[#allocation4 + $0xd08] sm:$0xf] }
 0x3c5   :  { %4669 = vmatpush.bf16.msra.mxu3 %v8172_v13  ;;  %v8004_v55 = vor.u32 %v9364_v36, %v8003_v22  ;;  %v7988_v13 = vor.u32 %v9360_v19, %v7987_v34  ;;  %v7845_v34 = vld [vmem:[#allocation4 + $0xc98] sm:$0xf0] }
 0x3c6   :  { %4632 = vmatmul.bf16.vlgmr.msra.gmra.mxu0 %v10688_v15 }
 0x3c7   :  { %4728 = vmatpush.bf16.msra.mxu0 %v7892_v35  ;;  %v9421_v35 = vld [vmem:[#allocation4 + $0xfa4] sm:$0xf] }
 0x3c8   :  { %v9653_v26 = vpop.eup %9652  ;;  %v8240_v62 = vor.u32 %v9421_v35, %v8237_v18  ;;  %v7923_v18 = vld [vmem:[#allocation4 + $0xd28] sm:$0xf] }
 0x3c9   :  { %v3829_v49 = vadd.f32 1.0, %v9653_v26  ;;  %4670 = vmatpush.bf16.msra.mxu3 %v8156_v33  ;;  %v9308_v26 = vld [vmem:[#allocation4 + $0xc14] sm:$0xf0] }
 0x3ca   :  { %v7780_v39 = vor.u32 %v9308_v26, %v7779_v37  ;;  %v9318_v26 = vld [vmem:[#allocation4 + $0xc6c] sm:$0xf] }
 0x3cb   :  { %9654 = vrcp.f32 %v3829_v49  ;;  %4729 = vmatpush.bf16.msra.mxu0 %v7876_v27  ;;  %v3760_v44 = vpop.f32.mrf.mxu3  ;;  %v7796_v27 = vor.u32 %v9312_v51, %v7795_v52  ;;  %v9334_v49 = vld [vmem:[#allocation4 + $0xcec] sm:$0xf]  ;;  %v9392_v52 = vld [vmem:[#allocation4 + $0xeb4] sm:$0xf0] }
 0x3cc   :  { %v10694_v6 = vadd.f32 %v3760_v44, %v3748_v24  ;;  %v10696_v56 = vpop.f32.mrf.mxu2  ;;  %v8208_v24 = vor.u32 %v9413_v40, %v8205_v9  ;;  %v7955_v44 = vld [vmem:[#allocation4 + $0xd68] sm:$0xf]  ;;  %v7896_v33 = vor.u32 %v9334_v49, %v7893_v29  ;;  %v9322_v51 = vld [vmem:[#allocation4 + $0xc8c] sm:$0xf]  ;;  %v8021_v40 = vld [vmem:[#allocation4 + $0xdf8] sm:$0xf0] }
 0x3cd   :  { %4715 = vmatpush.bf16.msrb.mxu3 %v8272_v4  ;;  %v9330_v4 = vld [vmem:[#allocation4 + $0xccc] sm:$0xf] }
 0x3ce   :  { %v3818_v20 = vsub.f32 0.0, %v10694_v6 }
 0x3cf   :  { %4730 = vmatpush.bf16.msra.mxu0 %v7860_v31  ;;  %v9352_v31 = vld [vmem:[#allocation4 + $0xd74] sm:$0xf0] }
 0x3d0   :  { %v3824_v10 = vmul.f32 1.442695, %v3818_v20  ;;  %v7877_v20 = vld [vmem:[#allocation4 + $0xcd8] sm:$0xf0]  ;;  %v7956_v46 = vor.u32 %v9352_v31, %v7955_v44  ;;  %v9314_v44 = vld [vmem:[#allocation4 + $0xc4c] sm:$0xf] }
 0x3d1   :  { %v9655_v47 = vpop.eup %9654  ;;  %4716 = vmatpush.bf16.msrb.mxu3 %v8256_v3  ;;  %v7880_v17 = vor.u32 %v9330_v4, %v7877_v20  ;;  %v9348_v3 = vld [vmem:[#allocation4 + $0xd54] sm:$0xf0]  ;;  %v7813_v31 = vld [vmem:[#allocation4 + $0xc58] sm:$0xf0] }
 0x3d2   :  { %v3837_v60 = vmul.f32 %v9655_v47, %v10683_v16  ;;  %9656 = vpow2.f32 %v3824_v10  ;;  %v7812_v16 = vor.u32 %v9316_v59, %v7811_v30  ;;  %v7939_v47 = vld [vmem:[#allocation4 + $0xd48] sm:$0xf]  ;;  %v9401_v30 = vld [vmem:[#allocation4 + $0xf04] sm:$0xf]  ;;  %v8157_v59 = vld [vmem:[#allocation4 + $0xf10] sm:$0xf0]  ;;  %v7816_v42 = vor.u32 %v9314_v44, %v7813_v31 }
 0x3d3   :  { %4731 = vmatpush.bf16.msra.mxu0 %v7844_v25  ;;  %v3762_v54 = vpop.f32.mrf.mxu3  ;;  %v9380_v20 = vld [vmem:[#allocation4 + $0xe54] sm:$0xf0]  ;;  %v9338_v44 = vld [vmem:[#allocation4 + $0xd0c] sm:$0xf]  ;;  %v7909_v31 = vld [vmem:[#allocation4 + $0xd18] sm:$0xf0] }
 0x3d4   :  { %v10700_v5 = vpack.c.bf16 %v3837_v60, %v3837_v60  ;;  %v3801_v63 = vpop.f32.mrf.mxu2  ;;  %v8131_v60 = vld [vmem:[#allocation4 + $0xec8] sm:$0xf]  ;;  %v3787_v54 = vadd.f32 %v10679_v23, %v3774_v53 }
 0x3d5   :  { %4717 = vmatpush.bf16.msrb.mxu3 %v8240_v62  ;;  %v7940_v63 = vor.u32 %v9348_v3, %v7939_v47  ;;  %v9344_v62 = vld [vmem:[#allocation4 + $0xd34] sm:$0xf0] }
 0x3d6   :  { %4645 = vmatmul.bf16.vlgmr.msra.gmra.mxu1 %v10700_v5  ;;  %4684 = vmatmul.bf16.vlgmr.msrb.gmra.mxu0 %v10688_v15  ;;  %v3800_v22 = vadd.f32 %v10696_v56, %v3787_v54  ;;  %v7924_v19 = vor.u32 %v9344_v62, %v7923_v18  ;;  %v9376_v3 = vld [vmem:[#allocation4 + $0xe34] sm:$0xf0]  ;;  %v7781_v54 = vld [vmem:[#allocation4 + $0xc18] sm:$0xf0]  ;;  %v9398_v62 = vld [vmem:[#allocation4 + $0xeec] sm:$0xf] }
 0x3d7   :  { %4732 = vmatpush.bf16.msra.mxu0 %v7828_v45  ;;  %4741 = vmatpush.bf16.msra.mxu1 %v8020_v7  ;;  %v9396_v45 = vld [vmem:[#allocation4 + $0xed4] sm:$0xf0]  ;;  %v7861_v7 = vld [vmem:[#allocation4 + $0xcb8] sm:$0xf0] }
 0x3d8   :  { %v9657_v48 = vpop.eup %9656  ;;  %v8132_v23 = vor.u32 %v9396_v45, %v8131_v60  ;;  %v9306_v60 = vld [vmem:[#allocation4 + $0xc0c] sm:$0xf]  ;;  %v7957_v18 = vld [vmem:[#allocation4 + $0xd78] sm:$0xf0] }
 0x3d9   :  { %v3830_v57 = vadd.f32 1.0, %v9657_v48  ;;  %4718 = vmatpush.bf16.msrb.mxu3 %v8224_v21  ;;  %v8160_v48 = vor.u32 %v9401_v30, %v8157_v59  ;;  %v9340_v21 = vld [vmem:[#allocation4 + $0xd14] sm:$0xf0]  ;;  %v9354_v45 = vld [vmem:[#allocation4 + $0xd8c] sm:$0xf] }
 0x3da   :  { %v7908_v9 = vor.u32 %v9340_v21, %v7907_v28  ;;  %v8035_v30 = vld [vmem:[#allocation4 + $0xe08] sm:$0xf]  ;;  %v9372_v59 = vld [vmem:[#allocation4 + $0xe14] sm:$0xf0]  ;;  %v7941_v21 = vld [vmem:[#allocation4 + $0xd58] sm:$0xf0] }
 0x3db   :  { %9658 = vrcp.f32 %v3830_v57  ;;  %4733 = vmatpush.bf16.msra.mxu0 %v7812_v16  ;;  %4742 = vmatpush.bf16.msra.mxu1 %v8004_v55  ;;  %v8115_v16 = vld [vmem:[#allocation4 + $0xea8] sm:$0xf]  ;;  %v7848_v57 = vor.u32 %v9322_v51, %v7845_v34  ;;  %v8036_v51 = vor.u32 %v9372_v59, %v8035_v30  ;;  %v9404_v30 = vld [vmem:[#allocation4 + $0xf14] sm:$0xf0]  ;;  %v9370_v59 = vld [vmem:[#allocation4 + $0xe0c] sm:$0xf] }
 0x3dc   :  { %v8116_v12 = vor.u32 %v9392_v52, %v8115_v16  ;;  %v8149_v16 = vld [vmem:[#allocation4 + $0xef8] sm:$0xf0]  ;;  %v8259_v28 = vld [vmem:[#allocation4 + $0xfc8] sm:$0xf] }
 0x3dd   :  { %4719 = vmatpush.bf16.msrb.mxu3 %v8208_v24  ;;  %v7832_v24 = vor.u32 %v9318_v26, %v7829_v61  ;;  %v8243_v61 = vld [vmem:[#allocation4 + $0xfa8] sm:$0xf] }
 0x3df   :  { %4734 = vmatpush.bf16.msra.mxu0 %v7796_v27  ;;  %4743 = vmatpush.bf16.msra.mxu1 %v7988_v13  ;;  %v8099_v27 = vld [vmem:[#allocation4 + $0xe88] sm:$0xf]  ;;  %v9388_v13 = vld [vmem:[#allocation4 + $0xe94] sm:$0xf0] }
 0x3e0   :  { %v8100_v29 = vor.u32 %v9388_v13, %v8099_v27  ;;  %v9394_v27 = vld [vmem:[#allocation4 + $0xecc] sm:$0xf]  ;;  %v8133_v13 = vld [vmem:[#allocation4 + $0xed8] sm:$0xf0] }
 0x3e1   :  { %v9659_v11 = vpop.eup %9658  ;;  %4720 = vmatpush.bf16.msrb.mxu3 %v8192_v43  ;;  %v9310_v43 = vld [vmem:[#allocation4 + $0xc2c] sm:$0xf]  ;;  %v8136_v26 = vor.u32 %v9394_v27, %v8133_v13  ;;  %v8197_v13 = vld [vmem:[#allocation4 + $0xf58] sm:$0xf0] }
 0x3e2   :  { %v3838_v25 = vmul.f32 %v9659_v11, %v10694_v6  ;;  %v9326_v6 = vld [vmem:[#allocation4 + $0xcac] sm:$0xf]  ;;  %v8067_v11 = vld [vmem:[#allocation4 + $0xe48] sm:$0xf] }
 0x3e3   :  { %4735 = vmatpush.bf16.msra.mxu0 %v7780_v39  ;;  %4744 = vmatpush.bf16.msra.mxu1 %v7972_v1  ;;  %v7864_v35 = vor.u32 %v9326_v6, %v7861_v7  ;;  %v8024_v39 = vor.u32 %v9366_v41, %v8021_v40  ;;  %v9384_v1 = vld [vmem:[#allocation4 + $0xe74] sm:$0xf0]  ;;  %v8068_v58 = vor.u32 %v9380_v20, %v8067_v11  ;;  %v7973_v6 = vld [vmem:[#allocation4 + $0xd98] sm:$0xf0]  ;;  %v9342_v40 = vld [vmem:[#allocation4 + $0xd2c] sm:$0xf] }
 0x3e4   :  { %v10707_v10 = vpack.c.bf16 %v3838_v25, %v3838_v25  ;;  %v8084_v8 = vor.u32 %v9384_v1, %v8083_v32  ;;  %v7797_v25 = vld [vmem:[#allocation4 + $0xc38] sm:$0xf0]  ;;  %v9424_v41 = vld [vmem:[#allocation4 + $0xfb4] sm:$0xf0]  ;;  %v9382_v20 = vld [vmem:[#allocation4 + $0xe6c] sm:$0xf] }
 0x3e5   :  { %4721 = vmatpush.bf16.msrb.mxu3 %v8176_v38  ;;  %v7784_v38 = vor.u32 %v9306_v60, %v7781_v54  ;;  %v9420_v1 = vld [vmem:[#allocation4 + $0xf94] sm:$0xf0]  ;;  %v9374_v54 = vld [vmem:[#allocation4 + $0xe2c] sm:$0xf] }
 0x3e6   :  { %4658 = vmatmul.bf16.vlgmr.msra.gmra.mxu2 %v10707_v10  ;;  %4697 = vmatmul.bf16.vlgmr.msrb.gmra.mxu1 %v10700_v5  ;;  %v9408_v60 = vld [vmem:[#allocation4 + $0xf34] sm:$0xf0]  ;;  %v9410_v27 = vld [vmem:[#allocation4 + $0xf4c] sm:$0xf] }
 0x3e7   :  { %4780 = vmatpush.bf16.msrb.mxu0 %v7896_v33  ;;  %4745 = vmatpush.bf16.msra.mxu1 %v7956_v46  ;;  %v9362_v33 = vld [vmem:[#allocation4 + $0xdcc] sm:$0xf] }
 0x3e8   :  { %4736 = vmatmul.bf16.vlgmr.msra.gmra.mxu0 %v10688_v15  ;;  %4754 = vmatpush.bf16.msra.mxu2 %v8148_v0  ;;  %v8008_v4 = vor.u32 %v9362_v33, %v8005_v50  ;;  %v9358_v46 = vld [vmem:[#allocation4 + $0xdac] sm:$0xf]  ;;  %v7800_v0 = vor.u32 %v9310_v43, %v7797_v25  ;;  %v8101_v50 = vld [vmem:[#allocation4 + $0xe98] sm:$0xf0] }
 0x3e9   :  { %4722 = vmatpush.bf16.msrb.mxu3 %v8160_v48  ;;  %v7992_v47 = vor.u32 %v9358_v46, %v7989_v2  ;;  %v9386_v33 = vld [vmem:[#allocation4 + $0xe8c] sm:$0xf]  ;;  %v8085_v43 = vld [vmem:[#allocation4 + $0xe78] sm:$0xf0]  ;;  %v8195_v46 = vld [vmem:[#allocation4 + $0xf48] sm:$0xf] }
 0x3ea   :  { %v8104_v11 = vor.u32 %v9386_v33, %v8101_v50  ;;  %v9412_v2 = vld [vmem:[#allocation4 + $0xf54] sm:$0xf0]  ;;  %v8347_v50 = vld [vmem:[#allocation4 + $0x1080] sm:$0xf] }
 0x3eb   :  { %v3812_v36 = vpop.f32.mrf.mxu3  ;;  %4781 = vmatpush.bf16.msrb.mxu0 %v7880_v17  ;;  %4746 = vmatpush.bf16.msra.mxu1 %v7940_v63  ;;  %v8051_v17 = vld [vmem:[#allocation4 + $0xe28] sm:$0xf] }
 0x3ec   :  { %v10714_v55 = vadd.f32 %v3812_v36, %v3800_v22  ;;  %4755 = vmatpush.bf16.msra.mxu2 %v8132_v23  ;;  %v8052_v7 = vor.u32 %v9376_v3, %v8051_v17  ;;  %v7976_v22 = vor.u32 %v9354_v45, %v7973_v6  ;;  %v8275_v63 = vld [vmem:[#allocation4 + $0xfe8] sm:$0xf]  ;;  %v9432_v36 = vld [vmem:[#allocation4 + $0xff4] sm:$0xf0]  ;;  %v9350_v23 = vld [vmem:[#allocation4 + $0xd6c] sm:$0xf]  ;;  %v8196_v17 = vor.u32 %v9412_v2, %v8195_v46 }
 0x3ed   :  { %v8276_v34 = vor.u32 %v9432_v36, %v8275_v63  ;;  %v8179_v3 = vld [vmem:[#allocation4 + $0xf28] sm:$0xf]  ;;  %v8053_v45 = vld [vmem:[#allocation4 + $0xe38] sm:$0xf0]  ;;  %v9430_v63 = vld [vmem:[#allocation4 + $0xfec] sm:$0xf] }
 0x3ee   :  { %v3819_v56 = vsub.f32 0.0, %v10714_v55  ;;  %v8180_v6 = vor.u32 %v9408_v60, %v8179_v3  ;;  %v8277_v36 = vld [vmem:[#allocation4 + $0xff8] sm:$0xf0]  ;;  %v8315_v46 = vld [vmem:[#allocation4 + $0x1040] sm:$0xf] }
 0x3ef   :  { %4782 = vmatpush.bf16.msrb.mxu0 %v7864_v35  ;;  %4747 = vmatpush.bf16.msra.mxu1 %v7924_v19  ;;  %v8152_v19 = vor.u32 %v9398_v62, %v8149_v16  ;;  %v8261_v62 = vld [vmem:[#allocation4 + $0xfd8] sm:$0xf0]  ;;  %v9443_v2 = vld [vmem:[#allocation4 + $0x104c] sm:$0xf0]  ;;  %v8299_v60 = vld [vmem:[#allocation4 + $0x1020] sm:$0xf] }
 0x3f0   :  { %v3826_v37 = vmul.f32 1.442695, %v3819_v56  ;;  %4756 = vmatpush.bf16.msra.mxu2 %v8116_v12  ;;  %v7960_v56 = vor.u32 %v9350_v23, %v7957_v18  ;;  %v9428_v12 = vld [vmem:[#allocation4 + $0xfd4] sm:$0xf0]  ;;  %v9426_v18 = vld [vmem:[#allocation4 + $0xfcc] sm:$0xf] }
 0x3f1   :  { %v8264_v16 = vor.u32 %v9426_v18, %v8261_v62  ;;  %v9491_v3 = vld [vmem:[#allocation4 + $0x11cc] sm:$0xf0] }
 0x3f2   :  { %9660 = vpow2.f32 %v3826_v37 }
 0x3f3   :  { %v3814_v49 = vpop.f32.mrf.mxu3  ;;  %4783 = vmatpush.bf16.msrb.mxu0 %v7848_v57  ;;  %4748 = vmatpush.bf16.msra.mxu1 %v7908_v9  ;;  %v9346_v57 = vld [vmem:[#allocation4 + $0xd4c] sm:$0xf]  ;;  %v7925_v9 = vld [vmem:[#allocation4 + $0xd38] sm:$0xf0] }
 0x3f4   :  { %4757 = vmatpush.bf16.msra.mxu2 %v8100_v29  ;;  %v7944_v37 = vor.u32 %v9346_v57, %v7941_v21  ;;  %v9390_v49 = vld [vmem:[#allocation4 + $0xeac] sm:$0xf]  ;;  %v8117_v29 = vld [vmem:[#allocation4 + $0xeb8] sm:$0xf0] }
 0x3f5   :  { %v8120_v32 = vor.u32 %v9390_v49, %v8117_v29  ;;  %v8213_v57 = vld [vmem:[#allocation4 + $0xf78] sm:$0xf0]  ;;  %v8395_v49 = vld [vmem:[#allocation4 + $0x10e0] sm:$0xf]  ;;  %v9463_v29 = vld [vmem:[#allocation4 + $0x10ec] sm:$0xf0] }
 0x3f6   :  { %4710 = vmatmul.bf16.vlgmr.msrb.gmra.mxu2 %v10707_v10  ;;  %4749 = vmatmul.bf16.vlgmr.msra.gmra.mxu1 %v10700_v5 }
 0x3f7   :  { %4784 = vmatpush.bf16.msrb.mxu0 %v7832_v24  ;;  %4793 = vmatpush.bf16.msrb.mxu1 %v8024_v39  ;;  %v8244_v24 = vor.u32 %v9424_v41, %v8243_v61  ;;  %v8227_v39 = vld [vmem:[#allocation4 + $0xf88] sm:$0xf]  ;;  %v9402_v41 = vld [vmem:[#allocation4 + $0xf0c] sm:$0xf] }
 0x3f8   :  { %v9661_v14 = vpop.eup %9660  ;;  %4758 = vmatpush.bf16.msra.mxu2 %v8084_v8  ;;  %v8228_v8 = vor.u32 %v9420_v1, %v8227_v39 }
 0x3f9   :  { %v3831_v53 = vadd.f32 1.0, %v9661_v14  ;;  %v8211_v14 = vld [vmem:[#allocation4 + $0xf68] sm:$0xf] }
 0x3fb   :  { %9662 = vrcp.f32 %v3831_v53  ;;  %4785 = vmatpush.bf16.msrb.mxu0 %v7816_v42  ;;  %4794 = vmatpush.bf16.msrb.mxu1 %v8008_v4  ;;  %v7912_v42 = vor.u32 %v9338_v44, %v7909_v31  ;;  %v9416_v4 = vld [vmem:[#allocation4 + $0xf74] sm:$0xf0]  ;;  %v8088_v53 = vor.u32 %v9382_v20, %v8085_v43  ;;  %v8363_v44 = vld [vmem:[#allocation4 + $0x10a0] sm:$0xf]  ;;  %v9455_v31 = vld [vmem:[#allocation4 + $0x10ac] sm:$0xf0] }
 0x3fc   :  { %4759 = vmatpush.bf16.msra.mxu2 %v8068_v58  ;;  %v8212_v25 = vor.u32 %v9416_v4, %v8211_v14  ;;  %v9378_v58 = vld [vmem:[#allocation4 + $0xe4c] sm:$0xf]  ;;  %v8364_v33 = vor.u32 %v9455_v31, %v8363_v44  ;;  %v8331_v14 = vld [vmem:[#allocation4 + $0x1060] sm:$0xf]  ;;  %v9447_v4 = vld [vmem:[#allocation4 + $0x106c] sm:$0xf0] }
 0x3fd   :  { %v8523_v20 = vld [vmem:[#allocation4 + $0x11e0] sm:$0xf]  ;;  %v8332_v43 = vor.u32 %v9447_v4, %v8331_v14  ;;  %v9471_v44 = vld [vmem:[#allocation4 + $0x112c] sm:$0xf0] }
 0x3fe   :  { %v8619_v31 = vld [vmem:[#allocation4 + $0x12a0] sm:$0xf] }
 0x3ff   :  { %4786 = vmatpush.bf16.msrb.mxu0 %v7800_v0  ;;  %4795 = vmatpush.bf16.msrb.mxu1 %v7992_v47  ;;  %v8069_v0 = vld [vmem:[#allocation4 + $0xe58] sm:$0xf0] }
 0x400   :  { %4760 = vmatpush.bf16.msra.mxu2 %v8052_v7  ;;  %v8072_v47 = vor.u32 %v9378_v58, %v8069_v0  ;;  %v8056_v7 = vor.u32 %v9374_v54, %v8053_v45  ;;  %v8507_v58 = vld [vmem:[#allocation4 + $0x11c0] sm:$0xf]  ;;  %v9439_v54 = vld [vmem:[#allocation4 + $0x102c] sm:$0xf0] }
 0x401   :  { %v9663_v35 = vpop.eup %9662  ;;  %v8508_v45 = vor.u32 %v9491_v3, %v8507_v58  ;;  %v9515_v58 = vld [vmem:[#allocation4 + $0x128c] sm:$0xf0] }
 0x402   :  { %v3839_v52 = vmul.f32 %v9663_v35, %v10714_v55  ;;  %v8260_v55 = vor.u32 %v9428_v12, %v8259_v28  ;;  %v8280_v35 = vor.u32 %v9430_v63, %v8277_v36  ;;  %v9414_v12 = vld [vmem:[#allocation4 + $0xf6c] sm:$0xf]  ;;  %v8475_v63 = vld [vmem:[#allocation4 + $0x1180] sm:$0xf] }
 0x403   :  { %4787 = vmatpush.bf16.msrb.mxu0 %v7784_v38  ;;  %4796 = vmatpush.bf16.msrb.mxu1 %v7976_v22  ;;  %v8163_v38 = vld [vmem:[#allocation4 + $0xf08] sm:$0xf]  ;;  %v8037_v22 = vld [vmem:[#allocation4 + $0xe18] sm:$0xf0]  ;;  %v8216_v21 = vor.u32 %v9414_v12, %v8213_v57  ;;  %v8651_v12 = vld [vmem:[#allocation4 + $0x12e0] sm:$0xf] }
 0x404   :  { %v10720_v48 = vpack.c.bf16 %v3839_v52, %v3839_v52  ;;  %4761 = vmatpush.bf16.msra.mxu2 %v8036_v51  ;;  %v8164_v23 = vor.u32 %v9404_v30, %v8163_v38  ;;  %v9422_v52 = vld [vmem:[#allocation4 + $0xfac] sm:$0xf]  ;;  %v8245_v51 = vld [vmem:[#allocation4 + $0xfb8] sm:$0xf0]  ;;  %v8300_v38 = vor.u32 %v9439_v54, %v8299_v60  ;;  %v9493_v54 = vld [vmem:[#allocation4 + $0x11e4] sm:$0xf] }
 0x406   :  { %4671 = vmatmul.bf16.vlgmr.msra.gmra.mxu3 %v10720_v48  ;;  %4788 = vmatmul.bf16.vlgmr.msrb.gmra.mxu0 %v10688_v15  ;;  %v7928_v15 = vor.u32 %v9342_v40, %v7925_v9 }
 0x407   :  { %4767 = vmatpush.bf16.msra.mxu3 %v8276_v34  ;;  %4797 = vmatpush.bf16.msrb.mxu1 %v7960_v56  ;;  %v8248_v34 = vor.u32 %v9422_v52, %v8245_v51  ;;  %v9418_v56 = vld [vmem:[#allocation4 + $0xf8c] sm:$0xf] }
 0x408   :  { %4806 = vmatpush.bf16.msrb.mxu2 %v8152_v19  ;;  %v8229_v19 = vld [vmem:[#allocation4 + $0xf98] sm:$0xf0] }
 0x409   :  { %4762 = vmatmul.bf16.vlgmr.msra.gmra.mxu2 %v10707_v10  ;;  %v8232_v28 = vor.u32 %v9418_v56, %v8229_v19  ;;  %v8459_v19 = vld [vmem:[#allocation4 + $0x1160] sm:$0xf] }
 0x40b   :  { %4768 = vmatpush.bf16.msra.mxu3 %v8260_v55  ;;  %4798 = vmatpush.bf16.msrb.mxu1 %v7944_v37  ;;  %v8200_v55 = vor.u32 %v9410_v27, %v8197_v13  ;;  %v9406_v37 = vld [vmem:[#allocation4 + $0xf2c] sm:$0xf]  ;;  %v9457_v27 = vld [vmem:[#allocation4 + $0x10c4] sm:$0xf]  ;;  %v8381_v13 = vld [vmem:[#allocation4 + $0x10d0] sm:$0xf0] }
 0x40c   :  { %4807 = vmatpush.bf16.msrb.mxu2 %v8136_v26  ;;  %v8181_v26 = vld [vmem:[#allocation4 + $0xf38] sm:$0xf0] }
 0x40d   :  { %v8184_v61 = vor.u32 %v9406_v37, %v8181_v26  ;;  %v8384_v37 = vor.u32 %v9457_v27, %v8381_v13 }
 0x40f   :  { %4769 = vmatpush.bf16.msra.mxu3 %v8244_v24  ;;  %4799 = vmatpush.bf16.msrb.mxu1 %v7928_v15  ;;  %v8396_v24 = vor.u32 %v9463_v29, %v8395_v49  ;;  %v8379_v15 = vld [vmem:[#allocation4 + $0x10c0] sm:$0xf]  ;;  %v9523_v49 = vld [vmem:[#allocation4 + $0x12cc] sm:$0xf0]  ;;  %v9453_v29 = vld [vmem:[#allocation4 + $0x10a4] sm:$0xf] }
 0x410   :  { %4808 = vmatpush.bf16.msrb.mxu2 %v8120_v32  ;;  %v9459_v32 = vld [vmem:[#allocation4 + $0x10cc] sm:$0xf0] }
 0x411   :  { %5640 = vmatpush.bf16.msra.mxu0 %v8396_v24  ;;  %v8380_v1 = vor.u32 %v9459_v32, %v8379_v15  ;;  %v8365_v24 = vld [vmem:[#allocation4 + $0x10b0] sm:$0xf0] }
 0x413   :  { %4770 = vmatpush.bf16.msra.mxu3 %v8228_v8  ;;  %4800 = vmatpush.bf16.msrb.mxu1 %v7912_v42  ;;  %v9451_v8 = vld [vmem:[#allocation4 + $0x108c] sm:$0xf0] }
 0x414   :  { %4809 = vmatpush.bf16.msrb.mxu2 %v8104_v11  ;;  %v8348_v42 = vor.u32 %v9451_v8, %v8347_v50  ;;  %v9519_v50 = vld [vmem:[#allocation4 + $0x12ac] sm:$0xf0]  ;;  %v9449_v8 = vld [vmem:[#allocation4 + $0x1084] sm:$0xf] }
 0x415   :  { %5641 = vmatpush.bf16.msra.mxu0 %v8380_v1  ;;  %v8427_v1 = vld [vmem:[#allocation4 + $0x1120] sm:$0xf]  ;;  %v8620_v14 = vor.u32 %v9519_v50, %v8619_v31  ;;  %v9499_v31 = vld [vmem:[#allocation4 + $0x120c] sm:$0xf0] }
 0x416   :  { %4723 = vmatmul.bf16.vlgmr.msrb.gmra.mxu3 %v10720_v48  ;;  %4801 = vmatmul.bf16.vlgmr.msrb.gmra.mxu1 %v10700_v5  ;;  %v8040_v5 = vor.u32 %v9370_v59, %v8037_v22  ;;  %v8283_v59 = vld [vmem:[#allocation4 + $0x1000] sm:$0xf]  ;;  %v9435_v22 = vld [vmem:[#allocation4 + $0x100c] sm:$0xf0] }
 0x417   :  { %4771 = vmatpush.bf16.msra.mxu3 %v8212_v25  ;;  %v9495_v25 = vld [vmem:[#allocation4 + $0x11ec] sm:$0xf0]  ;;  %v8284_v36 = vor.u32 %v9435_v22, %v8283_v59  ;;  %v9441_v22 = vld [vmem:[#allocation4 + $0x1044] sm:$0xf] }
 0x418   :  { %4810 = vmatpush.bf16.msrb.mxu2 %v8088_v53  ;;  %v8524_v53 = vor.u32 %v9495_v25, %v8523_v20  ;;  %v10744_v20 = vld [vmem:[#allocation6 + $0xc] sm:$0xf]  ;;  %v8411_v25 = vld [vmem:[#allocation4 + $0x1100] sm:$0xf] }
 0x419   :  { %5642 = vmatpush.bf16.msra.mxu0 %v8364_v33  ;;  %v8428_v33 = vor.u32 %v9471_v44, %v8427_v1 }
 0x41a   :  { %5653 = vmatpush.bf16.msra.mxu1 %v8524_v53  ;;  %v9467_v53 = vld [vmem:[#allocation4 + $0x110c] sm:$0xf0] }
 0x41b   :  { %4772 = vmatpush.bf16.msra.mxu3 %v8196_v17 }
 0x41c   :  { %4811 = vmatpush.bf16.msrb.mxu2 %v8072_v47  ;;  %v8316_v47 = vor.u32 %v9443_v2, %v8315_v46  ;;  %v8603_v46 = vld [vmem:[#allocation4 + $0x1280] sm:$0xf]  ;;  %v8412_v2 = vor.u32 %v9467_v53, %v8411_v25  ;;  %v8461_v53 = vld [vmem:[#allocation4 + $0x1170] sm:$0xf0] }
 0x41d   :  { %5643 = vmatpush.bf16.msra.mxu0 %v8348_v42  ;;  %v8349_v42 = vld [vmem:[#allocation4 + $0x1090] sm:$0xf0]  ;;  %v8604_v3 = vor.u32 %v9515_v58, %v8603_v46  ;;  %v9525_v46 = vld [vmem:[#allocation4 + $0x12e4] sm:$0xf] }
 0x41e   :  { %5654 = vmatpush.bf16.msra.mxu1 %v8508_v45  ;;  %v8352_v4 = vor.u32 %v9449_v8, %v8349_v42  ;;  %v8525_v45 = vld [vmem:[#allocation4 + $0x11f0] sm:$0xf0]  ;;  %v8779_v8 = vld [vmem:[#allocation4 + $0x13e0] sm:$0xf]  ;;  %v9559_v42 = vld [vmem:[#allocation4 + $0x13ec] sm:$0xf0] }
 0x41f   :  { %4773 = vmatpush.bf16.msra.mxu3 %v8180_v6  ;;  %v8491_v6 = vld [vmem:[#allocation4 + $0x11a0] sm:$0xf]  ;;  %v8780_v25 = vor.u32 %v9559_v42, %v8779_v8  ;;  %v8653_v58 = vld [vmem:[#allocation4 + $0x12f0] sm:$0xf0] }
 0x420   :  { %4812 = vmatpush.bf16.msrb.mxu2 %v8056_v7  ;;  %v9487_v7 = vld [vmem:[#allocation4 + $0x11ac] sm:$0xf0] }
 0x421   :  { %5644 = vmatpush.bf16.msra.mxu0 %v8332_v43  ;;  %v8492_v30 = vor.u32 %v9487_v7, %v8491_v6  ;;  %v8528_v6 = vor.u32 %v9493_v54, %v8525_v45  ;;  %v3976_v7 = vperm.slane %v10744_v20, 0  ;;  %v9473_v45 = vld [vmem:[#allocation4 + $0x1144] sm:$0xf] }
 0x423   :  { %4774 = vmatpush.bf16.msra.mxu3 %v8164_v23  ;;  %5655 = vmatpush.bf16.msra.mxu1 %v8492_v30  ;;  %v9483_v23 = vld [vmem:[#allocation4 + $0x118c] sm:$0xf0] }
 0x424   :  { %4813 = vmatpush.bf16.msrb.mxu2 %v8040_v5  ;;  %v9461_v5 = vld [vmem:[#allocation4 + $0x10e4] sm:$0xf]  ;;  %v8476_v62 = vor.u32 %v9483_v23, %v8475_v63  ;;  %v9511_v30 = vld [vmem:[#allocation4 + $0x126c] sm:$0xf0]  ;;  %v8317_v63 = vld [vmem:[#allocation4 + $0x1050] sm:$0xf0] }
 0x425   :  { %5645 = vmatpush.bf16.msra.mxu0 %v8316_v47  ;;  %v8320_v23 = vor.u32 %v9441_v22, %v8317_v63 }
 0x426   :  { %4775 = vmatmul.bf16.vlgmr.msra.gmra.mxu3 %v10720_v48 }
 0x427   :  { %4819 = vmatpush.bf16.msrb.mxu3 %v8280_v35  ;;  %4814 = vmatmul.bf16.vlgmr.msrb.gmra.mxu2 %v10707_v10  ;;  %v8165_v10 = vld [vmem:[#allocation4 + $0xf18] sm:$0xf0]  ;;  %v8397_v35 = vld [vmem:[#allocation4 + $0x10f0] sm:$0xf0] }
 0x428   :  { %v8168_v40 = vor.u32 %v9402_v41, %v8165_v10  ;;  %5656 = vmatpush.bf16.msra.mxu1 %v8476_v62  ;;  %v9475_v41 = vld [vmem:[#allocation4 + $0x114c] sm:$0xf0]  ;;  %v8635_v10 = vld [vmem:[#allocation4 + $0x12c0] sm:$0xf] }
 0x429   :  { %5646 = vmatpush.bf16.msra.mxu0 %v8300_v38  ;;  %v8636_v32 = vor.u32 %v9523_v49, %v8635_v10  ;;  %v8587_v38 = vld [vmem:[#allocation4 + $0x1260] sm:$0xf]  ;;  %v8285_v49 = vld [vmem:[#allocation4 + $0x1010] sm:$0xf0] }
 0x42a   :  { %v8588_v59 = vor.u32 %v9511_v30, %v8587_v38  ;;  %v8637_v30 = vld [vmem:[#allocation4 + $0x12d0] sm:$0xf0] }
 0x42b   :  { %4820 = vmatpush.bf16.msrb.mxu3 %v8264_v16  ;;  %v8400_v16 = vor.u32 %v9461_v5, %v8397_v35  ;;  %v8509_v5 = vld [vmem:[#allocation4 + $0x11d0] sm:$0xf0] }
 0x42d   :  { %5647 = vmatpush.bf16.msra.mxu0 %v8284_v36  ;;  %v9489_v36 = vld [vmem:[#allocation4 + $0x11c4] sm:$0xf] }
 0x42e   :  { %v8512_v62 = vor.u32 %v9489_v36, %v8509_v5  ;;  %v8747_v36 = vld [vmem:[#allocation4 + $0x13a0] sm:$0xf] }
 0x42f   :  { %4821 = vmatpush.bf16.msrb.mxu3 %v8248_v34 }
 0x431   :  { %5692 = vmatpush.bf16.msrb.mxu0 %v8400_v16 }
 0x433   :  { %4822 = vmatpush.bf16.msrb.mxu3 %v8232_v28  ;;  %v9479_v28 = vld [vmem:[#allocation4 + $0x116c] sm:$0xf0] }
 0x434   :  { %v8460_v57 = vor.u32 %v9479_v28, %v8459_v19  ;;  %v9507_v19 = vld [vmem:[#allocation4 + $0x124c] sm:$0xf0] }
 0x435   :  { %5693 = vmatpush.bf16.msrb.mxu0 %v8384_v37 }
 0x436   :  { %5657 = vmatpush.bf16.msra.mxu1 %v8460_v57  ;;  %v8301_v57 = vld [vmem:[#allocation4 + $0x1030] sm:$0xf0] }
 0x437   :  { %4823 = vmatpush.bf16.msrb.mxu3 %v8216_v21  ;;  %v9527_v21 = vld [vmem:[#allocation4 + $0x12ec] sm:$0xf0] }
 0x43b   :  { %4824 = vmatpush.bf16.msrb.mxu3 %v8200_v55  ;;  %v8652_v55 = vor.u32 %v9527_v21, %v8651_v12  ;;  %v9437_v12 = vld [vmem:[#allocation4 + $0x1024] sm:$0xf] }
 0x43c   :  { %v9485_v21 = vld [vmem:[#allocation4 + $0x11a4] sm:$0xf]  ;;  %v8304_v13 = vor.u32 %v9437_v12, %v8301_v57  ;;  %v8621_v57 = vld [vmem:[#allocation4 + $0x12b0] sm:$0xf0] }
 0x43d   :  { %5666 = vmatpush.bf16.msra.mxu2 %v8652_v55  ;;  %v8493_v55 = vld [vmem:[#allocation4 + $0x11b0] sm:$0xf0] }
 0x43e   :  { %v8496_v37 = vor.u32 %v9485_v21, %v8493_v55  ;;  %v9547_v55 = vld [vmem:[#allocation4 + $0x138c] sm:$0xf0] }
 0x43f   :  { %4825 = vmatpush.bf16.msrb.mxu3 %v8184_v61  ;;  %v8443_v61 = vld [vmem:[#allocation4 + $0x1140] sm:$0xf] }
 0x441   :  { %5667 = vmatpush.bf16.msra.mxu2 %v8636_v32 }
 0x443   :  { %4826 = vmatpush.bf16.msrb.mxu3 %v8168_v40  ;;  %v10730_v9 = vpop.f32.mrf.mxu0  ;;  %v8444_v40 = vor.u32 %v9475_v41, %v8443_v61  ;;  %v9503_v61 = vld [vmem:[#allocation4 + $0x122c] sm:$0xf0] }
 0x444   :  { %v4634_v16 = vadd.f32 %v10730_v9, %v3976_v7  ;;  %v8555_v9 = vld [vmem:[#allocation4 + $0x1220] sm:$0xf]  ;;  %v9521_v7 = vld [vmem:[#allocation4 + $0x12c4] sm:$0xf] }
 0x445   :  { %5658 = vmatpush.bf16.msra.mxu1 %v8444_v40  ;;  %5668 = vmatpush.bf16.msra.mxu2 %v8620_v14  ;;  %v8556_v10 = vor.u32 %v9503_v61, %v8555_v9  ;;  %v9433_v40 = vld [vmem:[#allocation4 + $0x1004] sm:$0xf]  ;;  %v8413_v61 = vld [vmem:[#allocation4 + $0x1110] sm:$0xf0] }
 0x446   :  { %4827 = vmatmul.bf16.vlgmr.msrb.gmra.mxu3 %v10720_v48  ;;  %v8288_v32 = vor.u32 %v9433_v40, %v8285_v49  ;;  %v9477_v14 = vld [vmem:[#allocation4 + $0x1164] sm:$0xf]  ;;  %v8605_v40 = vld [vmem:[#allocation4 + $0x1290] sm:$0xf0] }
 0x447   :  { %5679 = vmatpush.bf16.msra.mxu3 %v8780_v25  ;;  %v9465_v9 = vld [vmem:[#allocation4 + $0x1104] sm:$0xf]  ;;  %v8699_v25 = vld [vmem:[#allocation4 + $0x1340] sm:$0xf] }
 0x449   :  { %5659 = vmatpush.bf16.msra.mxu1 %v8428_v33  ;;  %5669 = vmatpush.bf16.msra.mxu2 %v8604_v3  ;;  %v9555_v3 = vld [vmem:[#allocation4 + $0x13cc] sm:$0xf0] }
 0x44b   :  { %v4635_v39 = vpop.f32.mrf.mxu0 }
 0x44c   :  { %v8368_v39 = vor.u32 %v9453_v29, %v8365_v24  ;;  %v9481_v29 = vld [vmem:[#allocation4 + $0x1184] sm:$0xf] }
 0x44d   :  { %5660 = vmatpush.bf16.msra.mxu1 %v8412_v2  ;;  %5670 = vmatpush.bf16.msra.mxu2 %v8588_v59  ;;  %v8464_v2 = vor.u32 %v9477_v14, %v8461_v53  ;;  %v8640_v59 = vor.u32 %v9521_v7, %v8637_v30  ;;  %v3978_v14 = vperm.slane %v10744_v20, 2  ;;  %v9539_v53 = vld [vmem:[#allocation4 + $0x134c] sm:$0xf0]  ;;  %v8557_v30 = vld [vmem:[#allocation4 + $0x1230] sm:$0xf0] }
 0x44e   :  { %5694 = vmatpush.bf16.msrb.mxu0 %v8368_v39  ;;  %v8477_v39 = vld [vmem:[#allocation4 + $0x1190] sm:$0xf0] }
 0x44f   :  { %v8480_v1 = vor.u32 %v9481_v29, %v8477_v39  ;;  %v9543_v39 = vld [vmem:[#allocation4 + $0x136c] sm:$0xf0] }
 0x451   :  { %5705 = vmatpush.bf16.msrb.mxu1 %v8528_v6  ;;  %v8445_v6 = vld [vmem:[#allocation4 + $0x1150] sm:$0xf0] }
 0x452   :  { %5695 = vmatpush.bf16.msrb.mxu0 %v8352_v4  ;;  %v8448_v38 = vor.u32 %v9473_v45, %v8445_v6  ;;  %v8683_v45 = vld [vmem:[#allocation4 + $0x1320] sm:$0xf]  ;;  %v9535_v6 = vld [vmem:[#allocation4 + $0x132c] sm:$0xf0] }
 0x453   :  { %v10732_v11 = vpop.f32.mrf.mxu1  ;;  %v10734_v48 = vpop.f32.mrf.mxu0 }
 0x454   :  { %v4647_v27 = vadd.f32 %v10732_v11, %v4634_v16  ;;  %v9469_v16 = vld [vmem:[#allocation4 + $0x1124] sm:$0xf] }
 0x455   :  { %5706 = vmatpush.bf16.msrb.mxu1 %v8512_v62 }
 0x459   :  { %5707 = vmatpush.bf16.msrb.mxu1 %v8496_v37 }
 0x45b   :  { %v4648_v0 = vpop.f32.mrf.mxu1  ;;  %v4687_v17 = vpop.f32.mrf.mxu0 }
 0x45c   :  { %v9445_v0 = vld [vmem:[#allocation4 + $0x1064] sm:$0xf]  ;;  %v8333_v17 = vld [vmem:[#allocation4 + $0x1070] sm:$0xf0] }
 0x45d   :  { %v8336_v60 = vor.u32 %v9445_v0, %v8333_v17  ;;  %5708 = vmatpush.bf16.msrb.mxu1 %v8480_v1  ;;  %v3977_v0 = vperm.slane %v10744_v20, 1  ;;  %v8656_v17 = vor.u32 %v9525_v46, %v8653_v58  ;;  %v9509_v1 = vld [vmem:[#allocation4 + $0x1264] sm:$0xf]  ;;  %v8700_v58 = vor.u32 %v9539_v53, %v8699_v25  ;;  %v9444_v25 = vld [vmem:[#allocation4 + $0x1054] sm:$0xf0] }
 0x45e   :  { %v8515_v53 = vld [vmem:[#allocation4 + $0x11c8] sm:$0xf] }
 0x45f   :  { %5696 = vmatpush.bf16.msrb.mxu0 %v8336_v60  ;;  %v4686_v22 = vadd.f32 %v10734_v48, %v3977_v0  ;;  %v9505_v0 = vld [vmem:[#allocation4 + $0x1244] sm:$0xf] }
 0x461   :  { %5709 = vmatpush.bf16.msrb.mxu1 %v8464_v2 }
 0x463   :  { %v10736_v18 = vpop.f32.mrf.mxu1  ;;  %5697 = vmatpush.bf16.msrb.mxu0 %v8320_v23  ;;  %v9551_v23 = vld [vmem:[#allocation4 + $0x13ac] sm:$0xf0] }
 0x464   :  { %v8748_v62 = vor.u32 %v9551_v23, %v8747_v36  ;;  %v8371_v23 = vld [vmem:[#allocation4 + $0x10a8] sm:$0xf] }
 0x465   :  { %v10738_v52 = vpop.f32.mrf.mxu0  ;;  %5710 = vmatpush.bf16.msrb.mxu1 %v8448_v38  ;;  %v9501_v38 = vld [vmem:[#allocation4 + $0x1224] sm:$0xf] }
 0x466   :  { %v4738_v7 = vadd.f32 %v10738_v52, %v3978_v14 }
 0x467   :  { %5698 = vmatpush.bf16.msrb.mxu0 %v8304_v13  ;;  %v8731_v13 = vld [vmem:[#allocation4 + $0x1380] sm:$0xf] }
 0x469   :  { %v10740_v51 = vpop.f32.mrf.mxu2 }
 0x46b   :  { %v4700_v34 = vpop.f32.mrf.mxu1  ;;  %5699 = vmatpush.bf16.msrb.mxu0 %v8288_v32 }
 0x46d   :  { %v4739_v56 = vpop.f32.mrf.mxu0 }
 0x46e   :  { %v8571_v56 = vld [vmem:[#allocation4 + $0x1240] sm:$0xf] }
 0x46f   :  { %v8572_v28 = vor.u32 %v9507_v19, %v8571_v56  ;;  %v9517_v56 = vld [vmem:[#allocation4 + $0x12a4] sm:$0xf] }
 0x471   :  { %v4661_v26 = vpop.f32.mrf.mxu2  ;;  %5671 = vmatpush.bf16.msra.mxu2 %v8572_v28  ;;  %v4699_v28 = vadd.f32 %v10736_v18, %v4686_v22  ;;  %v8416_v18 = vor.u32 %v9465_v9, %v8413_v61  ;;  %v8339_v61 = vld [vmem:[#allocation4 + $0x1068] sm:$0xf] }
 0x472   :  { %v4660_v26 = vadd.f32 %v10740_v51, %v4647_v27  ;;  %v8539_v51 = vld [vmem:[#allocation4 + $0x1200] sm:$0xf]  ;;  %v8624_v27 = vor.u32 %v9517_v56, %v8621_v57  ;;  %v9531_v56 = vld [vmem:[#allocation4 + $0x130c] sm:$0xf0]  ;;  %v9557_v57 = vld [vmem:[#allocation4 + $0x13e4] sm:$0xf] }
 0x473   :  { %v10742_v15 = vpop.f32.mrf.mxu1  ;;  %v8540_v50 = vor.u32 %v9499_v31, %v8539_v51  ;;  %v8403_v31 = vld [vmem:[#allocation4 + $0x10e8] sm:$0xf] }
 0x474   :  { %v4751_v36 = vadd.f32 %v10742_v15, %v4738_v7 }
 0x475   :  { %5672 = vmatpush.bf16.msra.mxu2 %v8556_v10 }
 0x479   :  { %v10746_v43 = vpop.f32.mrf.mxu2  ;;  %5673 = vmatpush.bf16.msra.mxu2 %v8540_v50  ;;  %v9464_v50 = vld [vmem:[#allocation4 + $0x10f4] sm:$0xf0] }
 0x47a   :  { %v4712_v48 = vadd.f32 %v10746_v43, %v4699_v28  ;;  %v8715_v43 = vld [vmem:[#allocation4 + $0x1360] sm:$0xf]  ;;  %v8404_v2 = vor.u32 %v9464_v50, %v8403_v31  ;;  %v8323_v50 = vld [vmem:[#allocation4 + $0x1048] sm:$0xf] }
 0x47b   :  { %v4752_v47 = vpop.f32.mrf.mxu1 }
 0x47c   :  { %v8763_v47 = vld [vmem:[#allocation4 + $0x13c0] sm:$0xf] }
 0x47d   :  { %v8764_v54 = vor.u32 %v9555_v3, %v8763_v47  ;;  %5718 = vmatpush.bf16.msrb.mxu2 %v8656_v17  ;;  %v8573_v17 = vld [vmem:[#allocation4 + $0x1250] sm:$0xf0]  ;;  %v8387_v3 = vld [vmem:[#allocation4 + $0x10c8] sm:$0xf] }
 0x47f   :  { %5680 = vmatpush.bf16.msra.mxu3 %v8764_v54  ;;  %v8576_v54 = vor.u32 %v9505_v0, %v8573_v17  ;;  %v8307_v0 = vld [vmem:[#allocation4 + $0x1028] sm:$0xf]  ;;  %v9545_v17 = vld [vmem:[#allocation4 + $0x1384] sm:$0xf] }
 0x481   :  { %v4713_v34 = vpop.f32.mrf.mxu2  ;;  %5719 = vmatpush.bf16.msrb.mxu2 %v8640_v59 }
 0x482   :  { %v8429_v34 = vld [vmem:[#allocation4 + $0x1130] sm:$0xf0] }
 0x483   :  { %v10749_v35 = vpop.f32.mrf.mxu0  ;;  %v8432_v12 = vor.u32 %v9469_v16, %v8429_v34  ;;  %5681 = vmatpush.bf16.msra.mxu3 %v8748_v62  ;;  %v8560_v62 = vor.u32 %v9501_v38, %v8557_v30  ;;  %v8667_v16 = vld [vmem:[#allocation4 + $0x1300] sm:$0xf] }
 0x484   :  { %v8668_v28 = vor.u32 %v9531_v56, %v8667_v16  ;;  %v8405_v56 = vld [vmem:[#allocation4 + $0x10f8] sm:$0xf0] }
 0x485   :  { %5711 = vmatpush.bf16.msrb.mxu1 %v8432_v12  ;;  %5720 = vmatpush.bf16.msrb.mxu2 %v8624_v27  ;;  %v8541_v12 = vld [vmem:[#allocation4 + $0x1210] sm:$0xf0] }
 0x489   :  { %v4672_v41 = vpop.f32.mrf.mxu3  ;;  %5712 = vmatpush.bf16.msrb.mxu1 %v8416_v18  ;;  %v9448_v18 = vld [vmem:[#allocation4 + $0x1074] sm:$0xf0] }
 0x48a   :  { %v10754_v24 = vadd.f32 %v4672_v41, %v4660_v26  ;;  %v8732_v26 = vor.u32 %v9547_v55, %v8731_v13  ;;  %v9513_v41 = vld [vmem:[#allocation4 + $0x1284] sm:$0xf] }
 0x48b   :  { %v4791_v11 = vpop.f32.mrf.mxu0  ;;  %v8608_v49 = vor.u32 %v9513_v41, %v8605_v40  ;;  %v9553_v40 = vld [vmem:[#allocation4 + $0x13c4] sm:$0xf] }
 0x48c   :  { %v4832_v44 = vsub.f32 0.0, %v10754_v24  ;;  %v10757_v33 = vpop.f32.mrf.mxu2  ;;  %5682 = vmatpush.bf16.msra.mxu3 %v8732_v26  ;;  %v8716_v11 = vor.u32 %v9543_v39, %v8715_v43  ;;  %v9452_v26 = vld [vmem:[#allocation4 + $0x1094] sm:$0xf0] }
 0x48d   :  { %5721 = vmatpush.bf16.msrb.mxu2 %v8608_v49  ;;  %v4764_v52 = vadd.f32 %v10757_v33, %v4751_v36  ;;  %v8765_v49 = vld [vmem:[#allocation4 + $0x13d0] sm:$0xf0]  ;;  %v9496_v43 = vld [vmem:[#allocation4 + $0x11f4] sm:$0xf0] }
 0x48e   :  { %v4836_v4 = vmul.f32 1.442695, %v4832_v44  ;;  %v8589_v44 = vld [vmem:[#allocation4 + $0x1270] sm:$0xf0]  ;;  %v8768_v39 = vor.u32 %v9553_v40, %v8765_v49 }
 0x48f   :  { %v8592_v8 = vor.u32 %v9509_v1, %v8589_v44  ;;  %v8717_v36 = vld [vmem:[#allocation4 + $0x1370] sm:$0xf0] }
 0x490   :  { %9664 = vpow2.f32 %v4836_v4  ;;  %5683 = vmatpush.bf16.msra.mxu3 %v8716_v11 }
 0x491   :  { %v4674_v60 = vpop.f32.mrf.mxu3  ;;  %5722 = vmatpush.bf16.msrb.mxu2 %v8592_v8  ;;  %v9549_v8 = vld [vmem:[#allocation4 + $0x13a4] sm:$0xf] }
 0x492   :  { %v9460_v60 = vld [vmem:[#allocation4 + $0x10d4] sm:$0xf0] }
 0x493   :  { %v10761_v63 = vpop.f32.mrf.mxu1  ;;  %v8388_v59 = vor.u32 %v9460_v60, %v8387_v3  ;;  %v8733_v3 = vld [vmem:[#allocation4 + $0x1390] sm:$0xf0] }
 0x494   :  { %v4765_v5 = vpop.f32.mrf.mxu2  ;;  %5684 = vmatpush.bf16.msra.mxu3 %v8700_v58  ;;  %v8736_v7 = vor.u32 %v9545_v17, %v8733_v3  ;;  %v9450_v17 = vld [vmem:[#allocation4 + $0x108c] sm:$0xf]  ;;  %v8357_v3 = vld [vmem:[#allocation4 + $0x1098] sm:$0xf0] }
 0x495   :  { %v9456_v5 = vld [vmem:[#allocation4 + $0x10b4] sm:$0xf0]  ;;  %5723 = vmatpush.bf16.msrb.mxu2 %v8576_v54 }
 0x496   :  { %v9665_v19 = vpop.eup %9664  ;;  %v9440_v54 = vld [vmem:[#allocation4 + $0x1034] sm:$0xf0] }
 0x497   :  { %v4844_v21 = vadd.f32 1.0, %v9665_v19  ;;  %v9497_v19 = vld [vmem:[#allocation4 + $0x1204] sm:$0xf]  ;;  %v8308_v38 = vor.u32 %v9440_v54, %v8307_v0  ;;  %v9520_v0 = vld [vmem:[#allocation4 + $0x12b4] sm:$0xf0] }
 0x498   :  { %v8544_v9 = vor.u32 %v9497_v19, %v8541_v12  ;;  %v3979_v19 = vperm.slane %v10744_v20, 3  ;;  %v9537_v12 = vld [vmem:[#allocation4 + $0x1344] sm:$0xf]  ;;  %v8685_v20 = vld [vmem:[#allocation4 + $0x1330] sm:$0xf0] }
 0x499   :  { %9666 = vrcp.f32 %v4844_v21  ;;  %v4724_v37 = vpop.f32.mrf.mxu3  ;;  %v8781_v21 = vld [vmem:[#allocation4 + $0x13f0] sm:$0xf0]  ;;  %5724 = vmatpush.bf16.msrb.mxu2 %v8560_v62  ;;  %v9484_v62 = vld [vmem:[#allocation4 + $0x1194] sm:$0xf0] }
 0x49a   :  { %v10765_v10 = vadd.f32 %v4724_v37, %v4712_v48  ;;  %v8372_v48 = vor.u32 %v9456_v5, %v8371_v23  ;;  %v8784_v15 = vor.u32 %v9557_v57, %v8781_v21  ;;  %v8355_v37 = vld [vmem:[#allocation4 + $0x1088] sm:$0xf]  ;;  %v9436_v23 = vld [vmem:[#allocation4 + $0x1014] sm:$0xf0]  ;;  %v8701_v57 = vld [vmem:[#allocation4 + $0x1350] sm:$0xf0]  ;;  %v4790_v40 = vadd.f32 %v10749_v35, %v3979_v19 }
 0x49b   :  { %v4804_v32 = vpop.f32.mrf.mxu1  ;;  %v8356_v41 = vor.u32 %v9452_v26, %v8355_v37  ;;  %v8483_v5 = vld [vmem:[#allocation4 + $0x1188] sm:$0xf]  ;;  %v8704_v37 = vor.u32 %v9537_v12, %v8701_v57  ;;  %v9529_v35 = vld [vmem:[#allocation4 + $0x1304] sm:$0xf]  ;;  %v9442_v12 = vld [vmem:[#allocation4 + $0x104c] sm:$0xf] }
 0x49c   :  { %v4833_v29 = vsub.f32 0.0, %v10765_v10  ;;  %v8531_v32 = vld [vmem:[#allocation4 + $0x11e8] sm:$0xf]  ;;  %v8325_v57 = vld [vmem:[#allocation4 + $0x1058] sm:$0xf0] }
 0x49d   :  { %5725 = vmatpush.bf16.msrb.mxu2 %v8544_v9  ;;  %v8532_v31 = vor.u32 %v9496_v43, %v8531_v32  ;;  %v9528_v9 = vld [vmem:[#allocation4 + $0x12f4] sm:$0xf0]  ;;  %v8595_v19 = vld [vmem:[#allocation4 + $0x1268] sm:$0xf] }
 0x49e   :  { %v4838_v51 = vmul.f32 1.442695, %v4833_v29 }
 0x49f   :  { %v9667_v42 = vpop.eup %9666 }
 0x4a0   :  { %v4852_v4 = vmul.f32 %v9667_v42, %v10754_v24  ;;  %9668 = vpow2.f32 %v4838_v51  ;;  %v8684_v24 = vor.u32 %v9535_v6, %v8683_v45  ;;  %v8340_v51 = vor.u32 %v9448_v18, %v8339_v61  ;;  %v8749_v42 = vld [vmem:[#allocation4 + $0x13b0] sm:$0xf0]  ;;  %v8499_v45 = vld [vmem:[#allocation4 + $0x11a8] sm:$0xf]  ;;  %v9488_v6 = vld [vmem:[#allocation4 + $0x11b4] sm:$0xf0] }
 0x4a1   :  { %v4726_v46 = vpop.f32.mrf.mxu3  ;;  %v8500_v30 = vor.u32 %v9488_v6, %v8499_v45  ;;  %v8389_v61 = vld [vmem:[#allocation4 + $0x10d8] sm:$0xf0]  ;;  %v9533_v18 = vld [vmem:[#allocation4 + $0x1324] sm:$0xf]  ;;  %v8419_v45 = vld [vmem:[#allocation4 + $0x1108] sm:$0xf] }
 0x4a2   :  { %v10770_v47 = vpack.c.bf16 %v4852_v4, %v4852_v4  ;;  %5685 = vmatpush.bf16.msra.mxu3 %v8684_v24  ;;  %v9492_v46 = vld [vmem:[#allocation4 + $0x11d4] sm:$0xf0] }
 0x4a3   :  { %v8516_v58 = vor.u32 %v9492_v46, %v8515_v53  ;;  %v8435_v46 = vld [vmem:[#allocation4 + $0x1128] sm:$0xf] }
 0x4a4   :  { %5648 = vmatmul.bf16.vlgmr.msra.gmra.mxu0 %v10770_v47 }
 0x4a5   :  { %5744 = vmatpush.bf16.msra.mxu0 %v8404_v2  ;;  %v8752_v2 = vor.u32 %v9549_v8, %v8749_v42  ;;  %v8669_v8 = vld [vmem:[#allocation4 + $0x1310] sm:$0xf0] }
 0x4a6   :  { %v9669_v22 = vpop.eup %9668  ;;  %5686 = vmatpush.bf16.msra.mxu3 %v8668_v28  ;;  %v8484_v28 = vor.u32 %v9484_v62, %v8483_v5  ;;  %v8533_v5 = vld [vmem:[#allocation4 + $0x11f8] sm:$0xf0] }
 0x4a7   :  { %v4845_v34 = vadd.f32 1.0, %v9669_v22  ;;  %v9541_v22 = vld [vmem:[#allocation4 + $0x1364] sm:$0xf] }
 0x4a8   :  { %v8720_v16 = vor.u32 %v9541_v22, %v8717_v36  ;;  %v9446_v22 = vld [vmem:[#allocation4 + $0x106c] sm:$0xf]  ;;  %v8341_v36 = vld [vmem:[#allocation4 + $0x1078] sm:$0xf0] }
 0x4a9   :  { %9670 = vrcp.f32 %v4845_v34  ;;  %5745 = vmatpush.bf16.msra.mxu0 %v8388_v59  ;;  %v4776_v27 = vpop.f32.mrf.mxu3  ;;  %v8291_v59 = vld [vmem:[#allocation4 + $0x1008] sm:$0xf]  ;;  %v9462_v34 = vld [vmem:[#allocation4 + $0x10ec] sm:$0xf] }
 0x4aa   :  { %v10776_v13 = vadd.f32 %v4776_v27, %v4764_v52  ;;  %v10778_v55 = vpop.f32.mrf.mxu2  ;;  %5731 = vmatpush.bf16.msrb.mxu3 %v8784_v15  ;;  %v8292_v52 = vor.u32 %v9436_v23, %v8291_v59  ;;  %v8408_v21 = vor.u32 %v9462_v34, %v8405_v56  ;;  %v8467_v27 = vld [vmem:[#allocation4 + $0x1168] sm:$0xf]  ;;  %v9494_v23 = vld [vmem:[#allocation4 + $0x11ec] sm:$0xf]  ;;  %v8344_v56 = vor.u32 %v9446_v22, %v8341_v36 }
 0x4ab   :  { %v8659_v15 = vld [vmem:[#allocation4 + $0x12e8] sm:$0xf] }
 0x4ac   :  { %v4834_v33 = vsub.f32 0.0, %v10776_v13  ;;  %v8660_v32 = vor.u32 %v9528_v9, %v8659_v15  ;;  %v8328_v15 = vor.u32 %v9442_v12, %v8325_v57  ;;  %v8755_v36 = vld [vmem:[#allocation4 + $0x13a8] sm:$0xf]  ;;  %v9466_v12 = vld [vmem:[#allocation4 + $0x110c] sm:$0xf] }
 0x4ad   :  { %5746 = vmatpush.bf16.msra.mxu0 %v8372_v48  ;;  %v9480_v48 = vld [vmem:[#allocation4 + $0x1174] sm:$0xf0]  ;;  %v8421_v57 = vld [vmem:[#allocation4 + $0x1118] sm:$0xf0] }
 0x4ae   :  { %v4840_v29 = vmul.f32 1.442695, %v4834_v33  ;;  %5732 = vmatpush.bf16.msrb.mxu3 %v8768_v39  ;;  %v9458_v33 = vld [vmem:[#allocation4 + $0x10cc] sm:$0xf]  ;;  %v8468_v49 = vor.u32 %v9480_v48, %v8467_v27  ;;  %v8451_v39 = vld [vmem:[#allocation4 + $0x1148] sm:$0xf] }
 0x4af   :  { %v9671_v11 = vpop.eup %9670  ;;  %v8392_v43 = vor.u32 %v9458_v33, %v8389_v61  ;;  %v8517_v27 = vld [vmem:[#allocation4 + $0x11d8] sm:$0xf0]  ;;  %v9508_v33 = vld [vmem:[#allocation4 + $0x1254] sm:$0xf0]  ;;  %v9438_v61 = vld [vmem:[#allocation4 + $0x102c] sm:$0xf] }
 0x4b0   :  { %v4853_v1 = vmul.f32 %v9671_v11, %v10765_v10  ;;  %9672 = vpow2.f32 %v4840_v29  ;;  %v8324_v10 = vor.u32 %v9444_v25, %v8323_v50  ;;  %v9476_v11 = vld [vmem:[#allocation4 + $0x1154] sm:$0xf0]  ;;  %v8688_v50 = vor.u32 %v9533_v18, %v8685_v20  ;;  %v9486_v20 = vld [vmem:[#allocation4 + $0x11ac] sm:$0xf] }
 0x4b1   :  { %5747 = vmatpush.bf16.msra.mxu0 %v8356_v41  ;;  %v4778_v44 = vpop.f32.mrf.mxu3 }
 0x4b2   :  { %v10782_v14 = vpack.c.bf16 %v4853_v1, %v4853_v1  ;;  %v4817_v4 = vpop.f32.mrf.mxu2  ;;  %5733 = vmatpush.bf16.msrb.mxu3 %v8752_v2  ;;  %v8643_v1 = vld [vmem:[#allocation4 + $0x12c8] sm:$0xf]  ;;  %v4803_v44 = vadd.f32 %v10761_v63, %v4790_v40  ;;  %v9472_v2 = vld [vmem:[#allocation4 + $0x1134] sm:$0xf0]  ;;  %v8501_v40 = vld [vmem:[#allocation4 + $0x11b8] sm:$0xf0] }
 0x4b3   :  { %v8452_v4 = vor.u32 %v9476_v11, %v8451_v39  ;;  %v8436_v54 = vor.u32 %v9472_v2, %v8435_v46  ;;  %v8504_v39 = vor.u32 %v9486_v20, %v8501_v40  ;;  %v9504_v11 = vld [vmem:[#allocation4 + $0x1234] sm:$0xf0]  ;;  %v8469_v46 = vld [vmem:[#allocation4 + $0x1178] sm:$0xf0]  ;;  %v9526_v2 = vld [vmem:[#allocation4 + $0x12ec] sm:$0xf] }
 0x4b4   :  { %5661 = vmatmul.bf16.vlgmr.msra.gmra.mxu1 %v10782_v14  ;;  %5700 = vmatmul.bf16.vlgmr.msrb.gmra.mxu0 %v10770_v47  ;;  %v4816_v42 = vadd.f32 %v10778_v55, %v4803_v44  ;;  %v8293_v44 = vld [vmem:[#allocation4 + $0x1018] sm:$0xf0]  ;;  %v8707_v20 = vld [vmem:[#allocation4 + $0x1348] sm:$0xf]  ;;  %v9540_v40 = vld [vmem:[#allocation4 + $0x1354] sm:$0xf0] }
 0x4b5   :  { %5748 = vmatpush.bf16.msra.mxu0 %v8340_v51  ;;  %5757 = vmatpush.bf16.msra.mxu1 %v8532_v31  ;;  %v9524_v51 = vld [vmem:[#allocation4 + $0x12d4] sm:$0xf0]  ;;  %v8373_v31 = vld [vmem:[#allocation4 + $0x10b8] sm:$0xf0] }
 0x4b6   :  { %v9673_v60 = vpop.eup %9672  ;;  %5734 = vmatpush.bf16.msrb.mxu3 %v8736_v7  ;;  %v8644_v63 = vor.u32 %v9524_v51, %v8643_v1  ;;  %v8360_v7 = vor.u32 %v9450_v17, %v8357_v3  ;;  %v9434_v1 = vld [vmem:[#allocation4 + $0x100c] sm:$0xf] }
 0x4b7   :  { %v4846_v24 = vadd.f32 1.0, %v9673_v60  ;;  %v8672_v60 = vor.u32 %v9529_v35, %v8669_v8  ;;  %v9482_v51 = vld [vmem:[#allocation4 + $0x118c] sm:$0xf]  ;;  %v8547_v35 = vld [vmem:[#allocation4 + $0x1208] sm:$0xf] }
 0x4b8   :  { %v9500_v8 = vld [vmem:[#allocation4 + $0x1214] sm:$0xf0] }
 0x4b9   :  { %9674 = vrcp.f32 %v4846_v24  ;;  %5749 = vmatpush.bf16.msra.mxu0 %v8324_v10  ;;  %5758 = vmatpush.bf16.msra.mxu1 %v8516_v58  ;;  %v8627_v10 = vld [vmem:[#allocation4 + $0x12a8] sm:$0xf]  ;;  %v9468_v24 = vld [vmem:[#allocation4 + $0x1114] sm:$0xf0]  ;;  %v8548_v17 = vor.u32 %v9500_v8, %v8547_v35  ;;  %v9498_v8 = vld [vmem:[#allocation4 + $0x120c] sm:$0xf] }
 0x4ba   :  { %5735 = vmatpush.bf16.msrb.mxu3 %v8720_v16  ;;  %v8628_v6 = vor.u32 %v9520_v0, %v8627_v10  ;;  %v8420_v62 = vor.u32 %v9468_v24, %v8419_v45  ;;  %v8661_v10 = vld [vmem:[#allocation4 + $0x12f8] sm:$0xf0]  ;;  %v8771_v45 = vld [vmem:[#allocation4 + $0x13c8] sm:$0xf]  ;;  %v9532_v35 = vld [vmem:[#allocation4 + $0x1314] sm:$0xf0] }
 0x4bb   :  { %v8453_v24 = vld [vmem:[#allocation4 + $0x1158] sm:$0xf0] }
 0x4bd   :  { %5750 = vmatpush.bf16.msra.mxu0 %v8308_v38  ;;  %5759 = vmatpush.bf16.msra.mxu1 %v8500_v30  ;;  %v8611_v38 = vld [vmem:[#allocation4 + $0x1288] sm:$0xf]  ;;  %v9516_v30 = vld [vmem:[#allocation4 + $0x1294] sm:$0xf0] }
 0x4be   :  { %5736 = vmatpush.bf16.msrb.mxu3 %v8704_v37  ;;  %v8612_v34 = vor.u32 %v9516_v30, %v8611_v38  ;;  %v8579_v37 = vld [vmem:[#allocation4 + $0x1248] sm:$0xf]  ;;  %v9522_v38 = vld [vmem:[#allocation4 + $0x12cc] sm:$0xf]  ;;  %v8645_v30 = vld [vmem:[#allocation4 + $0x12d8] sm:$0xf0] }
 0x4bf   :  { %v9675_v26 = vpop.eup %9674  ;;  %v8648_v22 = vor.u32 %v9522_v38, %v8645_v30  ;;  %v9538_v38 = vld [vmem:[#allocation4 + $0x134c] sm:$0xf]  ;;  %v8709_v30 = vld [vmem:[#allocation4 + $0x1358] sm:$0xf0] }
 0x4c0   :  { %v4854_v41 = vmul.f32 %v9675_v26, %v10776_v13  ;;  %v9454_v13 = vld [vmem:[#allocation4 + $0x10ac] sm:$0xf] }
 0x4c1   :  { %5751 = vmatpush.bf16.msra.mxu0 %v8292_v52  ;;  %5760 = vmatpush.bf16.msra.mxu1 %v8484_v28  ;;  %v8376_v53 = vor.u32 %v9454_v13, %v8373_v31  ;;  %v8536_v52 = vor.u32 %v9494_v23, %v8533_v5  ;;  %v9512_v28 = vld [vmem:[#allocation4 + $0x1274] sm:$0xf0]  ;;  %v8485_v13 = vld [vmem:[#allocation4 + $0x1198] sm:$0xf0]  ;;  %v9470_v5 = vld [vmem:[#allocation4 + $0x112c] sm:$0xf] }
 0x4c2   :  { %v10789_v29 = vpack.c.bf16 %v4854_v41, %v4854_v41  ;;  %5737 = vmatpush.bf16.msrb.mxu3 %v8688_v50  ;;  %v8596_v48 = vor.u32 %v9512_v28, %v8595_v19  ;;  %v8309_v41 = vld [vmem:[#allocation4 + $0x1038] sm:$0xf0]  ;;  %v8296_v50 = vor.u32 %v9434_v1, %v8293_v44  ;;  %v9552_v23 = vld [vmem:[#allocation4 + $0x13b4] sm:$0xf0]  ;;  %v9502_v44 = vld [vmem:[#allocation4 + $0x122c] sm:$0xf] }
 0x4c3   :  { %v9548_v28 = vld [vmem:[#allocation4 + $0x1394] sm:$0xf0] }
 0x4c4   :  { %5674 = vmatmul.bf16.vlgmr.msra.gmra.mxu2 %v10789_v29  ;;  %5713 = vmatmul.bf16.vlgmr.msrb.gmra.mxu1 %v10782_v14  ;;  %v9536_v1 = vld [vmem:[#allocation4 + $0x1334] sm:$0xf0] }
 0x4c5   :  { %5796 = vmatpush.bf16.msrb.mxu0 %v8408_v21  ;;  %5761 = vmatpush.bf16.msra.mxu1 %v8468_v49  ;;  %v9490_v21 = vld [vmem:[#allocation4 + $0x11cc] sm:$0xf]  ;;  %v8580_v49 = vor.u32 %v9508_v33, %v8579_v37 }
 0x4c6   :  { %5752 = vmatmul.bf16.vlgmr.msra.gmra.mxu0 %v10770_v47  ;;  %5770 = vmatpush.bf16.msra.mxu2 %v8660_v32  ;;  %v8520_v9 = vor.u32 %v9490_v21, %v8517_v27  ;;  %v8312_v32 = vor.u32 %v9438_v61, %v8309_v41  ;;  %v9514_v21 = vld [vmem:[#allocation4 + $0x128c] sm:$0xf]  ;;  %v8613_v27 = vld [vmem:[#allocation4 + $0x1298] sm:$0xf0] }
 0x4c7   :  { %5738 = vmatpush.bf16.msrb.mxu3 %v8672_v60  ;;  %v8616_v37 = vor.u32 %v9514_v21, %v8613_v27  ;;  %v9510_v33 = vld [vmem:[#allocation4 + $0x126c] sm:$0xf]  ;;  %v8597_v61 = vld [vmem:[#allocation4 + $0x1278] sm:$0xf0] }
 0x4c9   :  { %v4828_v25 = vpop.f32.mrf.mxu3  ;;  %5797 = vmatpush.bf16.msrb.mxu0 %v8392_v43  ;;  %5762 = vmatpush.bf16.msra.mxu1 %v8452_v4  ;;  %v8563_v43 = vld [vmem:[#allocation4 + $0x1228] sm:$0xf] }
 0x4ca   :  { %v10796_v58 = vadd.f32 %v4828_v25, %v4816_v42  ;;  %5771 = vmatpush.bf16.msra.mxu2 %v8644_v63  ;;  %v8564_v31 = vor.u32 %v9504_v11, %v8563_v43  ;;  %v8488_v42 = vor.u32 %v9482_v51, %v8485_v13  ;;  %v8787_v4 = vld [vmem:[#allocation4 + $0x13e8] sm:$0xf]  ;;  %v9560_v25 = vld [vmem:[#allocation4 + $0x13f4] sm:$0xf0]  ;;  %v9478_v63 = vld [vmem:[#allocation4 + $0x116c] sm:$0xf]  ;;  %v8708_v43 = vor.u32 %v9540_v40, %v8707_v20 }
 0x4cb   :  { %v8788_v3 = vor.u32 %v9560_v25, %v8787_v4  ;;  %v8691_v11 = vld [vmem:[#allocation4 + $0x1328] sm:$0xf]  ;;  %v8565_v51 = vld [vmem:[#allocation4 + $0x1238] sm:$0xf0]  ;;  %v9558_v4 = vld [vmem:[#allocation4 + $0x13ec] sm:$0xf] }
 0x4cc   :  { %v4835_v55 = vsub.f32 0.0, %v10796_v58  ;;  %v8692_v13 = vor.u32 %v9536_v1, %v8691_v11  ;;  %v8789_v25 = vld [vmem:[#allocation4 + $0x13f8] sm:$0xf0]  ;;  %v9563_v20 = vld [vmem:[#allocation7 + $0x10] sm:$0xff] }
 0x4cd   :  { %5798 = vmatpush.bf16.msrb.mxu0 %v8376_v53  ;;  %5763 = vmatpush.bf16.msra.mxu1 %v8436_v54  ;;  %v8664_v54 = vor.u32 %v9526_v2, %v8661_v10  ;;  %v8773_v2 = vld [vmem:[#allocation4 + $0x13d8] sm:$0xf0]  ;;  %v9575_v40 = vld [vmem:[#allocation7 + $0x70] sm:$0xff] }
 0x4ce   :  { %v4842_v59 = vmul.f32 1.442695, %v4835_v55  ;;  %5772 = vmatpush.bf16.msra.mxu2 %v8628_v6  ;;  %v8472_v55 = vor.u32 %v9478_v63, %v8469_v46  ;;  %v9556_v6 = vld [vmem:[#allocation4 + $0x13d4] sm:$0xf0]  ;;  %v9554_v46 = vld [vmem:[#allocation4 + $0x13cc] sm:$0xf] }
 0x4cf   :  { %v8776_v10 = vor.u32 %v9554_v46, %v8773_v2  ;;  %v9583_v46 = vld [vmem:[#allocation7 + $0xb0] sm:$0xff] }
 0x4d0   :  { %9676 = vpow2.f32 %v4842_v59 }
 0x4d1   :  { %v4830_v16 = vpop.f32.mrf.mxu3  ;;  %5799 = vmatpush.bf16.msrb.mxu0 %v8360_v7  ;;  %5764 = vmatpush.bf16.msra.mxu1 %v8420_v62  ;;  %v9474_v7 = vld [vmem:[#allocation4 + $0x114c] sm:$0xf]  ;;  %v8437_v62 = vld [vmem:[#allocation4 + $0x1138] sm:$0xf0] }
 0x4d2   :  { %5773 = vmatpush.bf16.msra.mxu2 %v8612_v34  ;;  %v8456_v59 = vor.u32 %v9474_v7, %v8453_v24  ;;  %v9518_v16 = vld [vmem:[#allocation4 + $0x12ac] sm:$0xf]  ;;  %v8629_v34 = vld [vmem:[#allocation4 + $0x12b8] sm:$0xf0] }
 0x4d3   :  { %v8632_v19 = vor.u32 %v9518_v16, %v8629_v34  ;;  %v8725_v7 = vld [vmem:[#allocation4 + $0x1378] sm:$0xf0] }
 0x4d4   :  { %5726 = vmatmul.bf16.vlgmr.msrb.gmra.mxu2 %v10789_v29  ;;  %5765 = vmatmul.bf16.vlgmr.msra.gmra.mxu1 %v10782_v14 }
 0x4d5   :  { %5800 = vmatpush.bf16.msrb.mxu0 %v8344_v56  ;;  %5809 = vmatpush.bf16.msrb.mxu1 %v8536_v52  ;;  %v8756_v56 = vor.u32 %v9552_v23, %v8755_v36  ;;  %v8739_v52 = vld [vmem:[#allocation4 + $0x1388] sm:$0xf]  ;;  %v9530_v23 = vld [vmem:[#allocation4 + $0x130c] sm:$0xf] }
 0x4d6   :  { %v9677_v26 = vpop.eup %9676  ;;  %5774 = vmatpush.bf16.msra.mxu2 %v8596_v48  ;;  %v8740_v48 = vor.u32 %v9548_v28, %v8739_v52  ;;  %v9568_v52 = vld [vmem:[#allocation7 + $0x38] sm:$0xff] }
 0x4d7   :  { %v4847_v18 = vadd.f32 1.0, %v9677_v26  ;;  %v8723_v26 = vld [vmem:[#allocation4 + $0x1368] sm:$0xf] }
 0x4d9   :  { %9678 = vrcp.f32 %v4847_v18  ;;  %5801 = vmatpush.bf16.msrb.mxu0 %v8328_v15  ;;  %5810 = vmatpush.bf16.msrb.mxu1 %v8520_v9  ;;  %v8424_v15 = vor.u32 %v9466_v12, %v8421_v57  ;;  %v9544_v9 = vld [vmem:[#allocation4 + $0x1374] sm:$0xf0]  ;;  %v8600_v18 = vor.u32 %v9510_v33, %v8597_v61  ;;  %v9576_v33 = vld [vmem:[#allocation7 + $0x78] sm:$0xff] }
 0x4da   :  { %5775 = vmatpush.bf16.msra.mxu2 %v8580_v49  ;;  %v8724_v41 = vor.u32 %v9544_v9, %v8723_v26  ;;  %v9506_v49 = vld [vmem:[#allocation4 + $0x124c] sm:$0xf]  ;;  %v9565_v26 = vld [vmem:[#allocation7 + $0x20] sm:$0xff] }
 0x4db   :  { %v9564_v9 = vld [vmem:[#allocation7 + $0x18] sm:$0xff] }
 0x4dd   :  { %5802 = vmatpush.bf16.msrb.mxu0 %v8312_v32  ;;  %5811 = vmatpush.bf16.msrb.mxu1 %v8504_v39  ;;  %v8581_v32 = vld [vmem:[#allocation4 + $0x1258] sm:$0xf0] }
 0x4de   :  { %5776 = vmatpush.bf16.msra.mxu2 %v8564_v31  ;;  %v8584_v39 = vor.u32 %v9506_v49, %v8581_v32  ;;  %v8568_v31 = vor.u32 %v9502_v44, %v8565_v51  ;;  %v9561_v51 = vld [vmem:[#allocation7] sm:$0xff] }
 0x4df   :  { %v9679_v53 = vpop.eup %9678 }
 0x4e0   :  { %v4855_v0 = vmul.f32 %v9679_v53, %v10796_v58  ;;  %v8772_v58 = vor.u32 %v9556_v6, %v8771_v45  ;;  %v8792_v53 = vor.u32 %v9558_v4, %v8789_v25  ;;  %v9542_v6 = vld [vmem:[#allocation4 + $0x136c] sm:$0xf] }
 0x4e1   :  { %5803 = vmatpush.bf16.msrb.mxu0 %v8296_v50  ;;  %5812 = vmatpush.bf16.msrb.mxu1 %v8488_v42  ;;  %v8675_v50 = vld [vmem:[#allocation4 + $0x1308] sm:$0xf]  ;;  %v8549_v42 = vld [vmem:[#allocation4 + $0x1218] sm:$0xf0]  ;;  %v8728_v24 = vor.u32 %v9542_v6, %v8725_v7  ;;  %v9584_v4 = vld [vmem:[#allocation7 + $0xb8] sm:$0xff] }
 0x4e2   :  { %v10802_v60 = vpack.c.bf16 %v4855_v0, %v4855_v0  ;;  %5777 = vmatpush.bf16.msra.mxu2 %v8548_v17  ;;  %v8676_v63 = vor.u32 %v9532_v35, %v8675_v50  ;;  %v9550_v0 = vld [vmem:[#allocation4 + $0x13ac] sm:$0xf]  ;;  %v8757_v17 = vld [vmem:[#allocation4 + $0x13b8] sm:$0xf0] }
 0x4e4   :  { %5687 = vmatmul.bf16.vlgmr.msra.gmra.mxu3 %v10802_v60  ;;  %5804 = vmatmul.bf16.vlgmr.msrb.gmra.mxu0 %v10770_v47  ;;  %v8440_v47 = vor.u32 %v9470_v5, %v8437_v62 }
 0x4e5   :  { %5783 = vmatpush.bf16.msra.mxu3 %v8788_v3  ;;  %5813 = vmatpush.bf16.msrb.mxu1 %v8472_v55  ;;  %v8760_v3 = vor.u32 %v9550_v0, %v8757_v17  ;;  %v9546_v55 = vld [vmem:[#allocation4 + $0x138c] sm:$0xf]  ;;  %v9570_v0 = vld [vmem:[#allocation7 + $0x48] sm:$0xff] }
 0x4e6   :  { %5822 = vmatpush.bf16.msrb.mxu2 %v8664_v54  ;;  %v8741_v54 = vld [vmem:[#allocation4 + $0x1398] sm:$0xf0]  ;;  %6136 = vmatpush.bf16.msra.mxu0 %v9568_v52  ;;  %v9592_v52 = vld [vmem:[#allocation7 + $0xf8] sm:$0xff] }
 0x4e7   :  { %5778 = vmatmul.bf16.vlgmr.msra.gmra.mxu2 %v10789_v29  ;;  %v8744_v45 = vor.u32 %v9546_v55, %v8741_v54  ;;  %v9582_v17 = vld [vmem:[#allocation7 + $0xa8] sm:$0xff] }
 0x4e9   :  { %5784 = vmatpush.bf16.msra.mxu3 %v8772_v58  ;;  %5814 = vmatpush.bf16.msrb.mxu1 %v8456_v59  ;;  %v8712_v58 = vor.u32 %v9538_v38, %v8709_v30  ;;  %v9534_v59 = vld [vmem:[#allocation4 + $0x132c] sm:$0xf]  ;;  %v9581_v38 = vld [vmem:[#allocation7 + $0xa0] sm:$0xff] }
 0x4ea   :  { %5823 = vmatpush.bf16.msrb.mxu2 %v8648_v22  ;;  %v8693_v22 = vld [vmem:[#allocation4 + $0x1338] sm:$0xf0] }
 0x4eb   :  { %v8696_v36 = vor.u32 %v9534_v59, %v8693_v22  ;;  %v9580_v22 = vld [vmem:[#allocation7 + $0x98] sm:$0xff] }
 0x4ed   :  { %5785 = vmatpush.bf16.msra.mxu3 %v8756_v56  ;;  %5815 = vmatpush.bf16.msrb.mxu1 %v8440_v47 }
 0x4ee   :  { %5824 = vmatpush.bf16.msrb.mxu2 %v8632_v19 }
 0x4f1   :  { %5786 = vmatpush.bf16.msra.mxu3 %v8740_v48  ;;  %5816 = vmatpush.bf16.msrb.mxu1 %v8424_v15  ;;  %v9567_v48 = vld [vmem:[#allocation7 + $0x30] sm:$0xff]  ;;  %v9566_v15 = vld [vmem:[#allocation7 + $0x28] sm:$0xff] }
 0x4f2   :  { %5825 = vmatpush.bf16.msrb.mxu2 %v8616_v37  ;;  %6137 = vmatpush.bf16.msra.mxu0 %v9567_v48 }
 0x4f4   :  { %5739 = vmatmul.bf16.vlgmr.msrb.gmra.mxu3 %v10802_v60  ;;  %5817 = vmatmul.bf16.vlgmr.msrb.gmra.mxu1 %v10782_v14  ;;  %v8552_v14 = vor.u32 %v9498_v8, %v8549_v42  ;;  %v9572_v42 = vld [vmem:[#allocation7 + $0x58] sm:$0xff] }
 0x4f5   :  { %5787 = vmatpush.bf16.msra.mxu3 %v8724_v41  ;;  %v10818_v41 = vld [vmem:[#allocation6 + $0x10] sm:$0xf]  ;;  %6149 = vmatpush.bf16.msra.mxu1 %v9576_v33  ;;  %v9591_v33 = vld [vmem:[#allocation7 + $0xf0] sm:$0xff] }
 0x4f6   :  { %5826 = vmatpush.bf16.msrb.mxu2 %v8600_v18  ;;  %6138 = vmatpush.bf16.msra.mxu0 %v9566_v15  ;;  %v4992_v49 = vperm.slane %v10818_v41, 0  ;;  %v4993_v2 = vperm.slane %v10818_v41, 1 }
 0x4f9   :  { %5788 = vmatpush.bf16.msra.mxu3 %v8708_v43  ;;  %6150 = vmatpush.bf16.msra.mxu1 %v9575_v40  ;;  %v9562_v43 = vld [vmem:[#allocation7 + $0x8] sm:$0xff] }
 0x4fa   :  { %5827 = vmatpush.bf16.msrb.mxu2 %v8584_v39  ;;  %6139 = vmatpush.bf16.msra.mxu0 %v9565_v26  ;;  %v9574_v39 = vld [vmem:[#allocation7 + $0x68] sm:$0xff] }
 0x4fd   :  { %5789 = vmatpush.bf16.msra.mxu3 %v8692_v13  ;;  %6151 = vmatpush.bf16.msra.mxu1 %v9574_v39  ;;  %v9573_v13 = vld [vmem:[#allocation7 + $0x60] sm:$0xff] }
 0x4fe   :  { %5828 = vmatpush.bf16.msrb.mxu2 %v8568_v31  ;;  %6140 = vmatpush.bf16.msra.mxu0 %v9564_v9 }
 0x501   :  { %5790 = vmatpush.bf16.msra.mxu3 %v8676_v63  ;;  %6152 = vmatpush.bf16.msra.mxu1 %v9573_v13  ;;  %v4995_v13 = vperm.slane %v10818_v41, 3 }
 0x502   :  { %5829 = vmatpush.bf16.msrb.mxu2 %v8552_v14  ;;  %6141 = vmatpush.bf16.msra.mxu0 %v9563_v20 }
 0x504   :  { %5791 = vmatmul.bf16.vlgmr.msra.gmra.mxu3 %v10802_v60 }
 0x505   :  { %5835 = vmatpush.bf16.msrb.mxu3 %v8792_v53  ;;  %5830 = vmatmul.bf16.vlgmr.msrb.gmra.mxu2 %v10789_v29  ;;  %v8677_v29 = vld [vmem:[#allocation4 + $0x1318] sm:$0xf0]  ;;  %v9571_v53 = vld [vmem:[#allocation7 + $0x50] sm:$0xff] }
 0x506   :  { %v8680_v5 = vor.u32 %v9530_v23, %v8677_v29  ;;  %6142 = vmatpush.bf16.msra.mxu0 %v9562_v43  ;;  %6153 = vmatpush.bf16.msra.mxu1 %v9572_v42  ;;  %v9585_v42 = vld [vmem:[#allocation7 + $0xc0] sm:$0xff] }
 0x507   :  { %6162 = vmatpush.bf16.msra.mxu2 %v9584_v4 }
 0x509   :  { %5836 = vmatpush.bf16.msrb.mxu3 %v8776_v10 }
 0x50a   :  { %6143 = vmatpush.bf16.msra.mxu0 %v9561_v51  ;;  %6154 = vmatpush.bf16.msra.mxu1 %v9571_v53  ;;  %v9587_v51 = vld [vmem:[#allocation7 + $0xd0] sm:$0xff] }
 0x50b   :  { %6163 = vmatpush.bf16.msra.mxu2 %v9583_v46 }
 0x50d   :  { %5837 = vmatpush.bf16.msrb.mxu3 %v8760_v3 }
 0x50e   :  { %6155 = vmatpush.bf16.msra.mxu1 %v9570_v0 }
 0x50f   :  { %6164 = vmatpush.bf16.msra.mxu2 %v9582_v17 }
 0x511   :  { %5838 = vmatpush.bf16.msrb.mxu3 %v8744_v45 }
 0x513   :  { %6165 = vmatpush.bf16.msra.mxu2 %v9581_v38  ;;  %v9615_v38 = vld [vmem:[#allocation9] ss:$0 sm:$0xff] }
 0x515   :  { %5839 = vmatpush.bf16.msrb.mxu3 %v8728_v24  ;;  %v9569_v24 = vld [vmem:[#allocation7 + $0x40] sm:$0xff] }
 0x516   :  { %6156 = vmatpush.bf16.msra.mxu1 %v9569_v24 }
 0x517   :  { %6166 = vmatpush.bf16.msra.mxu2 %v9580_v22 }
 0x519   :  { %5840 = vmatpush.bf16.msrb.mxu3 %v8712_v58 }
 0x51d   :  { %5841 = vmatpush.bf16.msrb.mxu3 %v8696_v36 }
 0x521   :  { %5842 = vmatpush.bf16.msrb.mxu3 %v8680_v5  ;;  %v5649_v62 = vpop.f32.mrf.mxu0 }
 0x522   :  { %v5650_v11 = vadd.f32 %v5649_v62, %v4992_v49  ;;  %v9579_v62 = vld [vmem:[#allocation7 + $0x90] sm:$0xff] }
 0x523   :  { %6167 = vmatpush.bf16.msra.mxu2 %v9579_v62 }
 0x524   :  { %5843 = vmatmul.bf16.vlgmr.msrb.gmra.mxu3 %v10802_v60 }
 0x525   :  { %6175 = vmatpush.bf16.msra.mxu3 %v9592_v52 }
 0x529   :  { %v5651_v16 = vpop.f32.mrf.mxu0  ;;  %6176 = vmatpush.bf16.msra.mxu3 %v9591_v33 }
 0x52a   :  { %v4994_v16 = vperm.slane %v10818_v41, 2 }
 0x531   :  { %v5662_v34 = vpop.f32.mrf.mxu1  ;;  %v5701_v56 = vpop.f32.mrf.mxu0 }
 0x532   :  { %v5663_v44 = vadd.f32 %v5662_v34, %v5650_v11  ;;  %v5702_v3 = vadd.f32 %v5701_v56, %v4993_v2 }
 0x539   :  { %v5664_v47 = vpop.f32.mrf.mxu1  ;;  %v5703_v19 = vpop.f32.mrf.mxu0 }
 0x53a   :  { %v9578_v19 = vld [vmem:[#allocation7 + $0x88] sm:$0xff] }
 0x53b   :  { %6168 = vmatpush.bf16.msra.mxu2 %v9578_v19  ;;  %v6206_v19 = vlaneseq }
 0x541   :  { %v10812_v28 = vpop.f32.mrf.mxu1 }
 0x542   :  { %v5715_v6 = vadd.f32 %v10812_v28, %v5702_v3 }
 0x543   :  { %v10814_v12 = vpop.f32.mrf.mxu0 }
 0x544   :  { %v5754_v28 = vadd.f32 %v10814_v12, %v4994_v16  ;;  %v9590_v12 = vld [vmem:[#allocation7 + $0xe8] sm:$0xff] }
 0x545   :  { %6177 = vmatpush.bf16.msra.mxu3 %v9590_v12 }
 0x547   :  { %v5675_v57 = vpop.f32.mrf.mxu2 }
 0x548   :  { %v5676_v31 = vadd.f32 %v5675_v57, %v5663_v44  ;;  %v9577_v57 = vld [vmem:[#allocation7 + $0x80] sm:$0xff]  ;;  %v9588_v44 = vld [vmem:[#allocation7 + $0xd8] sm:$0xff] }
 0x549   :  { %v5716_v21 = vpop.f32.mrf.mxu1  ;;  %6169 = vmatpush.bf16.msra.mxu2 %v9577_v57 }
 0x54b   :  { %v5755_v27 = vpop.f32.mrf.mxu0 }
 0x54f   :  { %v5677_v37 = vpop.f32.mrf.mxu2 }
 0x551   :  { %v10816_v60 = vpop.f32.mrf.mxu1 }
 0x552   :  { %v5767_v27 = vadd.f32 %v10816_v60, %v5754_v28  ;;  %v9589_v60 = vld [vmem:[#allocation7 + $0xe0] sm:$0xff]  ;;  %v6207_v28 = vand.u32 127, %v6206_v19 }
 0x553   :  { %6178 = vmatpush.bf16.msra.mxu3 %v9589_v60 }
 0x554   :  { %vm6208_vm10 = vcmp.ge.s32.totalorder %v6207_v28, 64  ;;  %vm6209_vm11 = vcmp.lt.s32.totalorder %v6207_v28, 96 }
 0x555   :  { %vm6210_vm12 = vmand %vm6208_vm10, %vm6209_vm11 }
 0x557   :  { %v5727_v61 = vpop.f32.mrf.mxu2  ;;  %6179 = vmatpush.bf16.msra.mxu3 %v9588_v44 }
 0x558   :  { %v5728_v30 = vadd.f32 %v5727_v61, %v5715_v6 }
 0x559   :  { %v5768_v18 = vpop.f32.mrf.mxu1 }
 0x55b   :  { %6180 = vmatpush.bf16.msra.mxu3 %v9587_v51 }
 0x55f   :  { %v5729_v1 = vpop.f32.mrf.mxu2 }
 0x561   :  { %v10821_v32 = vpop.f32.mrf.mxu0 }
 0x567   :  { %v5688_v50 = vpop.f32.mrf.mxu3 }
 0x568   :  { %v5689_v35 = vadd.f32 %v5688_v50, %v5676_v31  ;;  %v9586_v50 = vld [vmem:[#allocation7 + $0xc8] sm:$0xff] }
 0x569   :  { %v5807_v8 = vpop.f32.mrf.mxu0  ;;  %6181 = vmatpush.bf16.msra.mxu3 %v9586_v50 }
 0x56a   :  { %v5848_v25 = vsub.f32 0.0, %v5689_v35  ;;  %v5779_v63 = vpop.f32.mrf.mxu2  ;;  %v5806_v8 = vadd.f32 %v10821_v32, %v4995_v13 }
 0x56b   :  { %v5780_v15 = vadd.f32 %v5779_v63, %v5767_v27 }
 0x56c   :  { %v5852_v14 = vmul.f32 1.442695, %v5848_v25 }
 0x56d   :  { %6182 = vmatpush.bf16.msra.mxu3 %v9585_v42 }
 0x56e   :  { %9680 = vpow2.f32 %v5852_v14 }
 0x56f   :  { %v5690_v10 = vpop.f32.mrf.mxu3 }
 0x571   :  { %v10824_v55 = vpop.f32.mrf.mxu1 }
 0x572   :  { %v5781_v54 = vpop.f32.mrf.mxu2  ;;  %v5819_v25 = vadd.f32 %v10824_v55, %v5806_v8 }
 0x574   :  { %v9681_v45 = vpop.eup %9680 }
 0x575   :  { %v5860_v7 = vadd.f32 1.0, %v9681_v45 }
 0x577   :  { %9682 = vrcp.f32 %v5860_v7  ;;  %v5740_v58 = vpop.f32.mrf.mxu3 }
 0x578   :  { %v5741_v59 = vadd.f32 %v5740_v58, %v5728_v30 }
 0x579   :  { %v5820_v23 = vpop.f32.mrf.mxu1 }
 0x57a   :  { %v5849_v36 = vsub.f32 0.0, %v5741_v59 }
 0x57c   :  { %v5854_v29 = vmul.f32 1.442695, %v5849_v36 }
 0x57d   :  { %v9683_v5 = vpop.eup %9682 }
 0x57e   :  { %v5868_v34 = vmul.f32 %v9683_v5, %v5689_v35  ;;  %9684 = vpow2.f32 %v5854_v29 }
 0x57f   :  { %v5742_v56 = vpop.f32.mrf.mxu3 }
 0x580   :  { %v5872_v47 = vpack.c.bf16 %v5868_v34, %v5868_v34 }
 0x582   :  { %6144 = vmatmul.bf16.vlgmr.msra.gmra.mxu0 %v5872_v47 }
 0x584   :  { %v9685_v21 = vpop.eup %9684 }
 0x585   :  { %v5861_v48 = vadd.f32 1.0, %v9685_v21 }
 0x587   :  { %9686 = vrcp.f32 %v5861_v48  ;;  %v5792_v37 = vpop.f32.mrf.mxu3 }
 0x588   :  { %v5793_v26 = vadd.f32 %v5792_v37, %v5780_v15  ;;  %v5831_v9 = vpop.f32.mrf.mxu2 }
 0x589   :  { %v5832_v63 = vadd.f32 %v5831_v9, %v5819_v25 }
 0x58a   :  { %v5850_v61 = vsub.f32 0.0, %v5793_v26 }
 0x58c   :  { %v5856_v18 = vmul.f32 1.442695, %v5850_v61 }
 0x58d   :  { %v9687_v20 = vpop.eup %9686 }
 0x58e   :  { %v5869_v40 = vmul.f32 %v9687_v20, %v5741_v59  ;;  %9688 = vpow2.f32 %v5856_v18 }
 0x58f   :  { %v5794_v49 = vpop.f32.mrf.mxu3 }
 0x590   :  { %v5873_v43 = vpack.c.bf16 %v5869_v40, %v5869_v40  ;;  %v5833_v39 = vpop.f32.mrf.mxu2 }
 0x592   :  { %6157 = vmatmul.bf16.vlgmr.msra.gmra.mxu1 %v5873_v43 }
 0x594   :  { %v9689_v11 = vpop.eup %9688 }
 0x595   :  { %v5862_v1 = vadd.f32 1.0, %v9689_v11 }
 0x597   :  { %9690 = vrcp.f32 %v5862_v1 }
 0x59d   :  { %v9691_v31 = vpop.eup %9690 }
 0x59e   :  { %v5870_v35 = vmul.f32 %v9691_v31, %v5793_v26 }
 0x5a0   :  { %v5874_v4 = vpack.c.bf16 %v5870_v35, %v5870_v35 }
 0x5a2   :  { %6170 = vmatmul.bf16.vlgmr.msra.gmra.mxu2 %v5874_v4 }
 0x5a7   :  { %v5844_v14 = vpop.f32.mrf.mxu3 }
 0x5a8   :  { %v5845_v53 = vadd.f32 %v5844_v14, %v5832_v63 }
 0x5aa   :  { %v5851_v46 = vsub.f32 0.0, %v5845_v53 }
 0x5ac   :  { %v5858_v2 = vmul.f32 1.442695, %v5851_v46 }
 0x5ae   :  { %9692 = vpow2.f32 %v5858_v2 }
 0x5af   :  { %v5846_v41 = vpop.f32.mrf.mxu3 }
 0x5b4   :  { %v9693_v10 = vpop.eup %9692 }
 0x5b5   :  { %v5863_v0 = vadd.f32 1.0, %v9693_v10 }
 0x5b7   :  { %9694 = vrcp.f32 %v5863_v0 }
 0x5bd   :  { %v9695_v17 = vpop.eup %9694 }
 0x5be   :  { %v5871_v3 = vmul.f32 %v9695_v17, %v5845_v53 }
 0x5c0   :  { %v5875_v32 = vpack.c.bf16 %v5871_v3, %v5871_v3 }
 0x5c2   :  { %6183 = vmatmul.bf16.vlgmr.msra.gmra.mxu3 %v5875_v32 }
 0x5ff   :  { %v6145_v54 = vpop.f32.mrf.mxu0 }
 0x600   :  { %v6146_v30 = vadd.f32 %v9615_v38, %v6145_v54 }
 0x607   :  { %v6147_v45 = vpop.f32.mrf.mxu0 }
 0x60f   :  { %v6158_v6 = vpop.f32.mrf.mxu1 }
 0x610   :  { %v6159_v58 = vadd.f32 %v6158_v6, %v6146_v30 }
 0x617   :  { %v6160_v55 = vpop.f32.mrf.mxu1 }
 0x625   :  { %v6171_v7 = vpop.f32.mrf.mxu2 }
 0x626   :  { %v6172_v59 = vadd.f32 %v6171_v7, %v6159_v58 }
 0x62d   :  { %v6173_v24 = vpop.f32.mrf.mxu2 }
 0x645   :  { %v6184_v22 = vpop.f32.mrf.mxu3 }
 0x646   :  { %v6185_v36 = vadd.f32 %v6184_v22, %v6172_v59 }
 0x648   :  { %v6189_v23 = vsel %vm6188_vm8, %v6185_v36, -inf }
 0x649   :  { %6190 = vmax.xlane.f32.xlu1 %v6189_v23 }
 0x64d   :  { %v6186_v29 = vpop.f32.mrf.mxu3 }
 0x6bc   :  { %v6191_v5 = vpop.xlane.xlu1 %6190 }
 0x6bd   :  { %v6192_v62 = vsub.f32 %v6185_v36, %v6191_v5 }
 0x6bf   :  { %v6193_v16 = vmul.f32 1.442695, %v6192_v62 }
 0x6c1   :  { %9696 = vpow2.f32 %v6193_v16 }
 0x6c7   :  { %v9697_v34 = vpop.eup %9696 }
 0x6c8   :  { %6196 = vrot.lane.b32.xlu2 %v9697_v34, %s9830_s2 }
 0x722   :  { %v6197_v56 = vpop.permute.xlu2 %6196 }
 0x723   :  { %v6200_v47 = vsel %vm6199_vm9, %v6197_v56, 0.0 }
 0x724   :  { %6201 = vadd.xlane.f32.xlu2 %v6200_v47 }
 0x797   :  { %v6202_v52 = vpop.xlane.xlu2 %6201 }
 0x798   :  { %9698 = vlog2.f32 %v6202_v52 }
 0x79e   :  { %v9699_v57 = vpop.eup %9698 }
 0x79f   :  { %v6204_v21 = vmul.f32 0.6931472, %v9699_v57 }
 0x7a1   :  { %v6205_v27 = vadd.f32 %v6204_v21, %v6191_v5 }
 0x7a3   :  { %v6211_v48 = vsub.f32 %v6185_v36, %v6205_v27 }
 0x7a5   :  { %v6212_v15 = vsel %vm6210_vm12, %v6211_v48, %v6185_v36 }
 0x7a6   :  { %6213 = vst [vmem:[%s10843_s6] sm:$0xff] %v6212_v15 }
 0x7a7   :  { %6218 = vsyncpa [#allocation3], 1 }
 0x7a8   :  { %6219 = vsyncpa [#allocation5], 1 }
 0x7a9   :  { %6220 = vsyncpa [#allocation8], 1 }

</bundles_post_ra>
